<compile_context>
chip_gen: v7x
topology: tpu7x:2x2x1
jax: 0.10.0
libtpu: 0.0.40
codegen_flags: <defaults>
</compile_context>

<pallas_src>
import functools

import jax
import jax.numpy as jnp
from jax.experimental import pallas as pl
from jax.experimental.pallas import tpu as pltpu


# --------------------------------------------------------------------------
# Kernel 1: row-tiled matmul + bias.
# Used for the hoisted input projection of a whole layer (both directions):
#   (T*B, D_in) @ (D_in, 8H) + b -> (T*B, 8H)
# --------------------------------------------------------------------------
def _matmul_bias_kernel(x_ref, w_ref, b_ref, o_ref):
    o_ref[...] = (jnp.dot(x_ref[...], w_ref[...],
                          preferred_element_type=jnp.float32) + b_ref[...])


def matmul_bias(x, w, b, row_block=256):
    N, Din = x.shape
    Dout = w.shape[1]
    rb = N if N <= row_block else row_block
    return pl.pallas_call(
        _matmul_bias_kernel,
        out_shape=jax.ShapeDtypeStruct((N, Dout), jnp.float32),
        grid=(pl.cdiv(N, rb),),
        in_specs=[
            pl.BlockSpec((rb, Din), lambda i: (i, 0)),
            pl.BlockSpec((Din, Dout), lambda i: (0, 0)),
            pl.BlockSpec((1, Dout), lambda i: (0, 0)),
        ],
        out_specs=pl.BlockSpec((rb, Dout), lambda i: (i, 0)),
        compiler_params=pltpu.CompilerParams(
            dimension_semantics=("parallel",)),
    )(x, w, b)


# --------------------------------------------------------------------------
# Kernel 2: fused bidirectional LSTM recurrence (optionally + classifier).
#
#   gin_ref : (T*B, 8H)  precomputed x @ W_ih + b, columns = [fwd i,f,g,o | bwd i,f,g,o]
#   whh_ref : (2H, 8H)   block-diagonal [[w_hh_f, 0], [0, w_hh_b]]
#   output  : hidden (T*B, 2H)  (intermediate layers)
#             logits (T*B, 2)   (last layer, classifier fused)
# --------------------------------------------------------------------------
def _bilstm_kernel(with_classifier, *refs):
    if with_classifier:
        gin_ref, whh_ref, wc_ref, bc_ref, logits_ref, hid_ref, h_scr, c_scr = refs
    else:
        gin_ref, whh_ref, hid_ref, h_scr, c_scr = refs

    B, H2 = h_scr.shape
    H = H2 // 2
    G4 = 4 * H
    TB = gin_ref.shape[0]
    T = TB // B

    h_scr[...] = jnp.zeros_like(h_scr)
    c_scr[...] = jnp.zeros_like(c_scr)

    whh = whh_ref[...]                      # (2H, 8H) hoisted out of the loop

    # Lane mask selecting the 'g' (tanh) gate within each direction's [i,f,g,o]
    # block; everything else gets sigmoid.  Built once, reused every step.
    col = jax.lax.broadcasted_iota(jnp.int32, (B, G4), 1)
    g_mask = (col >= 2 * H) & (col < 3 * H)

    def step(s, carry):
        del carry
        h = h_scr[...]                      # (B, 2H) = [h_fwd | h_bwd]
        c = c_scr[...]                      # (B, 2H) = [c_fwd | c_bwd]

        # One 256-wide recurrent matmul for both directions.
        rec = jnp.dot(h, whh, preferred_element_type=jnp.float32)      # (B, 8H)

        row_f = s * B                       # time index s        (forward)
        row_b = (T - 1 - s) * B             # time index T-1-s    (backward)
        gin_f = gin_ref[pl.ds(row_f, B), :]                              # (B, 8H)
        gin_b = gin_ref[pl.ds(row_b, B), :]                              # (B, 8H)

        gates_f = rec[:, :G4] + gin_f[:, :G4]                            # (B, 4H)
        gates_b = rec[:, G4:] + gin_b[:, G4:]                            # (B, 4H)

        act_f = jnp.where(g_mask, jnp.tanh(gates_f), jax.nn.sigmoid(gates_f))
        act_b = jnp.where(g_mask, jnp.tanh(gates_b), jax.nn.sigmoid(gates_b))

        # c_new = f*c + i*g ; h_new = o*tanh(c_new)   (gate order [i,f,g,o])
        c_f = act_f[:, H:2 * H] * c[:, :H] + act_f[:, :H] * act_f[:, 2 * H:3 * H]
        c_b = act_b[:, H:2 * H] * c[:, H:] + act_b[:, :H] * act_b[:, 2 * H:3 * H]
        h_f = act_f[:, 3 * H:] * jnp.tanh(c_f)
        h_b = act_b[:, 3 * H:] * jnp.tanh(c_b)

        c_scr[:, :H] = c_f
        c_scr[:, H:] = c_b
        h_scr[:, :H] = h_f
        h_scr[:, H:] = h_b

        # Write both directions directly into the concatenated (T*B, 2H) slab.
        hid_ref[pl.ds(row_f, B), :H] = h_f
        hid_ref[pl.ds(row_b, B), H:] = h_b
        return 0

    jax.lax.fori_loop(0, T, step, 0, unroll=True if T <= 32 else False)

    if with_classifier:
        # Classifier fused on the VMEM-resident hidden slab.
        logits_ref[...] = (jnp.dot(hid_ref[...], wc_ref[...],
                                   preferred_element_type=jnp.float32)
                           + bc_ref[...])


def bilstm_layer(gin, w_hh, *, batch, w_cls=None, b_cls=None):
    """One fused bidirectional LSTM layer.

    gin:   (T*B, 8H) precomputed input projections (both directions).
    w_hh:  (2H, 8H)  block-diagonal recurrent weights.
    Returns (T*B, 2H) hidden slab, or (T*B, n_cls) logits if w_cls is given.
    """
    TB, G8 = gin.shape
    H = G8 // 8
    H2 = 2 * H
    with_classifier = w_cls is not None

    in_specs = [
        pl.BlockSpec((TB, G8), lambda i: (0, 0)),
        pl.BlockSpec((H2, G8), lambda i: (0, 0)),
    ]
    inputs = (gin, w_hh)
    scratch = [
        pltpu.VMEM((batch, H2), jnp.float32),   # h state
        pltpu.VMEM((batch, H2), jnp.float32),   # c state
    ]

    if with_classifier:
        n_cls = w_cls.shape[1]
        in_specs += [
            pl.BlockSpec((H2, n_cls), lambda i: (0, 0)),
            pl.BlockSpec((1, n_cls), lambda i: (0, 0)),
        ]
        inputs += (w_cls, b_cls)
        out_shape = jax.ShapeDtypeStruct((TB, n_cls), jnp.float32)
        out_spec = pl.BlockSpec((TB, n_cls), lambda i: (0, 0))
        scratch = [pltpu.VMEM((TB, H2), jnp.float32)] + scratch  # hidden slab
    else:
        out_shape = jax.ShapeDtypeStruct((TB, H2), jnp.float32)
        out_spec = pl.BlockSpec((TB, H2), lambda i: (0, 0))

    return pl.pallas_call(
        functools.partial(_bilstm_kernel, with_classifier),
        out_shape=out_shape,
        grid_spec=pltpu.PrefetchScalarGridSpec(
            num_scalar_prefetch=0,
            grid=(1,),
            in_specs=in_specs,
            out_specs=out_spec,
            scratch_shapes=scratch,
        ),
        compiler_params=pltpu.CompilerParams(
            dimension_semantics=("arbitrary",)),   # single step, serial recurrence inside
    )(*inputs)


# --------------------------------------------------------------------------
# Parameters & forward
# --------------------------------------------------------------------------
def init_params(key, vocab_size, char_dim, hidden_size, num_layers):
    H = hidden_size
    params = {}

    key, k_emb = jax.random.split(key)
    emb = 0.1 * jax.random.normal(k_emb, (vocab_size + 1, char_dim), jnp.float32)
    emb = emb.at[0].set(0.0)                       # padding_idx=0 -> zero row
    params["embedding"] = emb

    lstm = []
    for layer in range(num_layers):
        d_in = char_dim if layer == 0 else 2 * H
        dir_w_ih, dir_w_hh, dir_b = [], [], []
        for _ in range(2):                          # forward, backward
            key, k1, k2, k3 = jax.random.split(key, 4)
            w_ih = 0.1 * jax.random.normal(k1, (d_in, 4 * H), jnp.float32)
            w_hh = 0.1 * jax.random.normal(k2, (H, 4 * H), jnp.float32)
            b = 0.1 * jax.random.normal(k3, (1, 4 * H), jnp.float32)   # b_ih + b_hh
            dir_w_ih.append(w_ih)
            dir_w_hh.append(w_hh)
            dir_b.append(b)

        # Fused input-projection weights/bias: columns = [fwd 4H | bwd 4H].
        w_ih_fused = jnp.concatenate(dir_w_ih, axis=1)          # (d_in, 8H)
        b_fused = jnp.concatenate(dir_b, axis=1)                # (1, 8H)
        # Block-diagonal recurrent weights: h=[h_f|h_b] (B,2H) @ (2H,8H).
        w_hh_fused = jnp.zeros((2 * H, 8 * H), jnp.float32)
        w_hh_fused = w_hh_fused.at[:H, :4 * H].set(dir_w_hh[0])
        w_hh_fused = w_hh_fused.at[H:, 4 * H:].set(dir_w_hh[1])
        lstm.append((w_ih_fused, w_hh_fused, b_fused))
    params["lstm"] = lstm

    key, kw, kb = jax.random.split(key, 3)
    params["classify_w"] = 0.1 * jax.random.normal(kw, (2 * H, 2), jnp.float32)
    params["classify_b"] = 0.1 * jax.random.normal(kb, (1, 2), jnp.float32)
    return params


def forward(params, x_ids):
    """x_ids: int32 (B, T) token ids -> logits (B, T, 2)."""
    B, T = x_ids.shape
    x = jnp.take(params["embedding"], x_ids, axis=0)            # (B, T, D)  glue
    h = jnp.transpose(x, (1, 0, 2)).reshape(T * B, -1)          # time-major (T*B, D)

    num_layers = len(params["lstm"])
    logits_flat = None
    for li, (w_ih, w_hh, b) in enumerate(params["lstm"]):
        gin = matmul_bias(h, w_ih, b)                           # (T*B, 8H) hoisted proj
        if li == num_layers - 1:
            logits_flat = bilstm_layer(gin, w_hh, batch=B,
                                       w_cls=params["classify_w"],
                                       b_cls=params["classify_b"])   # (T*B, 2)
        else:
            h = bilstm_layer(gin, w_hh, batch=B)                # (T*B, 2H)

    logits = jnp.transpose(logits_flat.reshape(T, B, 2), (1, 0, 2))  # (B, T, 2)
    return logits


if __name__ == "__main__":
    vocab_size = 10
    char_dim = 16
    hidden_size = 32
    num_layers = 2
    B, T = 2, 8

    key = jax.random.PRNGKey(0)
    k_params, k_x = jax.random.split(key)
    params = init_params(k_params, vocab_size, char_dim, hidden_size, num_layers)
    x_ids = jax.random.randint(k_x, (B, T), 0, vocab_size + 1, dtype=jnp.int32)

    fwd = jax.jit(forward)
    out = jax.block_until_ready(fwd(params, x_ids))
    assert out.shape == (B, T, 2), out.shape
    assert bool(jnp.all(jnp.isfinite(out)))
    print("KERNEL_OK")
</pallas_src>

<mosaic_0001>
module attributes {stable_mosaic.version = 11 : i64} {
  func.func @_matmul_bias_kernel(%arg0: i32, %arg1: memref<16x16xf32, #tpu.memory_space<vmem>>, %arg2: memref<16x256xf32, #tpu.memory_space<vmem>>, %arg3: memref<1x256xf32, #tpu.memory_space<vmem>>, %arg4: memref<16x256xf32, #tpu.memory_space<vmem>>) attributes {dimension_semantics = [#tpu.dimension_semantics<parallel>], iteration_bounds = array<i64: 1>, scalar_prefetch = 0 : i64, scratch_operands = 0 : i64, tpu.core_type = #tpu.core_type<tc>, window_params = [{transform_indices = @transform_0, window_bounds = array<i64: 16, 16>}, {pipeline_mode = #tpu.pipeline_mode<synchronous>, transform_indices = @transform_1, window_bounds = array<i64: 16, 256>}, {pipeline_mode = #tpu.pipeline_mode<synchronous>, transform_indices = @transform_2, window_bounds = array<i64: 1, 256>}, {transform_indices = @transform_3, window_bounds = array<i64: 16, 256>}]} {
    %c0 = arith.constant 0 : index
    %c0_0 = arith.constant 0 : index
    %0 = vector.load %arg1[%c0, %c0_0] : memref<16x16xf32, #tpu.memory_space<vmem>>, vector<16x16xf32>
    %c0_1 = arith.constant 0 : index
    %c0_2 = arith.constant 0 : index
    %1 = vector.load %arg2[%c0_1, %c0_2] : memref<16x256xf32, #tpu.memory_space<vmem>>, vector<16x256xf32>
    %cst = arith.constant dense<0.000000e+00> : vector<16x256xf32>
    %2 = tpu.matmul %0, %1, %cst {dimension_numbers = #tpu.dot_dimension_numbers<[1], [0], [0], [1], [0, 0, 1, 1], [], []>} : vector<16x16xf32>, vector<16x256xf32>, vector<16x256xf32> -> vector<16x256xf32>
    %c0_3 = arith.constant 0 : index
    %c0_4 = arith.constant 0 : index
    %3 = vector.load %arg3[%c0_3, %c0_4] : memref<1x256xf32, #tpu.memory_space<vmem>>, vector<1x256xf32>
    %4 = vector.broadcast %3 : vector<1x256xf32> to vector<16x256xf32>
    %5 = arith.addf %2, %4 : vector<16x256xf32>
    %c0_5 = arith.constant 0 : index
    %c0_6 = arith.constant 0 : index
    %6 = vector.load %arg4[%c0_5, %c0_6] : memref<16x256xf32, #tpu.memory_space<vmem>>, vector<16x256xf32>
    tpu.vector_store %arg4[%c0_5, %c0_6], %5 {strides = array<i32>} : memref<16x256xf32, #tpu.memory_space<vmem>>, vector<16x256xf32>,
    return
  }
  func.func @transform_0(%arg0: i32) -> (i32, i32) {
    %c0_i32 = arith.constant 0 : i32
    %c0_i32_0 = arith.constant 0 : i32
    return %arg0, %c0_i32 : i32, i32
  }
  func.func @transform_1(%arg0: i32) -> (i32, i32) {
    %c0_i32 = arith.constant 0 : i32
    %c0_i32_0 = arith.constant 0 : i32
    %c0_i32_1 = arith.constant 0 : i32
    return %c0_i32, %c0_i32_0 : i32, i32
  }
  func.func @transform_2(%arg0: i32) -> (i32, i32) {
    %c0_i32 = arith.constant 0 : i32
    %c0_i32_0 = arith.constant 0 : i32
    %c0_i32_1 = arith.constant 0 : i32
    return %c0_i32, %c0_i32_0 : i32, i32
  }
  func.func @transform_3(%arg0: i32) -> (i32, i32) {
    %c0_i32 = arith.constant 0 : i32
    %c0_i32_0 = arith.constant 0 : i32
    return %arg0, %c0_i32 : i32, i32
  }
}

module attributes {stable_mosaic.version = 11 : i64} {
  func.func @_matmul_bias_kernel(%arg0: i32, %arg1: memref<16x64xf32, #tpu.memory_space<vmem>>, %arg2: memref<64x256xf32, #tpu.memory_space<vmem>>, %arg3: memref<1x256xf32, #tpu.memory_space<vmem>>, %arg4: memref<16x256xf32, #tpu.memory_space<vmem>>) attributes {dimension_semantics = [#tpu.dimension_semantics<parallel>], iteration_bounds = array<i64: 1>, scalar_prefetch = 0 : i64, scratch_operands = 0 : i64, tpu.core_type = #tpu.core_type<tc>, window_params = [{transform_indices = @transform_0, window_bounds = array<i64: 16, 64>}, {pipeline_mode = #tpu.pipeline_mode<synchronous>, transform_indices = @transform_1, window_bounds = array<i64: 64, 256>}, {pipeline_mode = #tpu.pipeline_mode<synchronous>, transform_indices = @transform_2, window_bounds = array<i64: 1, 256>}, {transform_indices = @transform_3, window_bounds = array<i64: 16, 256>}]} {
    %c0 = arith.constant 0 : index
    %c0_0 = arith.constant 0 : index
    %0 = vector.load %arg1[%c0, %c0_0] : memref<16x64xf32, #tpu.memory_space<vmem>>, vector<16x64xf32>
    %c0_1 = arith.constant 0 : index
    %c0_2 = arith.constant 0 : index
    %1 = vector.load %arg2[%c0_1, %c0_2] : memref<64x256xf32, #tpu.memory_space<vmem>>, vector<64x256xf32>
    %cst = arith.constant dense<0.000000e+00> : vector<16x256xf32>
    %2 = tpu.matmul %0, %1, %cst {dimension_numbers = #tpu.dot_dimension_numbers<[1], [0], [0], [1], [0, 0, 1, 1], [], []>} : vector<16x64xf32>, vector<64x256xf32>, vector<16x256xf32> -> vector<16x256xf32>
    %c0_3 = arith.constant 0 : index
    %c0_4 = arith.constant 0 : index
    %3 = vector.load %arg3[%c0_3, %c0_4] : memref<1x256xf32, #tpu.memory_space<vmem>>, vector<1x256xf32>
    %4 = vector.broadcast %3 : vector<1x256xf32> to vector<16x256xf32>
    %5 = arith.addf %2, %4 : vector<16x256xf32>
    %c0_5 = arith.constant 0 : index
    %c0_6 = arith.constant 0 : index
    %6 = vector.load %arg4[%c0_5, %c0_6] : memref<16x256xf32, #tpu.memory_space<vmem>>, vector<16x256xf32>
    tpu.vector_store %arg4[%c0_5, %c0_6], %5 {strides = array<i32>} : memref<16x256xf32, #tpu.memory_space<vmem>>, vector<16x256xf32>,
    return
  }
  func.func @transform_0(%arg0: i32) -> (i32, i32) {
    %c0_i32 = arith.constant 0 : i32
    %c0_i32_0 = arith.constant 0 : i32
    return %arg0, %c0_i32 : i32, i32
  }
  func.func @transform_1(%arg0: i32) -> (i32, i32) {
    %c0_i32 = arith.constant 0 : i32
    %c0_i32_0 = arith.constant 0 : i32
    %c0_i32_1 = arith.constant 0 : i32
    return %c0_i32, %c0_i32_0 : i32, i32
  }
  func.func @transform_2(%arg0: i32) -> (i32, i32) {
    %c0_i32 = arith.constant 0 : i32
    %c0_i32_0 = arith.constant 0 : i32
    %c0_i32_1 = arith.constant 0 : i32
    return %c0_i32, %c0_i32_0 : i32, i32
  }
  func.func @transform_3(%arg0: i32) -> (i32, i32) {
    %c0_i32 = arith.constant 0 : i32
    %c0_i32_0 = arith.constant 0 : i32
    return %arg0, %c0_i32 : i32, i32
  }
}

module attributes {stable_mosaic.version = 11 : i64} {
  func.func @_bilstm_kernel(%arg0: i32, %arg1: memref<16x256xf32, #tpu.memory_space<vmem>>, %arg2: memref<64x256xf32, #tpu.memory_space<vmem>>, %arg3: memref<16x64xf32, #tpu.memory_space<vmem>>, %arg4: memref<2x64xf32, #tpu.memory_space<vmem>>, %arg5: memref<2x64xf32, #tpu.memory_space<vmem>>) attributes {dimension_semantics = [#tpu.dimension_semantics<arbitrary>], iteration_bounds = array<i64: 1>, scalar_prefetch = 0 : i64, scratch_operands = 2 : i64, tpu.core_type = #tpu.core_type<tc>, window_params = [{pipeline_mode = #tpu.pipeline_mode<synchronous>, transform_indices = @transform_0, window_bounds = array<i64: 16, 256>}, {pipeline_mode = #tpu.pipeline_mode<synchronous>, transform_indices = @transform_1, window_bounds = array<i64: 64, 256>}, {pipeline_mode = #tpu.pipeline_mode<synchronous>, transform_indices = @transform_2, window_bounds = array<i64: 16, 64>}]} {
    %cst = arith.constant 0.000000e+00 : f32
    %0 = vector.broadcast %cst : f32 to vector<2x64xf32>
    %c0 = arith.constant 0 : index
    %c0_0 = arith.constant 0 : index
    %1 = vector.load %arg4[%c0, %c0_0] : memref<2x64xf32, #tpu.memory_space<vmem>>, vector<2x64xf32>
    tpu.vector_store %arg4[%c0, %c0_0], %0 {strides = array<i32>} : memref<2x64xf32, #tpu.memory_space<vmem>>, vector<2x64xf32>,
    %cst_1 = arith.constant 0.000000e+00 : f32
    %2 = vector.broadcast %cst_1 : f32 to vector<2x64xf32>
    %c0_2 = arith.constant 0 : index
    %c0_3 = arith.constant 0 : index
    %3 = vector.load %arg5[%c0_2, %c0_3] : memref<2x64xf32, #tpu.memory_space<vmem>>, vector<2x64xf32>
    tpu.vector_store %arg5[%c0_2, %c0_3], %2 {strides = array<i32>} : memref<2x64xf32, #tpu.memory_space<vmem>>, vector<2x64xf32>,
    %c0_4 = arith.constant 0 : index
    %c0_5 = arith.constant 0 : index
    %4 = vector.load %arg2[%c0_4, %c0_5] : memref<64x256xf32, #tpu.memory_space<vmem>>, vector<64x256xf32>
    %5 = tpu.iota {dimensions = array<i32: 1>} : vector<2x128xi32>
    %c64_i32 = arith.constant 64 : i32
    %6 = vector.broadcast %c64_i32 : i32 to vector<2x128xi32>
    %7 = arith.cmpi sge, %5, %6 : vector<2x128xi32>
    %c96_i32 = arith.constant 96 : i32
    %8 = vector.broadcast %c96_i32 : i32 to vector<2x128xi32>
    %9 = arith.cmpi slt, %5, %8 : vector<2x128xi32>
    %10 = arith.andi %7, %9 : vector<2x128xi1>
    %c0_i32 = arith.constant 0 : i32
    %c0_6 = arith.constant 0 : index
    %c0_7 = arith.constant 0 : index
    %11 = vector.load %arg4[%c0_6, %c0_7] : memref<2x64xf32, #tpu.memory_space<vmem>>, vector<2x64xf32>
    %c0_8 = arith.constant 0 : index
    %c0_9 = arith.constant 0 : index
    %12 = vector.load %arg5[%c0_8, %c0_9] : memref<2x64xf32, #tpu.memory_space<vmem>>, vector<2x64xf32>
    %cst_10 = arith.constant dense<0.000000e+00> : vector<2x256xf32>
    %13 = tpu.matmul %11, %4, %cst_10 {dimension_numbers = #tpu.dot_dimension_numbers<[1], [0], [0], [1], [0, 0, 1, 1], [], []>} : vector<2x64xf32>, vector<64x256xf32>, vector<2x256xf32> -> vector<2x256xf32>
    %c2_i32 = arith.constant 2 : i32
    %14 = arith.muli %c0_i32, %c2_i32 : i32
    %c7_i32 = arith.constant 7 : i32
    %15 = arith.subi %c7_i32, %c0_i32 : i32
    %c2_i32_11 = arith.constant 2 : i32
    %16 = arith.muli %15, %c2_i32_11 : i32
    %17 = arith.index_cast %14 : i32 to index
    %c0_12 = arith.constant 0 : index
    %18 = vector.load %arg1[%17, %c0_12] : memref<16x256xf32, #tpu.memory_space<vmem>>, vector<2x256xf32>
    %19 = arith.index_cast %16 : i32 to index
    %c0_13 = arith.constant 0 : index
    %20 = vector.load %arg1[%19, %c0_13] : memref<16x256xf32, #tpu.memory_space<vmem>>, vector<2x256xf32>
    %21 = vector.extract_strided_slice %13 {offsets = [0, 0], sizes = [2, 128], strides = [1, 1]} : vector<2x256xf32> to vector<2x128xf32>
    %22 = vector.extract_strided_slice %18 {offsets = [0, 0], sizes = [2, 128], strides = [1, 1]} : vector<2x256xf32> to vector<2x128xf32>
    %23 = arith.addf %21, %22 : vector<2x128xf32>
    %24 = vector.extract_strided_slice %13 {offsets = [0, 128], sizes = [2, 128], strides = [1, 1]} : vector<2x256xf32> to vector<2x128xf32>
    %25 = vector.extract_strided_slice %20 {offsets = [0, 128], sizes = [2, 128], strides = [1, 1]} : vector<2x256xf32> to vector<2x128xf32>
    %26 = arith.addf %24, %25 : vector<2x128xf32>
    %27 = math.tanh %23 : vector<2x128xf32>
    %28 = arith.negf %23 : vector<2x128xf32>
    %29 = math.exp %28 : vector<2x128xf32>
    %cst_14 = arith.constant 1.000000e+00 : f32
    %30 = vector.broadcast %cst_14 : f32 to vector<2x128xf32>
    %31 = arith.addf %30, %29 : vector<2x128xf32>
    %32 = arith.divf %30, %31 : vector<2x128xf32>
    %33 = arith.select %10, %27, %32 : vector<2x128xi1>, vector<2x128xf32>
    %34 = math.tanh %26 : vector<2x128xf32>
    %35 = arith.negf %26 : vector<2x128xf32>
    %36 = math.exp %35 : vector<2x128xf32>
    %cst_15 = arith.constant 1.000000e+00 : f32
    %37 = vector.broadcast %cst_15 : f32 to vector<2x128xf32>
    %38 = arith.addf %37, %36 : vector<2x128xf32>
    %39 = arith.divf %37, %38 : vector<2x128xf32>
    %40 = arith.select %10, %34, %39 : vector<2x128xi1>, vector<2x128xf32>
    %41 = vector.extract_strided_slice %33 {offsets = [0, 32], sizes = [2, 32], strides = [1, 1]} : vector<2x128xf32> to vector<2x32xf32>
    %42 = vector.extract_strided_slice %12 {offsets = [0, 0], sizes = [2, 32], strides = [1, 1]} : vector<2x64xf32> to vector<2x32xf32>
    %43 = arith.mulf %41, %42 : vector<2x32xf32>
    %44 = vector.extract_strided_slice %33 {offsets = [0, 0], sizes = [2, 32], strides = [1, 1]} : vector<2x128xf32> to vector<2x32xf32>
    %45 = vector.extract_strided_slice %33 {offsets = [0, 64], sizes = [2, 32], strides = [1, 1]} : vector<2x128xf32> to vector<2x32xf32>
    %46 = arith.mulf %44, %45 : vector<2x32xf32>
    %47 = arith.addf %43, %46 : vector<2x32xf32>
    %48 = vector.extract_strided_slice %40 {offsets = [0, 32], sizes = [2, 32], strides = [1, 1]} : vector<2x128xf32> to vector<2x32xf32>
    %49 = vector.extract_strided_slice %12 {offsets = [0, 32], sizes = [2, 32], strides = [1, 1]} : vector<2x64xf32> to vector<2x32xf32>
    %50 = arith.mulf %48, %49 : vector<2x32xf32>
    %51 = vector.extract_strided_slice %40 {offsets = [0, 0], sizes = [2, 32], strides = [1, 1]} : vector<2x128xf32> to vector<2x32xf32>
    %52 = vector.extract_strided_slice %40 {offsets = [0, 64], sizes = [2, 32], strides = [1, 1]} : vector<2x128xf32> to vector<2x32xf32>
    %53 = arith.mulf %51, %52 : vector<2x32xf32>
    %54 = arith.addf %50, %53 : vector<2x32xf32>
    %55 = vector.extract_strided_slice %33 {offsets = [0, 96], sizes = [2, 32], strides = [1, 1]} : vector<2x128xf32> to vector<2x32xf32>
    %56 = math.tanh %47 : vector<2x32xf32>
    %57 = arith.mulf %55, %56 : vector<2x32xf32>
    %58 = vector.extract_strided_slice %40 {offsets = [0, 96], sizes = [2, 32], strides = [1, 1]} : vector<2x128xf32> to vector<2x32xf32>
    %59 = math.tanh %54 : vector<2x32xf32>
    %60 = arith.mulf %58, %59 : vector<2x32xf32>
    %c0_16 = arith.constant 0 : index
    %c0_17 = arith.constant 0 : index
    %61 = vector.load %arg5[%c0_16, %c0_17] : memref<2x64xf32, #tpu.memory_space<vmem>>, vector<2x32xf32>
    tpu.vector_store %arg5[%c0_16, %c0_17], %47 {strides = array<i32>} : memref<2x64xf32, #tpu.memory_space<vmem>>, vector<2x32xf32>,
    %c0_18 = arith.constant 0 : index
    %c32 = arith.constant 32 : index
    %62 = vector.load %arg5[%c0_18, %c32] : memref<2x64xf32, #tpu.memory_space<vmem>>, vector<2x32xf32>
    tpu.vector_store %arg5[%c0_18, %c32], %54 {strides = array<i32>} : memref<2x64xf32, #tpu.memory_space<vmem>>, vector<2x32xf32>,
    %c0_19 = arith.constant 0 : index
    %c0_20 = arith.constant 0 : index
    %63 = vector.load %arg4[%c0_19, %c0_20] : memref<2x64xf32, #tpu.memory_space<vmem>>, vector<2x32xf32>
    tpu.vector_store %arg4[%c0_19, %c0_20], %57 {strides = array<i32>} : memref<2x64xf32, #tpu.memory_space<vmem>>, vector<2x32xf32>,
    %c0_21 = arith.constant 0 : index
    %c32_22 = arith.constant 32 : index
    %64 = vector.load %arg4[%c0_21, %c32_22] : memref<2x64xf32, #tpu.memory_space<vmem>>, vector<2x32xf32>
    tpu.vector_store %arg4[%c0_21, %c32_22], %60 {strides = array<i32>} : memref<2x64xf32, #tpu.memory_space<vmem>>, vector<2x32xf32>,
    %65 = arith.index_cast %14 : i32 to index
    %c0_23 = arith.constant 0 : index
    %66 = vector.load %arg3[%65, %c0_23] : memref<16x64xf32, #tpu.memory_space<vmem>>, vector<2x32xf32>
    tpu.vector_store %arg3[%65, %c0_23], %57 {strides = array<i32>} : memref<16x64xf32, #tpu.memory_space<vmem>>, vector<2x32xf32>,
    %67 = arith.index_cast %16 : i32 to index
    %c32_24 = arith.constant 32 : index
    %68 = vector.load %arg3[%67, %c32_24] : memref<16x64xf32, #tpu.memory_space<vmem>>, vector<2x32xf32>
    tpu.vector_store %arg3[%67, %c32_24], %60 {strides = array<i32>} : memref<16x64xf32, #tpu.memory_space<vmem>>, vector<2x32xf32>,
    %c1_i32 = arith.constant 1 : i32
    %c0_25 = arith.constant 0 : index
    %c0_26 = arith.constant 0 : index
    %69 = vector.load %arg4[%c0_25, %c0_26] : memref<2x64xf32, #tpu.memory_space<vmem>>, vector<2x64xf32>
    %c0_27 = arith.constant 0 : index
    %c0_28 = arith.constant 0 : index
    %70 = vector.load %arg5[%c0_27, %c0_28] : memref<2x64xf32, #tpu.memory_space<vmem>>, vector<2x64xf32>
    %cst_29 = arith.constant dense<0.000000e+00> : vector<2x256xf32>
    %71 = tpu.matmul %69, %4, %cst_29 {dimension_numbers = #tpu.dot_dimension_numbers<[1], [0], [0], [1], [0, 0, 1, 1], [], []>} : vector<2x64xf32>, vector<64x256xf32>, vector<2x256xf32> -> vector<2x256xf32>
    %c2_i32_30 = arith.constant 2 : i32
    %72 = arith.muli %c1_i32, %c2_i32_30 : i32
    %c7_i32_31 = arith.constant 7 : i32
    %73 = arith.subi %c7_i32_31, %c1_i32 : i32
    %c2_i32_32 = arith.constant 2 : i32
    %74 = arith.muli %73, %c2_i32_32 : i32
    %75 = arith.index_cast %72 : i32 to index
    %c0_33 = arith.constant 0 : index
    %76 = vector.load %arg1[%75, %c0_33] : memref<16x256xf32, #tpu.memory_space<vmem>>, vector<2x256xf32>
    %77 = arith.index_cast %74 : i32 to index
    %c0_34 = arith.constant 0 : index
    %78 = vector.load %arg1[%77, %c0_34] : memref<16x256xf32, #tpu.memory_space<vmem>>, vector<2x256xf32>
    %79 = vector.extract_strided_slice %71 {offsets = [0, 0], sizes = [2, 128], strides = [1, 1]} : vector<2x256xf32> to vector<2x128xf32>
    %80 = vector.extract_strided_slice %76 {offsets = [0, 0], sizes = [2, 128], strides = [1, 1]} : vector<2x256xf32> to vector<2x128xf32>
    %81 = arith.addf %79, %80 : vector<2x128xf32>
    %82 = vector.extract_strided_slice %71 {offsets = [0, 128], sizes = [2, 128], strides = [1, 1]} : vector<2x256xf32> to vector<2x128xf32>
    %83 = vector.extract_strided_slice %78 {offsets = [0, 128], sizes = [2, 128], strides = [1, 1]} : vector<2x256xf32> to vector<2x128xf32>
    %84 = arith.addf %82, %83 : vector<2x128xf32>
    %85 = math.tanh %81 : vector<2x128xf32>
    %86 = arith.negf %81 : vector<2x128xf32>
    %87 = math.exp %86 : vector<2x128xf32>
    %cst_35 = arith.constant 1.000000e+00 : f32
    %88 = vector.broadcast %cst_35 : f32 to vector<2x128xf32>
    %89 = arith.addf %88, %87 : vector<2x128xf32>
    %90 = arith.divf %88, %89 : vector<2x128xf32>
    %91 = arith.select %10, %85, %90 : vector<2x128xi1>, vector<2x128xf32>
    %92 = math.tanh %84 : vector<2x128xf32>
    %93 = arith.negf %84 : vector<2x128xf32>
    %94 = math.exp %93 : vector<2x128xf32>
    %cst_36 = arith.constant 1.000000e+00 : f32
    %95 = vector.broadcast %cst_36 : f32 to vector<2x128xf32>
    %96 = arith.addf %95, %94 : vector<2x128xf32>
    %97 = arith.divf %95, %96 : vector<2x128xf32>
    %98 = arith.select %10, %92, %97 : vector<2x128xi1>, vector<2x128xf32>
    %99 = vector.extract_strided_slice %91 {offsets = [0, 32], sizes = [2, 32], strides = [1, 1]} : vector<2x128xf32> to vector<2x32xf32>
    %100 = vector.extract_strided_slice %70 {offsets = [0, 0], sizes = [2, 32], strides = [1, 1]} : vector<2x64xf32> to vector<2x32xf32>
    %101 = arith.mulf %99, %100 : vector<2x32xf32>
    %102 = vector.extract_strided_slice %91 {offsets = [0, 0], sizes = [2, 32], strides = [1, 1]} : vector<2x128xf32> to vector<2x32xf32>
    %103 = vector.extract_strided_slice %91 {offsets = [0, 64], sizes = [2, 32], strides = [1, 1]} : vector<2x128xf32> to vector<2x32xf32>
    %104 = arith.mulf %102, %103 : vector<2x32xf32>
    %105 = arith.addf %101, %104 : vector<2x32xf32>
    %106 = vector.extract_strided_slice %98 {offsets = [0, 32], sizes = [2, 32], strides = [1, 1]} : vector<2x128xf32> to vector<2x32xf32>
    %107 = vector.extract_strided_slice %70 {offsets = [0, 32], sizes = [2, 32], strides = [1, 1]} : vector<2x64xf32> to vector<2x32xf32>
    %108 = arith.mulf %106, %107 : vector<2x32xf32>
    %109 = vector.extract_strided_slice %98 {offsets = [0, 0], sizes = [2, 32], strides = [1, 1]} : vector<2x128xf32> to vector<2x32xf32>
    %110 = vector.extract_strided_slice %98 {offsets = [0, 64], sizes = [2, 32], strides = [1, 1]} : vector<2x128xf32> to vector<2x32xf32>
    %111 = arith.mulf %109, %110 : vector<2x32xf32>
    %112 = arith.addf %108, %111 : vector<2x32xf32>
    %113 = vector.extract_strided_slice %91 {offsets = [0, 96], sizes = [2, 32], strides = [1, 1]} : vector<2x128xf32> to vector<2x32xf32>
    %114 = math.tanh %105 : vector<2x32xf32>
    %115 = arith.mulf %113, %114 : vector<2x32xf32>
    %116 = vector.extract_strided_slice %98 {offsets = [0, 96], sizes = [2, 32], strides = [1, 1]} : vector<2x128xf32> to vector<2x32xf32>
    %117 = math.tanh %112 : vector<2x32xf32>
    %118 = arith.mulf %116, %117 : vector<2x32xf32>
    %c0_37 = arith.constant 0 : index
    %c0_38 = arith.constant 0 : index
    %119 = vector.load %arg5[%c0_37, %c0_38] : memref<2x64xf32, #tpu.memory_space<vmem>>, vector<2x32xf32>
    tpu.vector_store %arg5[%c0_37, %c0_38], %105 {strides = array<i32>} : memref<2x64xf32, #tpu.memory_space<vmem>>, vector<2x32xf32>,
    %c0_39 = arith.constant 0 : index
    %c32_40 = arith.constant 32 : index
    %120 = vector.load %arg5[%c0_39, %c32_40] : memref<2x64xf32, #tpu.memory_space<vmem>>, vector<2x32xf32>
    tpu.vector_store %arg5[%c0_39, %c32_40], %112 {strides = array<i32>} : memref<2x64xf32, #tpu.memory_space<vmem>>, vector<2x32xf32>,
    %c0_41 = arith.constant 0 : index
    %c0_42 = arith.constant 0 : index
    %121 = vector.load %arg4[%c0_41, %c0_42] : memref<2x64xf32, #tpu.memory_space<vmem>>, vector<2x32xf32>
    tpu.vector_store %arg4[%c0_41, %c0_42], %115 {strides = array<i32>} : memref<2x64xf32, #tpu.memory_space<vmem>>, vector<2x32xf32>,
    %c0_43 = arith.constant 0 : index
    %c32_44 = arith.constant 32 : index
    %122 = vector.load %arg4[%c0_43, %c32_44] : memref<2x64xf32, #tpu.memory_space<vmem>>, vector<2x32xf32>
    tpu.vector_store %arg4[%c0_43, %c32_44], %118 {strides = array<i32>} : memref<2x64xf32, #tpu.memory_space<vmem>>, vector<2x32xf32>,
    %123 = arith.index_cast %72 : i32 to index
    %c0_45 = arith.constant 0 : index
    %124 = vector.load %arg3[%123, %c0_45] : memref<16x64xf32, #tpu.memory_space<vmem>>, vector<2x32xf32>
    tpu.vector_store %arg3[%123, %c0_45], %115 {strides = array<i32>} : memref<16x64xf32, #tpu.memory_space<vmem>>, vector<2x32xf32>,
    %125 = arith.index_cast %74 : i32 to index
    %c32_46 = arith.constant 32 : index
    %126 = vector.load %arg3[%125, %c32_46] : memref<16x64xf32, #tpu.memory_space<vmem>>, vector<2x32xf32>
    tpu.vector_store %arg3[%125, %c32_46], %118 {strides = array<i32>} : memref<16x64xf32, #tpu.memory_space<vmem>>, vector<2x32xf32>,
    %c2_i32_47 = arith.constant 2 : i32
    %c0_48 = arith.constant 0 : index
    %c0_49 = arith.constant 0 : index
    %127 = vector.load %arg4[%c0_48, %c0_49] : memref<2x64xf32, #tpu.memory_space<vmem>>, vector<2x64xf32>
    %c0_50 = arith.constant 0 : index
    %c0_51 = arith.constant 0 : index
    %128 = vector.load %arg5[%c0_50, %c0_51] : memref<2x64xf32, #tpu.memory_space<vmem>>, vector<2x64xf32>
    %cst_52 = arith.constant dense<0.000000e+00> : vector<2x256xf32>
    %129 = tpu.matmul %127, %4, %cst_52 {dimension_numbers = #tpu.dot_dimension_numbers<[1], [0], [0], [1], [0, 0, 1, 1], [], []>} : vector<2x64xf32>, vector<64x256xf32>, vector<2x256xf32> -> vector<2x256xf32>
    %c2_i32_53 = arith.constant 2 : i32
    %130 = arith.muli %c2_i32_47, %c2_i32_53 : i32
    %c7_i32_54 = arith.constant 7 : i32
    %131 = arith.subi %c7_i32_54, %c2_i32_47 : i32
    %c2_i32_55 = arith.constant 2 : i32
    %132 = arith.muli %131, %c2_i32_55 : i32
    %133 = arith.index_cast %130 : i32 to index
    %c0_56 = arith.constant 0 : index
    %134 = vector.load %arg1[%133, %c0_56] : memref<16x256xf32, #tpu.memory_space<vmem>>, vector<2x256xf32>
    %135 = arith.index_cast %132 : i32 to index
    %c0_57 = arith.constant 0 : index
    %136 = vector.load %arg1[%135, %c0_57] : memref<16x256xf32, #tpu.memory_space<vmem>>, vector<2x256xf32>
    %137 = vector.extract_strided_slice %129 {offsets = [0, 0], sizes = [2, 128], strides = [1, 1]} : vector<2x256xf32> to vector<2x128xf32>
    %138 = vector.extract_strided_slice %134 {offsets = [0, 0], sizes = [2, 128], strides = [1, 1]} : vector<2x256xf32> to vector<2x128xf32>
    %139 = arith.addf %137, %138 : vector<2x128xf32>
    %140 = vector.extract_strided_slice %129 {offsets = [0, 128], sizes = [2, 128], strides = [1, 1]} : vector<2x256xf32> to vector<2x128xf32>
    %141 = vector.extract_strided_slice %136 {offsets = [0, 128], sizes = [2, 128], strides = [1, 1]} : vector<2x256xf32> to vector<2x128xf32>
    %142 = arith.addf %140, %141 : vector<2x128xf32>
    %143 = math.tanh %139 : vector<2x128xf32>
    %144 = arith.negf %139 : vector<2x128xf32>
    %145 = math.exp %144 : vector<2x128xf32>
    %cst_58 = arith.constant 1.000000e+00 : f32
    %146 = vector.broadcast %cst_58 : f32 to vector<2x128xf32>
    %147 = arith.addf %146, %145 : vector<2x128xf32>
    %148 = arith.divf %146, %147 : vector<2x128xf32>
    %149 = arith.select %10, %143, %148 : vector<2x128xi1>, vector<2x128xf32>
    %150 = math.tanh %142 : vector<2x128xf32>
    %151 = arith.negf %142 : vector<2x128xf32>
    %152 = math.exp %151 : vector<2x128xf32>
    %cst_59 = arith.constant 1.000000e+00 : f32
    %153 = vector.broadcast %cst_59 : f32 to vector<2x128xf32>
    %154 = arith.addf %153, %152 : vector<2x128xf32>
    %155 = arith.divf %153, %154 : vector<2x128xf32>
    %156 = arith.select %10, %150, %155 : vector<2x128xi1>, vector<2x128xf32>
    %157 = vector.extract_strided_slice %149 {offsets = [0, 32], sizes = [2, 32], strides = [1, 1]} : vector<2x128xf32> to vector<2x32xf32>
    %158 = vector.extract_strided_slice %128 {offsets = [0, 0], sizes = [2, 32], strides = [1, 1]} : vector<2x64xf32> to vector<2x32xf32>
    %159 = arith.mulf %157, %158 : vector<2x32xf32>
    %160 = vector.extract_strided_slice %149 {offsets = [0, 0], sizes = [2, 32], strides = [1, 1]} : vector<2x128xf32> to vector<2x32xf32>
    %161 = vector.extract_strided_slice %149 {offsets = [0, 64], sizes = [2, 32], strides = [1, 1]} : vector<2x128xf32> to vector<2x32xf32>
    %162 = arith.mulf %160, %161 : vector<2x32xf32>
    %163 = arith.addf %159, %162 : vector<2x32xf32>
    %164 = vector.extract_strided_slice %156 {offsets = [0, 32], sizes = [2, 32], strides = [1, 1]} : vector<2x128xf32> to vector<2x32xf32>
    %165 = vector.extract_strided_slice %128 {offsets = [0, 32], sizes = [2, 32], strides = [1, 1]} : vector<2x64xf32> to vector<2x32xf32>
    %166 = arith.mulf %164, %165 : vector<2x32xf32>
    %167 = vector.extract_strided_slice %156 {offsets = [0, 0], sizes = [2, 32], strides = [1, 1]} : vector<2x128xf32> to vector<2x32xf32>
    %168 = vector.extract_strided_slice %156 {offsets = [0, 64], sizes = [2, 32], strides = [1, 1]} : vector<2x128xf32> to vector<2x32xf32>
    %169 = arith.mulf %167, %168 : vector<2x32xf32>
    %170 = arith.addf %166, %169 : vector<2x32xf32>
    %171 = vector.extract_strided_slice %149 {offsets = [0, 96], sizes = [2, 32], strides = [1, 1]} : vector<2x128xf32> to vector<2x32xf32>
    %172 = math.tanh %163 : vector<2x32xf32>
    %173 = arith.mulf %171, %172 : vector<2x32xf32>
    %174 = vector.extract_strided_slice %156 {offsets = [0, 96], sizes = [2, 32], strides = [1, 1]} : vector<2x128xf32> to vector<2x32xf32>
    %175 = math.tanh %170 : vector<2x32xf32>
    %176 = arith.mulf %174, %175 : vector<2x32xf32>
    %c0_60 = arith.constant 0 : index
    %c0_61 = arith.constant 0 : index
    %177 = vector.load %arg5[%c0_60, %c0_61] : memref<2x64xf32, #tpu.memory_space<vmem>>, vector<2x32xf32>
    tpu.vector_store %arg5[%c0_60, %c0_61], %163 {strides = array<i32>} : memref<2x64xf32, #tpu.memory_space<vmem>>, vector<2x32xf32>,
    %c0_62 = arith.constant 0 : index
    %c32_63 = arith.constant 32 : index
    %178 = vector.load %arg5[%c0_62, %c32_63] : memref<2x64xf32, #tpu.memory_space<vmem>>, vector<2x32xf32>
    tpu.vector_store %arg5[%c0_62, %c32_63], %170 {strides = array<i32>} : memref<2x64xf32, #tpu.memory_space<vmem>>, vector<2x32xf32>,
    %c0_64 = arith.constant 0 : index
    %c0_65 = arith.constant 0 : index
    %179 = vector.load %arg4[%c0_64, %c0_65] : memref<2x64xf32, #tpu.memory_space<vmem>>, vector<2x32xf32>
    tpu.vector_store %arg4[%c0_64, %c0_65], %173 {strides = array<i32>} : memref<2x64xf32, #tpu.memory_space<vmem>>, vector<2x32xf32>,
    %c0_66 = arith.constant 0 : index
    %c32_67 = arith.constant 32 : index
    %180 = vector.load %arg4[%c0_66, %c32_67] : memref<2x64xf32, #tpu.memory_space<vmem>>, vector<2x32xf32>
    tpu.vector_store %arg4[%c0_66, %c32_67], %176 {strides = array<i32>} : memref<2x64xf32, #tpu.memory_space<vmem>>, vector<2x32xf32>,
    %181 = arith.index_cast %130 : i32 to index
    %c0_68 = arith.constant 0 : index
    %182 = vector.load %arg3[%181, %c0_68] : memref<16x64xf32, #tpu.memory_space<vmem>>, vector<2x32xf32>
    tpu.vector_store %arg3[%181, %c0_68], %173 {strides = array<i32>} : memref<16x64xf32, #tpu.memory_space<vmem>>, vector<2x32xf32>,
    %183 = arith.index_cast %132 : i32 to index
    %c32_69 = arith.constant 32 : index
    %184 = vector.load %arg3[%183, %c32_69] : memref<16x64xf32, #tpu.memory_space<vmem>>, vector<2x32xf32>
    tpu.vector_store %arg3[%183, %c32_69], %176 {strides = array<i32>} : memref<16x64xf32, #tpu.memory_space<vmem>>, vector<2x32xf32>,
    %c3_i32 = arith.constant 3 : i32
    %c0_70 = arith.constant 0 : index
    %c0_71 = arith.constant 0 : index
    %185 = vector.load %arg4[%c0_70, %c0_71] : memref<2x64xf32, #tpu.memory_space<vmem>>, vector<2x64xf32>
    %c0_72 = arith.constant 0 : index
    %c0_73 = arith.constant 0 : index
    %186 = vector.load %arg5[%c0_72, %c0_73] : memref<2x64xf32, #tpu.memory_space<vmem>>, vector<2x64xf32>
    %cst_74 = arith.constant dense<0.000000e+00> : vector<2x256xf32>
    %187 = tpu.matmul %185, %4, %cst_74 {dimension_numbers = #tpu.dot_dimension_numbers<[1], [0], [0], [1], [0, 0, 1, 1], [], []>} : vector<2x64xf32>, vector<64x256xf32>, vector<2x256xf32> -> vector<2x256xf32>
    %c2_i32_75 = arith.constant 2 : i32
    %188 = arith.muli %c3_i32, %c2_i32_75 : i32
    %c7_i32_76 = arith.constant 7 : i32
    %189 = arith.subi %c7_i32_76, %c3_i32 : i32
    %c2_i32_77 = arith.constant 2 : i32
    %190 = arith.muli %189, %c2_i32_77 : i32
    %191 = arith.index_cast %188 : i32 to index
    %c0_78 = arith.constant 0 : index
    %192 = vector.load %arg1[%191, %c0_78] : memref<16x256xf32, #tpu.memory_space<vmem>>, vector<2x256xf32>
    %193 = arith.index_cast %190 : i32 to index
    %c0_79 = arith.constant 0 : index
    %194 = vector.load %arg1[%193, %c0_79] : memref<16x256xf32, #tpu.memory_space<vmem>>, vector<2x256xf32>
    %195 = vector.extract_strided_slice %187 {offsets = [0, 0], sizes = [2, 128], strides = [1, 1]} : vector<2x256xf32> to vector<2x128xf32>
    %196 = vector.extract_strided_slice %192 {offsets = [0, 0], sizes = [2, 128], strides = [1, 1]} : vector<2x256xf32> to vector<2x128xf32>
    %197 = arith.addf %195, %196 : vector<2x128xf32>
    %198 = vector.extract_strided_slice %187 {offsets = [0, 128], sizes = [2, 128], strides = [1, 1]} : vector<2x256xf32> to vector<2x128xf32>
    %199 = vector.extract_strided_slice %194 {offsets = [0, 128], sizes = [2, 128], strides = [1, 1]} : vector<2x256xf32> to vector<2x128xf32>
    %200 = arith.addf %198, %199 : vector<2x128xf32>
    %201 = math.tanh %197 : vector<2x128xf32>
    %202 = arith.negf %197 : vector<2x128xf32>
    %203 = math.exp %202 : vector<2x128xf32>
    %cst_80 = arith.constant 1.000000e+00 : f32
    %204 = vector.broadcast %cst_80 : f32 to vector<2x128xf32>
    %205 = arith.addf %204, %203 : vector<2x128xf32>
    %206 = arith.divf %204, %205 : vector<2x128xf32>
    %207 = arith.select %10, %201, %206 : vector<2x128xi1>, vector<2x128xf32>
    %208 = math.tanh %200 : vector<2x128xf32>
    %209 = arith.negf %200 : vector<2x128xf32>
    %210 = math.exp %209 : vector<2x128xf32>
    %cst_81 = arith.constant 1.000000e+00 : f32
    %211 = vector.broadcast %cst_81 : f32 to vector<2x128xf32>
    %212 = arith.addf %211, %210 : vector<2x128xf32>
    %213 = arith.divf %211, %212 : vector<2x128xf32>
    %214 = arith.select %10, %208, %213 : vector<2x128xi1>, vector<2x128xf32>
    %215 = vector.extract_strided_slice %207 {offsets = [0, 32], sizes = [2, 32], strides = [1, 1]} : vector<2x128xf32> to vector<2x32xf32>
    %216 = vector.extract_strided_slice %186 {offsets = [0, 0], sizes = [2, 32], strides = [1, 1]} : vector<2x64xf32> to vector<2x32xf32>
    %217 = arith.mulf %215, %216 : vector<2x32xf32>
    %218 = vector.extract_strided_slice %207 {offsets = [0, 0], sizes = [2, 32], strides = [1, 1]} : vector<2x128xf32> to vector<2x32xf32>
    %219 = vector.extract_strided_slice %207 {offsets = [0, 64], sizes = [2, 32], strides = [1, 1]} : vector<2x128xf32> to vector<2x32xf32>
    %220 = arith.mulf %218, %219 : vector<2x32xf32>
    %221 = arith.addf %217, %220 : vector<2x32xf32>
    %222 = vector.extract_strided_slice %214 {offsets = [0, 32], sizes = [2, 32], strides = [1, 1]} : vector<2x128xf32> to vector<2x32xf32>
    %223 = vector.extract_strided_slice %186 {offsets = [0, 32], sizes = [2, 32], strides = [1, 1]} : vector<2x64xf32> to vector<2x32xf32>
    %224 = arith.mulf %222, %223 : vector<2x32xf32>
    %225 = vector.extract_strided_slice %214 {offsets = [0, 0], sizes = [2, 32], strides = [1, 1]} : vector<2x128xf32> to vector<2x32xf32>
    %226 = vector.extract_strided_slice %214 {offsets = [0, 64], sizes = [2, 32], strides = [1, 1]} : vector<2x128xf32> to vector<2x32xf32>
    %227 = arith.mulf %225, %226 : vector<2x32xf32>
    %228 = arith.addf %224, %227 : vector<2x32xf32>
    %229 = vector.extract_strided_slice %207 {offsets = [0, 96], sizes = [2, 32], strides = [1, 1]} : vector<2x128xf32> to vector<2x32xf32>
    %230 = math.tanh %221 : vector<2x32xf32>
    %231 = arith.mulf %229, %230 : vector<2x32xf32>
    %232 = vector.extract_strided_slice %214 {offsets = [0, 96], sizes = [2, 32], strides = [1, 1]} : vector<2x128xf32> to vector<2x32xf32>
    %233 = math.tanh %228 : vector<2x32xf32>
    %234 = arith.mulf %232, %233 : vector<2x32xf32>
    %c0_82 = arith.constant 0 : index
    %c0_83 = arith.constant 0 : index
    %235 = vector.load %arg5[%c0_82, %c0_83] : memref<2x64xf32, #tpu.memory_space<vmem>>, vector<2x32xf32>
    tpu.vector_store %arg5[%c0_82, %c0_83], %221 {strides = array<i32>} : memref<2x64xf32, #tpu.memory_space<vmem>>, vector<2x32xf32>,
    %c0_84 = arith.constant 0 : index
    %c32_85 = arith.constant 32 : index
    %236 = vector.load %arg5[%c0_84, %c32_85] : memref<2x64xf32, #tpu.memory_space<vmem>>, vector<2x32xf32>
    tpu.vector_store %arg5[%c0_84, %c32_85], %228 {strides = array<i32>} : memref<2x64xf32, #tpu.memory_space<vmem>>, vector<2x32xf32>,
    %c0_86 = arith.constant 0 : index
    %c0_87 = arith.constant 0 : index
    %237 = vector.load %arg4[%c0_86, %c0_87] : memref<2x64xf32, #tpu.memory_space<vmem>>, vector<2x32xf32>
    tpu.vector_store %arg4[%c0_86, %c0_87], %231 {strides = array<i32>} : memref<2x64xf32, #tpu.memory_space<vmem>>, vector<2x32xf32>,
    %c0_88 = arith.constant 0 : index
    %c32_89 = arith.constant 32 : index
    %238 = vector.load %arg4[%c0_88, %c32_89] : memref<2x64xf32, #tpu.memory_space<vmem>>, vector<2x32xf32>
    tpu.vector_store %arg4[%c0_88, %c32_89], %234 {strides = array<i32>} : memref<2x64xf32, #tpu.memory_space<vmem>>, vector<2x32xf32>,
    %239 = arith.index_cast %188 : i32 to index
    %c0_90 = arith.constant 0 : index
    %240 = vector.load %arg3[%239, %c0_90] : memref<16x64xf32, #tpu.memory_space<vmem>>, vector<2x32xf32>
    tpu.vector_store %arg3[%239, %c0_90], %231 {strides = array<i32>} : memref<16x64xf32, #tpu.memory_space<vmem>>, vector<2x32xf32>,
    %241 = arith.index_cast %190 : i32 to index
    %c32_91 = arith.constant 32 : index
    %242 = vector.load %arg3[%241, %c32_91] : memref<16x64xf32, #tpu.memory_space<vmem>>, vector<2x32xf32>
    tpu.vector_store %arg3[%241, %c32_91], %234 {strides = array<i32>} : memref<16x64xf32, #tpu.memory_space<vmem>>, vector<2x32xf32>,
    %c4_i32 = arith.constant 4 : i32
    %c0_92 = arith.constant 0 : index
    %c0_93 = arith.constant 0 : index
    %243 = vector.load %arg4[%c0_92, %c0_93] : memref<2x64xf32, #tpu.memory_space<vmem>>, vector<2x64xf32>
    %c0_94 = arith.constant 0 : index
    %c0_95 = arith.constant 0 : index
    %244 = vector.load %arg5[%c0_94, %c0_95] : memref<2x64xf32, #tpu.memory_space<vmem>>, vector<2x64xf32>
    %cst_96 = arith.constant dense<0.000000e+00> : vector<2x256xf32>
    %245 = tpu.matmul %243, %4, %cst_96 {dimension_numbers = #tpu.dot_dimension_numbers<[1], [0], [0], [1], [0, 0, 1, 1], [], []>} : vector<2x64xf32>, vector<64x256xf32>, vector<2x256xf32> -> vector<2x256xf32>
    %c2_i32_97 = arith.constant 2 : i32
    %246 = arith.muli %c4_i32, %c2_i32_97 : i32
    %c7_i32_98 = arith.constant 7 : i32
    %247 = arith.subi %c7_i32_98, %c4_i32 : i32
    %c2_i32_99 = arith.constant 2 : i32
    %248 = arith.muli %247, %c2_i32_99 : i32
    %249 = arith.index_cast %246 : i32 to index
    %c0_100 = arith.constant 0 : index
    %250 = vector.load %arg1[%249, %c0_100] : memref<16x256xf32, #tpu.memory_space<vmem>>, vector<2x256xf32>
    %251 = arith.index_cast %248 : i32 to index
    %c0_101 = arith.constant 0 : index
    %252 = vector.load %arg1[%251, %c0_101] : memref<16x256xf32, #tpu.memory_space<vmem>>, vector<2x256xf32>
    %253 = vector.extract_strided_slice %245 {offsets = [0, 0], sizes = [2, 128], strides = [1, 1]} : vector<2x256xf32> to vector<2x128xf32>
    %254 = vector.extract_strided_slice %250 {offsets = [0, 0], sizes = [2, 128], strides = [1, 1]} : vector<2x256xf32> to vector<2x128xf32>
    %255 = arith.addf %253, %254 : vector<2x128xf32>
    %256 = vector.extract_strided_slice %245 {offsets = [0, 128], sizes = [2, 128], strides = [1, 1]} : vector<2x256xf32> to vector<2x128xf32>
    %257 = vector.extract_strided_slice %252 {offsets = [0, 128], sizes = [2, 128], strides = [1, 1]} : vector<2x256xf32> to vector<2x128xf32>
    %258 = arith.addf %256, %257 : vector<2x128xf32>
    %259 = math.tanh %255 : vector<2x128xf32>
    %260 = arith.negf %255 : vector<2x128xf32>
    %261 = math.exp %260 : vector<2x128xf32>
    %cst_102 = arith.constant 1.000000e+00 : f32
    %262 = vector.broadcast %cst_102 : f32 to vector<2x128xf32>
    %263 = arith.addf %262, %261 : vector<2x128xf32>
    %264 = arith.divf %262, %263 : vector<2x128xf32>
    %265 = arith.select %10, %259, %264 : vector<2x128xi1>, vector<2x128xf32>
    %266 = math.tanh %258 : vector<2x128xf32>
    %267 = arith.negf %258 : vector<2x128xf32>
    %268 = math.exp %267 : vector<2x128xf32>
    %cst_103 = arith.constant 1.000000e+00 : f32
    %269 = vector.broadcast %cst_103 : f32 to vector<2x128xf32>
    %270 = arith.addf %269, %268 : vector<2x128xf32>
    %271 = arith.divf %269, %270 : vector<2x128xf32>
    %272 = arith.select %10, %266, %271 : vector<2x128xi1>, vector<2x128xf32>
    %273 = vector.extract_strided_slice %265 {offsets = [0, 32], sizes = [2, 32], strides = [1, 1]} : vector<2x128xf32> to vector<2x32xf32>
    %274 = vector.extract_strided_slice %244 {offsets = [0, 0], sizes = [2, 32], strides = [1, 1]} : vector<2x64xf32> to vector<2x32xf32>
    %275 = arith.mulf %273, %274 : vector<2x32xf32>
    %276 = vector.extract_strided_slice %265 {offsets = [0, 0], sizes = [2, 32], strides = [1, 1]} : vector<2x128xf32> to vector<2x32xf32>
    %277 = vector.extract_strided_slice %265 {offsets = [0, 64], sizes = [2, 32], strides = [1, 1]} : vector<2x128xf32> to vector<2x32xf32>
    %278 = arith.mulf %276, %277 : vector<2x32xf32>
    %279 = arith.addf %275, %278 : vector<2x32xf32>
    %280 = vector.extract_strided_slice %272 {offsets = [0, 32], sizes = [2, 32], strides = [1, 1]} : vector<2x128xf32> to vector<2x32xf32>
    %281 = vector.extract_strided_slice %244 {offsets = [0, 32], sizes = [2, 32], strides = [1, 1]} : vector<2x64xf32> to vector<2x32xf32>
    %282 = arith.mulf %280, %281 : vector<2x32xf32>
    %283 = vector.extract_strided_slice %272 {offsets = [0, 0], sizes = [2, 32], strides = [1, 1]} : vector<2x128xf32> to vector<2x32xf32>
    %284 = vector.extract_strided_slice %272 {offsets = [0, 64], sizes = [2, 32], strides = [1, 1]} : vector<2x128xf32> to vector<2x32xf32>
    %285 = arith.mulf %283, %284 : vector<2x32xf32>
    %286 = arith.addf %282, %285 : vector<2x32xf32>
    %287 = vector.extract_strided_slice %265 {offsets = [0, 96], sizes = [2, 32], strides = [1, 1]} : vector<2x128xf32> to vector<2x32xf32>
    %288 = math.tanh %279 : vector<2x32xf32>
    %289 = arith.mulf %287, %288 : vector<2x32xf32>
    %290 = vector.extract_strided_slice %272 {offsets = [0, 96], sizes = [2, 32], strides = [1, 1]} : vector<2x128xf32> to vector<2x32xf32>
    %291 = math.tanh %286 : vector<2x32xf32>
    %292 = arith.mulf %290, %291 : vector<2x32xf32>
    %c0_104 = arith.constant 0 : index
    %c0_105 = arith.constant 0 : index
    %293 = vector.load %arg5[%c0_104, %c0_105] : memref<2x64xf32, #tpu.memory_space<vmem>>, vector<2x32xf32>
    tpu.vector_store %arg5[%c0_104, %c0_105], %279 {strides = array<i32>} : memref<2x64xf32, #tpu.memory_space<vmem>>, vector<2x32xf32>,
    %c0_106 = arith.constant 0 : index
    %c32_107 = arith.constant 32 : index
    %294 = vector.load %arg5[%c0_106, %c32_107] : memref<2x64xf32, #tpu.memory_space<vmem>>, vector<2x32xf32>
    tpu.vector_store %arg5[%c0_106, %c32_107], %286 {strides = array<i32>} : memref<2x64xf32, #tpu.memory_space<vmem>>, vector<2x32xf32>,
    %c0_108 = arith.constant 0 : index
    %c0_109 = arith.constant 0 : index
    %295 = vector.load %arg4[%c0_108, %c0_109] : memref<2x64xf32, #tpu.memory_space<vmem>>, vector<2x32xf32>
    tpu.vector_store %arg4[%c0_108, %c0_109], %289 {strides = array<i32>} : memref<2x64xf32, #tpu.memory_space<vmem>>, vector<2x32xf32>,
    %c0_110 = arith.constant 0 : index
    %c32_111 = arith.constant 32 : index
    %296 = vector.load %arg4[%c0_110, %c32_111] : memref<2x64xf32, #tpu.memory_space<vmem>>, vector<2x32xf32>
    tpu.vector_store %arg4[%c0_110, %c32_111], %292 {strides = array<i32>} : memref<2x64xf32, #tpu.memory_space<vmem>>, vector<2x32xf32>,
    %297 = arith.index_cast %246 : i32 to index
    %c0_112 = arith.constant 0 : index
    %298 = vector.load %arg3[%297, %c0_112] : memref<16x64xf32, #tpu.memory_space<vmem>>, vector<2x32xf32>
    tpu.vector_store %arg3[%297, %c0_112], %289 {strides = array<i32>} : memref<16x64xf32, #tpu.memory_space<vmem>>, vector<2x32xf32>,
    %299 = arith.index_cast %248 : i32 to index
    %c32_113 = arith.constant 32 : index
    %300 = vector.load %arg3[%299, %c32_113] : memref<16x64xf32, #tpu.memory_space<vmem>>, vector<2x32xf32>
    tpu.vector_store %arg3[%299, %c32_113], %292 {strides = array<i32>} : memref<16x64xf32, #tpu.memory_space<vmem>>, vector<2x32xf32>,
    %c5_i32 = arith.constant 5 : i32
    %c0_114 = arith.constant 0 : index
    %c0_115 = arith.constant 0 : index
    %301 = vector.load %arg4[%c0_114, %c0_115] : memref<2x64xf32, #tpu.memory_space<vmem>>, vector<2x64xf32>
    %c0_116 = arith.constant 0 : index
    %c0_117 = arith.constant 0 : index
    %302 = vector.load %arg5[%c0_116, %c0_117] : memref<2x64xf32, #tpu.memory_space<vmem>>, vector<2x64xf32>
    %cst_118 = arith.constant dense<0.000000e+00> : vector<2x256xf32>
    %303 = tpu.matmul %301, %4, %cst_118 {dimension_numbers = #tpu.dot_dimension_numbers<[1], [0], [0], [1], [0, 0, 1, 1], [], []>} : vector<2x64xf32>, vector<64x256xf32>, vector<2x256xf32> -> vector<2x256xf32>
    %c2_i32_119 = arith.constant 2 : i32
    %304 = arith.muli %c5_i32, %c2_i32_119 : i32
    %c7_i32_120 = arith.constant 7 : i32
    %305 = arith.subi %c7_i32_120, %c5_i32 : i32
    %c2_i32_121 = arith.constant 2 : i32
    %306 = arith.muli %305, %c2_i32_121 : i32
    %307 = arith.index_cast %304 : i32 to index
    %c0_122 = arith.constant 0 : index
    %308 = vector.load %arg1[%307, %c0_122] : memref<16x256xf32, #tpu.memory_space<vmem>>, vector<2x256xf32>
    %309 = arith.index_cast %306 : i32 to index
    %c0_123 = arith.constant 0 : index
    %310 = vector.load %arg1[%309, %c0_123] : memref<16x256xf32, #tpu.memory_space<vmem>>, vector<2x256xf32>
    %311 = vector.extract_strided_slice %303 {offsets = [0, 0], sizes = [2, 128], strides = [1, 1]} : vector<2x256xf32> to vector<2x128xf32>
    %312 = vector.extract_strided_slice %308 {offsets = [0, 0], sizes = [2, 128], strides = [1, 1]} : vector<2x256xf32> to vector<2x128xf32>
    %313 = arith.addf %311, %312 : vector<2x128xf32>
    %314 = vector.extract_strided_slice %303 {offsets = [0, 128], sizes = [2, 128], strides = [1, 1]} : vector<2x256xf32> to vector<2x128xf32>
    %315 = vector.extract_strided_slice %310 {offsets = [0, 128], sizes = [2, 128], strides = [1, 1]} : vector<2x256xf32> to vector<2x128xf32>
    %316 = arith.addf %314, %315 : vector<2x128xf32>
    %317 = math.tanh %313 : vector<2x128xf32>
    %318 = arith.negf %313 : vector<2x128xf32>
    %319 = math.exp %318 : vector<2x128xf32>
    %cst_124 = arith.constant 1.000000e+00 : f32
    %320 = vector.broadcast %cst_124 : f32 to vector<2x128xf32>
    %321 = arith.addf %320, %319 : vector<2x128xf32>
    %322 = arith.divf %320, %321 : vector<2x128xf32>
    %323 = arith.select %10, %317, %322 : vector<2x128xi1>, vector<2x128xf32>
    %324 = math.tanh %316 : vector<2x128xf32>
    %325 = arith.negf %316 : vector<2x128xf32>
    %326 = math.exp %325 : vector<2x128xf32>
    %cst_125 = arith.constant 1.000000e+00 : f32
    %327 = vector.broadcast %cst_125 : f32 to vector<2x128xf32>
    %328 = arith.addf %327, %326 : vector<2x128xf32>
    %329 = arith.divf %327, %328 : vector<2x128xf32>
    %330 = arith.select %10, %324, %329 : vector<2x128xi1>, vector<2x128xf32>
    %331 = vector.extract_strided_slice %323 {offsets = [0, 32], sizes = [2, 32], strides = [1, 1]} : vector<2x128xf32> to vector<2x32xf32>
    %332 = vector.extract_strided_slice %302 {offsets = [0, 0], sizes = [2, 32], strides = [1, 1]} : vector<2x64xf32> to vector<2x32xf32>
    %333 = arith.mulf %331, %332 : vector<2x32xf32>
    %334 = vector.extract_strided_slice %323 {offsets = [0, 0], sizes = [2, 32], strides = [1, 1]} : vector<2x128xf32> to vector<2x32xf32>
    %335 = vector.extract_strided_slice %323 {offsets = [0, 64], sizes = [2, 32], strides = [1, 1]} : vector<2x128xf32> to vector<2x32xf32>
    %336 = arith.mulf %334, %335 : vector<2x32xf32>
    %337 = arith.addf %333, %336 : vector<2x32xf32>
    %338 = vector.extract_strided_slice %330 {offsets = [0, 32], sizes = [2, 32], strides = [1, 1]} : vector<2x128xf32> to vector<2x32xf32>
    %339 = vector.extract_strided_slice %302 {offsets = [0, 32], sizes = [2, 32], strides = [1, 1]} : vector<2x64xf32> to vector<2x32xf32>
    %340 = arith.mulf %338, %339 : vector<2x32xf32>
    %341 = vector.extract_strided_slice %330 {offsets = [0, 0], sizes = [2, 32], strides = [1, 1]} : vector<2x128xf32> to vector<2x32xf32>
    %342 = vector.extract_strided_slice %330 {offsets = [0, 64], sizes = [2, 32], strides = [1, 1]} : vector<2x128xf32> to vector<2x32xf32>
    %343 = arith.mulf %341, %342 : vector<2x32xf32>
    %344 = arith.addf %340, %343 : vector<2x32xf32>
    %345 = vector.extract_strided_slice %323 {offsets = [0, 96], sizes = [2, 32], strides = [1, 1]} : vector<2x128xf32> to vector<2x32xf32>
    %346 = math.tanh %337 : vector<2x32xf32>
    %347 = arith.mulf %345, %346 : vector<2x32xf32>
    %348 = vector.extract_strided_slice %330 {offsets = [0, 96], sizes = [2, 32], strides = [1, 1]} : vector<2x128xf32> to vector<2x32xf32>
    %349 = math.tanh %344 : vector<2x32xf32>
    %350 = arith.mulf %348, %349 : vector<2x32xf32>
    %c0_126 = arith.constant 0 : index
    %c0_127 = arith.constant 0 : index
    %351 = vector.load %arg5[%c0_126, %c0_127] : memref<2x64xf32, #tpu.memory_space<vmem>>, vector<2x32xf32>
    tpu.vector_store %arg5[%c0_126, %c0_127], %337 {strides = array<i32>} : memref<2x64xf32, #tpu.memory_space<vmem>>, vector<2x32xf32>,
    %c0_128 = arith.constant 0 : index
    %c32_129 = arith.constant 32 : index
    %352 = vector.load %arg5[%c0_128, %c32_129] : memref<2x64xf32, #tpu.memory_space<vmem>>, vector<2x32xf32>
    tpu.vector_store %arg5[%c0_128, %c32_129], %344 {strides = array<i32>} : memref<2x64xf32, #tpu.memory_space<vmem>>, vector<2x32xf32>,
    %c0_130 = arith.constant 0 : index
    %c0_131 = arith.constant 0 : index
    %353 = vector.load %arg4[%c0_130, %c0_131] : memref<2x64xf32, #tpu.memory_space<vmem>>, vector<2x32xf32>
    tpu.vector_store %arg4[%c0_130, %c0_131], %347 {strides = array<i32>} : memref<2x64xf32, #tpu.memory_space<vmem>>, vector<2x32xf32>,
    %c0_132 = arith.constant 0 : index
    %c32_133 = arith.constant 32 : index
    %354 = vector.load %arg4[%c0_132, %c32_133] : memref<2x64xf32, #tpu.memory_space<vmem>>, vector<2x32xf32>
    tpu.vector_store %arg4[%c0_132, %c32_133], %350 {strides = array<i32>} : memref<2x64xf32, #tpu.memory_space<vmem>>, vector<2x32xf32>,
    %355 = arith.index_cast %304 : i32 to index
    %c0_134 = arith.constant 0 : index
    %356 = vector.load %arg3[%355, %c0_134] : memref<16x64xf32, #tpu.memory_space<vmem>>, vector<2x32xf32>
    tpu.vector_store %arg3[%355, %c0_134], %347 {strides = array<i32>} : memref<16x64xf32, #tpu.memory_space<vmem>>, vector<2x32xf32>,
    %357 = arith.index_cast %306 : i32 to index
    %c32_135 = arith.constant 32 : index
    %358 = vector.load %arg3[%357, %c32_135] : memref<16x64xf32, #tpu.memory_space<vmem>>, vector<2x32xf32>
    tpu.vector_store %arg3[%357, %c32_135], %350 {strides = array<i32>} : memref<16x64xf32, #tpu.memory_space<vmem>>, vector<2x32xf32>,
    %c6_i32 = arith.constant 6 : i32
    %c0_136 = arith.constant 0 : index
    %c0_137 = arith.constant 0 : index
    %359 = vector.load %arg4[%c0_136, %c0_137] : memref<2x64xf32, #tpu.memory_space<vmem>>, vector<2x64xf32>
    %c0_138 = arith.constant 0 : index
    %c0_139 = arith.constant 0 : index
    %360 = vector.load %arg5[%c0_138, %c0_139] : memref<2x64xf32, #tpu.memory_space<vmem>>, vector<2x64xf32>
    %cst_140 = arith.constant dense<0.000000e+00> : vector<2x256xf32>
    %361 = tpu.matmul %359, %4, %cst_140 {dimension_numbers = #tpu.dot_dimension_numbers<[1], [0], [0], [1], [0, 0, 1, 1], [], []>} : vector<2x64xf32>, vector<64x256xf32>, vector<2x256xf32> -> vector<2x256xf32>
    %c2_i32_141 = arith.constant 2 : i32
    %362 = arith.muli %c6_i32, %c2_i32_141 : i32
    %c7_i32_142 = arith.constant 7 : i32
    %363 = arith.subi %c7_i32_142, %c6_i32 : i32
    %c2_i32_143 = arith.constant 2 : i32
    %364 = arith.muli %363, %c2_i32_143 : i32
    %365 = arith.index_cast %362 : i32 to index
    %c0_144 = arith.constant 0 : index
    %366 = vector.load %arg1[%365, %c0_144] : memref<16x256xf32, #tpu.memory_space<vmem>>, vector<2x256xf32>
    %367 = arith.index_cast %364 : i32 to index
    %c0_145 = arith.constant 0 : index
    %368 = vector.load %arg1[%367, %c0_145] : memref<16x256xf32, #tpu.memory_space<vmem>>, vector<2x256xf32>
    %369 = vector.extract_strided_slice %361 {offsets = [0, 0], sizes = [2, 128], strides = [1, 1]} : vector<2x256xf32> to vector<2x128xf32>
    %370 = vector.extract_strided_slice %366 {offsets = [0, 0], sizes = [2, 128], strides = [1, 1]} : vector<2x256xf32> to vector<2x128xf32>
    %371 = arith.addf %369, %370 : vector<2x128xf32>
    %372 = vector.extract_strided_slice %361 {offsets = [0, 128], sizes = [2, 128], strides = [1, 1]} : vector<2x256xf32> to vector<2x128xf32>
    %373 = vector.extract_strided_slice %368 {offsets = [0, 128], sizes = [2, 128], strides = [1, 1]} : vector<2x256xf32> to vector<2x128xf32>
    %374 = arith.addf %372, %373 : vector<2x128xf32>
    %375 = math.tanh %371 : vector<2x128xf32>
    %376 = arith.negf %371 : vector<2x128xf32>
    %377 = math.exp %376 : vector<2x128xf32>
    %cst_146 = arith.constant 1.000000e+00 : f32
    %378 = vector.broadcast %cst_146 : f32 to vector<2x128xf32>
    %379 = arith.addf %378, %377 : vector<2x128xf32>
    %380 = arith.divf %378, %379 : vector<2x128xf32>
    %381 = arith.select %10, %375, %380 : vector<2x128xi1>, vector<2x128xf32>
    %382 = math.tanh %374 : vector<2x128xf32>
    %383 = arith.negf %374 : vector<2x128xf32>
    %384 = math.exp %383 : vector<2x128xf32>
    %cst_147 = arith.constant 1.000000e+00 : f32
    %385 = vector.broadcast %cst_147 : f32 to vector<2x128xf32>
    %386 = arith.addf %385, %384 : vector<2x128xf32>
    %387 = arith.divf %385, %386 : vector<2x128xf32>
    %388 = arith.select %10, %382, %387 : vector<2x128xi1>, vector<2x128xf32>
    %389 = vector.extract_strided_slice %381 {offsets = [0, 32], sizes = [2, 32], strides = [1, 1]} : vector<2x128xf32> to vector<2x32xf32>
    %390 = vector.extract_strided_slice %360 {offsets = [0, 0], sizes = [2, 32], strides = [1, 1]} : vector<2x64xf32> to vector<2x32xf32>
    %391 = arith.mulf %389, %390 : vector<2x32xf32>
    %392 = vector.extract_strided_slice %381 {offsets = [0, 0], sizes = [2, 32], strides = [1, 1]} : vector<2x128xf32> to vector<2x32xf32>
    %393 = vector.extract_strided_slice %381 {offsets = [0, 64], sizes = [2, 32], strides = [1, 1]} : vector<2x128xf32> to vector<2x32xf32>
    %394 = arith.mulf %392, %393 : vector<2x32xf32>
    %395 = arith.addf %391, %394 : vector<2x32xf32>
    %396 = vector.extract_strided_slice %388 {offsets = [0, 32], sizes = [2, 32], strides = [1, 1]} : vector<2x128xf32> to vector<2x32xf32>
    %397 = vector.extract_strided_slice %360 {offsets = [0, 32], sizes = [2, 32], strides = [1, 1]} : vector<2x64xf32> to vector<2x32xf32>
    %398 = arith.mulf %396, %397 : vector<2x32xf32>
    %399 = vector.extract_strided_slice %388 {offsets = [0, 0], sizes = [2, 32], strides = [1, 1]} : vector<2x128xf32> to vector<2x32xf32>
    %400 = vector.extract_strided_slice %388 {offsets = [0, 64], sizes = [2, 32], strides = [1, 1]} : vector<2x128xf32> to vector<2x32xf32>
    %401 = arith.mulf %399, %400 : vector<2x32xf32>
    %402 = arith.addf %398, %401 : vector<2x32xf32>
    %403 = vector.extract_strided_slice %381 {offsets = [0, 96], sizes = [2, 32], strides = [1, 1]} : vector<2x128xf32> to vector<2x32xf32>
    %404 = math.tanh %395 : vector<2x32xf32>
    %405 = arith.mulf %403, %404 : vector<2x32xf32>
    %406 = vector.extract_strided_slice %388 {offsets = [0, 96], sizes = [2, 32], strides = [1, 1]} : vector<2x128xf32> to vector<2x32xf32>
    %407 = math.tanh %402 : vector<2x32xf32>
    %408 = arith.mulf %406, %407 : vector<2x32xf32>
    %c0_148 = arith.constant 0 : index
    %c0_149 = arith.constant 0 : index
    %409 = vector.load %arg5[%c0_148, %c0_149] : memref<2x64xf32, #tpu.memory_space<vmem>>, vector<2x32xf32>
    tpu.vector_store %arg5[%c0_148, %c0_149], %395 {strides = array<i32>} : memref<2x64xf32, #tpu.memory_space<vmem>>, vector<2x32xf32>,
    %c0_150 = arith.constant 0 : index
    %c32_151 = arith.constant 32 : index
    %410 = vector.load %arg5[%c0_150, %c32_151] : memref<2x64xf32, #tpu.memory_space<vmem>>, vector<2x32xf32>
    tpu.vector_store %arg5[%c0_150, %c32_151], %402 {strides = array<i32>} : memref<2x64xf32, #tpu.memory_space<vmem>>, vector<2x32xf32>,
    %c0_152 = arith.constant 0 : index
    %c0_153 = arith.constant 0 : index
    %411 = vector.load %arg4[%c0_152, %c0_153] : memref<2x64xf32, #tpu.memory_space<vmem>>, vector<2x32xf32>
    tpu.vector_store %arg4[%c0_152, %c0_153], %405 {strides = array<i32>} : memref<2x64xf32, #tpu.memory_space<vmem>>, vector<2x32xf32>,
    %c0_154 = arith.constant 0 : index
    %c32_155 = arith.constant 32 : index
    %412 = vector.load %arg4[%c0_154, %c32_155] : memref<2x64xf32, #tpu.memory_space<vmem>>, vector<2x32xf32>
    tpu.vector_store %arg4[%c0_154, %c32_155], %408 {strides = array<i32>} : memref<2x64xf32, #tpu.memory_space<vmem>>, vector<2x32xf32>,
    %413 = arith.index_cast %362 : i32 to index
    %c0_156 = arith.constant 0 : index
    %414 = vector.load %arg3[%413, %c0_156] : memref<16x64xf32, #tpu.memory_space<vmem>>, vector<2x32xf32>
    tpu.vector_store %arg3[%413, %c0_156], %405 {strides = array<i32>} : memref<16x64xf32, #tpu.memory_space<vmem>>, vector<2x32xf32>,
    %415 = arith.index_cast %364 : i32 to index
    %c32_157 = arith.constant 32 : index
    %416 = vector.load %arg3[%415, %c32_157] : memref<16x64xf32, #tpu.memory_space<vmem>>, vector<2x32xf32>
    tpu.vector_store %arg3[%415, %c32_157], %408 {strides = array<i32>} : memref<16x64xf32, #tpu.memory_space<vmem>>, vector<2x32xf32>,
    %c7_i32_158 = arith.constant 7 : i32
    %c0_159 = arith.constant 0 : index
    %c0_160 = arith.constant 0 : index
    %417 = vector.load %arg4[%c0_159, %c0_160] : memref<2x64xf32, #tpu.memory_space<vmem>>, vector<2x64xf32>
    %c0_161 = arith.constant 0 : index
    %c0_162 = arith.constant 0 : index
    %418 = vector.load %arg5[%c0_161, %c0_162] : memref<2x64xf32, #tpu.memory_space<vmem>>, vector<2x64xf32>
    %cst_163 = arith.constant dense<0.000000e+00> : vector<2x256xf32>
    %419 = tpu.matmul %417, %4, %cst_163 {dimension_numbers = #tpu.dot_dimension_numbers<[1], [0], [0], [1], [0, 0, 1, 1], [], []>} : vector<2x64xf32>, vector<64x256xf32>, vector<2x256xf32> -> vector<2x256xf32>
    %c2_i32_164 = arith.constant 2 : i32
    %420 = arith.muli %c7_i32_158, %c2_i32_164 : i32
    %c7_i32_165 = arith.constant 7 : i32
    %421 = arith.subi %c7_i32_165, %c7_i32_158 : i32
    %c2_i32_166 = arith.constant 2 : i32
    %422 = arith.muli %421, %c2_i32_166 : i32
    %423 = arith.index_cast %420 : i32 to index
    %c0_167 = arith.constant 0 : index
    %424 = vector.load %arg1[%423, %c0_167] : memref<16x256xf32, #tpu.memory_space<vmem>>, vector<2x256xf32>
    %425 = arith.index_cast %422 : i32 to index
    %c0_168 = arith.constant 0 : index
    %426 = vector.load %arg1[%425, %c0_168] : memref<16x256xf32, #tpu.memory_space<vmem>>, vector<2x256xf32>
    %427 = vector.extract_strided_slice %419 {offsets = [0, 0], sizes = [2, 128], strides = [1, 1]} : vector<2x256xf32> to vector<2x128xf32>
    %428 = vector.extract_strided_slice %424 {offsets = [0, 0], sizes = [2, 128], strides = [1, 1]} : vector<2x256xf32> to vector<2x128xf32>
    %429 = arith.addf %427, %428 : vector<2x128xf32>
    %430 = vector.extract_strided_slice %419 {offsets = [0, 128], sizes = [2, 128], strides = [1, 1]} : vector<2x256xf32> to vector<2x128xf32>
    %431 = vector.extract_strided_slice %426 {offsets = [0, 128], sizes = [2, 128], strides = [1, 1]} : vector<2x256xf32> to vector<2x128xf32>
    %432 = arith.addf %430, %431 : vector<2x128xf32>
    %433 = math.tanh %429 : vector<2x128xf32>
    %434 = arith.negf %429 : vector<2x128xf32>
    %435 = math.exp %434 : vector<2x128xf32>
    %cst_169 = arith.constant 1.000000e+00 : f32
    %436 = vector.broadcast %cst_169 : f32 to vector<2x128xf32>
    %437 = arith.addf %436, %435 : vector<2x128xf32>
    %438 = arith.divf %436, %437 : vector<2x128xf32>
    %439 = arith.select %10, %433, %438 : vector<2x128xi1>, vector<2x128xf32>
    %440 = math.tanh %432 : vector<2x128xf32>
    %441 = arith.negf %432 : vector<2x128xf32>
    %442 = math.exp %441 : vector<2x128xf32>
    %cst_170 = arith.constant 1.000000e+00 : f32
    %443 = vector.broadcast %cst_170 : f32 to vector<2x128xf32>
    %444 = arith.addf %443, %442 : vector<2x128xf32>
    %445 = arith.divf %443, %444 : vector<2x128xf32>
    %446 = arith.select %10, %440, %445 : vector<2x128xi1>, vector<2x128xf32>
    %447 = vector.extract_strided_slice %439 {offsets = [0, 32], sizes = [2, 32], strides = [1, 1]} : vector<2x128xf32> to vector<2x32xf32>
    %448 = vector.extract_strided_slice %418 {offsets = [0, 0], sizes = [2, 32], strides = [1, 1]} : vector<2x64xf32> to vector<2x32xf32>
    %449 = arith.mulf %447, %448 : vector<2x32xf32>
    %450 = vector.extract_strided_slice %439 {offsets = [0, 0], sizes = [2, 32], strides = [1, 1]} : vector<2x128xf32> to vector<2x32xf32>
    %451 = vector.extract_strided_slice %439 {offsets = [0, 64], sizes = [2, 32], strides = [1, 1]} : vector<2x128xf32> to vector<2x32xf32>
    %452 = arith.mulf %450, %451 : vector<2x32xf32>
    %453 = arith.addf %449, %452 : vector<2x32xf32>
    %454 = vector.extract_strided_slice %446 {offsets = [0, 32], sizes = [2, 32], strides = [1, 1]} : vector<2x128xf32> to vector<2x32xf32>
    %455 = vector.extract_strided_slice %418 {offsets = [0, 32], sizes = [2, 32], strides = [1, 1]} : vector<2x64xf32> to vector<2x32xf32>
    %456 = arith.mulf %454, %455 : vector<2x32xf32>
    %457 = vector.extract_strided_slice %446 {offsets = [0, 0], sizes = [2, 32], strides = [1, 1]} : vector<2x128xf32> to vector<2x32xf32>
    %458 = vector.extract_strided_slice %446 {offsets = [0, 64], sizes = [2, 32], strides = [1, 1]} : vector<2x128xf32> to vector<2x32xf32>
    %459 = arith.mulf %457, %458 : vector<2x32xf32>
    %460 = arith.addf %456, %459 : vector<2x32xf32>
    %461 = vector.extract_strided_slice %439 {offsets = [0, 96], sizes = [2, 32], strides = [1, 1]} : vector<2x128xf32> to vector<2x32xf32>
    %462 = math.tanh %453 : vector<2x32xf32>
    %463 = arith.mulf %461, %462 : vector<2x32xf32>
    %464 = vector.extract_strided_slice %446 {offsets = [0, 96], sizes = [2, 32], strides = [1, 1]} : vector<2x128xf32> to vector<2x32xf32>
    %465 = math.tanh %460 : vector<2x32xf32>
    %466 = arith.mulf %464, %465 : vector<2x32xf32>
    %c0_171 = arith.constant 0 : index
    %c0_172 = arith.constant 0 : index
    %467 = vector.load %arg5[%c0_171, %c0_172] : memref<2x64xf32, #tpu.memory_space<vmem>>, vector<2x32xf32>
    tpu.vector_store %arg5[%c0_171, %c0_172], %453 {strides = array<i32>} : memref<2x64xf32, #tpu.memory_space<vmem>>, vector<2x32xf32>,
    %c0_173 = arith.constant 0 : index
    %c32_174 = arith.constant 32 : index
    %468 = vector.load %arg5[%c0_173, %c32_174] : memref<2x64xf32, #tpu.memory_space<vmem>>, vector<2x32xf32>
    tpu.vector_store %arg5[%c0_173, %c32_174], %460 {strides = array<i32>} : memref<2x64xf32, #tpu.memory_space<vmem>>, vector<2x32xf32>,
    %c0_175 = arith.constant 0 : index
    %c0_176 = arith.constant 0 : index
    %469 = vector.load %arg4[%c0_175, %c0_176] : memref<2x64xf32, #tpu.memory_space<vmem>>, vector<2x32xf32>
    tpu.vector_store %arg4[%c0_175, %c0_176], %463 {strides = array<i32>} : memref<2x64xf32, #tpu.memory_space<vmem>>, vector<2x32xf32>,
    %c0_177 = arith.constant 0 : index
    %c32_178 = arith.constant 32 : index
    %470 = vector.load %arg4[%c0_177, %c32_178] : memref<2x64xf32, #tpu.memory_space<vmem>>, vector<2x32xf32>
    tpu.vector_store %arg4[%c0_177, %c32_178], %466 {strides = array<i32>} : memref<2x64xf32, #tpu.memory_space<vmem>>, vector<2x32xf32>,
    %471 = arith.index_cast %420 : i32 to index
    %c0_179 = arith.constant 0 : index
    %472 = vector.load %arg3[%471, %c0_179] : memref<16x64xf32, #tpu.memory_space<vmem>>, vector<2x32xf32>
    tpu.vector_store %arg3[%471, %c0_179], %463 {strides = array<i32>} : memref<16x64xf32, #tpu.memory_space<vmem>>, vector<2x32xf32>,
    %473 = arith.index_cast %422 : i32 to index
    %c32_180 = arith.constant 32 : index
    %474 = vector.load %arg3[%473, %c32_180] : memref<16x64xf32, #tpu.memory_space<vmem>>, vector<2x32xf32>
    tpu.vector_store %arg3[%473, %c32_180], %466 {strides = array<i32>} : memref<16x64xf32, #tpu.memory_space<vmem>>, vector<2x32xf32>,
    %c8_i32 = arith.constant 8 : i32
    return
  }
  func.func @transform_0(%arg0: i32) -> (i32, i32) {
    %c0_i32 = arith.constant 0 : i32
    %c0_i32_0 = arith.constant 0 : i32
    %c0_i32_1 = arith.constant 0 : i32
    return %c0_i32, %c0_i32_0 : i32, i32
  }
  func.func @transform_1(%arg0: i32) -> (i32, i32) {
    %c0_i32 = arith.constant 0 : i32
    %c0_i32_0 = arith.constant 0 : i32
    %c0_i32_1 = arith.constant 0 : i32
    return %c0_i32, %c0_i32_0 : i32, i32
  }
  func.func @transform_2(%arg0: i32) -> (i32, i32) {
    %c0_i32 = arith.constant 0 : i32
    %c0_i32_0 = arith.constant 0 : i32
    %c0_i32_1 = arith.constant 0 : i32
    return %c0_i32, %c0_i32_0 : i32, i32
  }
}

module attributes {stable_mosaic.version = 11 : i64} {
  func.func @_bilstm_kernel(%arg0: i32, %arg1: memref<16x256xf32, #tpu.memory_space<vmem>>, %arg2: memref<64x256xf32, #tpu.memory_space<vmem>>, %arg3: memref<64x2xf32, #tpu.memory_space<vmem>>, %arg4: memref<1x2xf32, #tpu.memory_space<vmem>>, %arg5: memref<16x2xf32, #tpu.memory_space<vmem>>, %arg6: memref<16x64xf32, #tpu.memory_space<vmem>>, %arg7: memref<2x64xf32, #tpu.memory_space<vmem>>, %arg8: memref<2x64xf32, #tpu.memory_space<vmem>>) attributes {dimension_semantics = [#tpu.dimension_semantics<arbitrary>], iteration_bounds = array<i64: 1>, scalar_prefetch = 0 : i64, scratch_operands = 3 : i64, tpu.core_type = #tpu.core_type<tc>, window_params = [{pipeline_mode = #tpu.pipeline_mode<synchronous>, transform_indices = @transform_0, window_bounds = array<i64: 16, 256>}, {pipeline_mode = #tpu.pipeline_mode<synchronous>, transform_indices = @transform_1, window_bounds = array<i64: 64, 256>}, {pipeline_mode = #tpu.pipeline_mode<synchronous>, transform_indices = @transform_2, window_bounds = array<i64: 64, 2>}, {pipeline_mode = #tpu.pipeline_mode<synchronous>, transform_indices = @transform_3, window_bounds = array<i64: 1, 2>}, {pipeline_mode = #tpu.pipeline_mode<synchronous>, transform_indices = @transform_4, window_bounds = array<i64: 16, 2>}]} {
    %cst = arith.constant 0.000000e+00 : f32
    %0 = vector.broadcast %cst : f32 to vector<2x64xf32>
    %c0 = arith.constant 0 : index
    %c0_0 = arith.constant 0 : index
    %1 = vector.load %arg7[%c0, %c0_0] : memref<2x64xf32, #tpu.memory_space<vmem>>, vector<2x64xf32>
    tpu.vector_store %arg7[%c0, %c0_0], %0 {strides = array<i32>} : memref<2x64xf32, #tpu.memory_space<vmem>>, vector<2x64xf32>,
    %cst_1 = arith.constant 0.000000e+00 : f32
    %2 = vector.broadcast %cst_1 : f32 to vector<2x64xf32>
    %c0_2 = arith.constant 0 : index
    %c0_3 = arith.constant 0 : index
    %3 = vector.load %arg8[%c0_2, %c0_3] : memref<2x64xf32, #tpu.memory_space<vmem>>, vector<2x64xf32>
    tpu.vector_store %arg8[%c0_2, %c0_3], %2 {strides = array<i32>} : memref<2x64xf32, #tpu.memory_space<vmem>>, vector<2x64xf32>,
    %c0_4 = arith.constant 0 : index
    %c0_5 = arith.constant 0 : index
    %4 = vector.load %arg2[%c0_4, %c0_5] : memref<64x256xf32, #tpu.memory_space<vmem>>, vector<64x256xf32>
    %5 = tpu.iota {dimensions = array<i32: 1>} : vector<2x128xi32>
    %c64_i32 = arith.constant 64 : i32
    %6 = vector.broadcast %c64_i32 : i32 to vector<2x128xi32>
    %7 = arith.cmpi sge, %5, %6 : vector<2x128xi32>
    %c96_i32 = arith.constant 96 : i32
    %8 = vector.broadcast %c96_i32 : i32 to vector<2x128xi32>
    %9 = arith.cmpi slt, %5, %8 : vector<2x128xi32>
    %10 = arith.andi %7, %9 : vector<2x128xi1>
    %c0_i32 = arith.constant 0 : i32
    %c0_6 = arith.constant 0 : index
    %c0_7 = arith.constant 0 : index
    %11 = vector.load %arg7[%c0_6, %c0_7] : memref<2x64xf32, #tpu.memory_space<vmem>>, vector<2x64xf32>
    %c0_8 = arith.constant 0 : index
    %c0_9 = arith.constant 0 : index
    %12 = vector.load %arg8[%c0_8, %c0_9] : memref<2x64xf32, #tpu.memory_space<vmem>>, vector<2x64xf32>
    %cst_10 = arith.constant dense<0.000000e+00> : vector<2x256xf32>
    %13 = tpu.matmul %11, %4, %cst_10 {dimension_numbers = #tpu.dot_dimension_numbers<[1], [0], [0], [1], [0, 0, 1, 1], [], []>} : vector<2x64xf32>, vector<64x256xf32>, vector<2x256xf32> -> vector<2x256xf32>
    %c2_i32 = arith.constant 2 : i32
    %14 = arith.muli %c0_i32, %c2_i32 : i32
    %c7_i32 = arith.constant 7 : i32
    %15 = arith.subi %c7_i32, %c0_i32 : i32
    %c2_i32_11 = arith.constant 2 : i32
    %16 = arith.muli %15, %c2_i32_11 : i32
    %17 = arith.index_cast %14 : i32 to index
    %c0_12 = arith.constant 0 : index
    %18 = vector.load %arg1[%17, %c0_12] : memref<16x256xf32, #tpu.memory_space<vmem>>, vector<2x256xf32>
    %19 = arith.index_cast %16 : i32 to index
    %c0_13 = arith.constant 0 : index
    %20 = vector.load %arg1[%19, %c0_13] : memref<16x256xf32, #tpu.memory_space<vmem>>, vector<2x256xf32>
    %21 = vector.extract_strided_slice %13 {offsets = [0, 0], sizes = [2, 128], strides = [1, 1]} : vector<2x256xf32> to vector<2x128xf32>
    %22 = vector.extract_strided_slice %18 {offsets = [0, 0], sizes = [2, 128], strides = [1, 1]} : vector<2x256xf32> to vector<2x128xf32>
    %23 = arith.addf %21, %22 : vector<2x128xf32>
    %24 = vector.extract_strided_slice %13 {offsets = [0, 128], sizes = [2, 128], strides = [1, 1]} : vector<2x256xf32> to vector<2x128xf32>
    %25 = vector.extract_strided_slice %20 {offsets = [0, 128], sizes = [2, 128], strides = [1, 1]} : vector<2x256xf32> to vector<2x128xf32>
    %26 = arith.addf %24, %25 : vector<2x128xf32>
    %27 = math.tanh %23 : vector<2x128xf32>
    %28 = arith.negf %23 : vector<2x128xf32>
    %29 = math.exp %28 : vector<2x128xf32>
    %cst_14 = arith.constant 1.000000e+00 : f32
    %30 = vector.broadcast %cst_14 : f32 to vector<2x128xf32>
    %31 = arith.addf %30, %29 : vector<2x128xf32>
    %32 = arith.divf %30, %31 : vector<2x128xf32>
    %33 = arith.select %10, %27, %32 : vector<2x128xi1>, vector<2x128xf32>
    %34 = math.tanh %26 : vector<2x128xf32>
    %35 = arith.negf %26 : vector<2x128xf32>
    %36 = math.exp %35 : vector<2x128xf32>
    %cst_15 = arith.constant 1.000000e+00 : f32
    %37 = vector.broadcast %cst_15 : f32 to vector<2x128xf32>
    %38 = arith.addf %37, %36 : vector<2x128xf32>
    %39 = arith.divf %37, %38 : vector<2x128xf32>
    %40 = arith.select %10, %34, %39 : vector<2x128xi1>, vector<2x128xf32>
    %41 = vector.extract_strided_slice %33 {offsets = [0, 32], sizes = [2, 32], strides = [1, 1]} : vector<2x128xf32> to vector<2x32xf32>
    %42 = vector.extract_strided_slice %12 {offsets = [0, 0], sizes = [2, 32], strides = [1, 1]} : vector<2x64xf32> to vector<2x32xf32>
    %43 = arith.mulf %41, %42 : vector<2x32xf32>
    %44 = vector.extract_strided_slice %33 {offsets = [0, 0], sizes = [2, 32], strides = [1, 1]} : vector<2x128xf32> to vector<2x32xf32>
    %45 = vector.extract_strided_slice %33 {offsets = [0, 64], sizes = [2, 32], strides = [1, 1]} : vector<2x128xf32> to vector<2x32xf32>
    %46 = arith.mulf %44, %45 : vector<2x32xf32>
    %47 = arith.addf %43, %46 : vector<2x32xf32>
    %48 = vector.extract_strided_slice %40 {offsets = [0, 32], sizes = [2, 32], strides = [1, 1]} : vector<2x128xf32> to vector<2x32xf32>
    %49 = vector.extract_strided_slice %12 {offsets = [0, 32], sizes = [2, 32], strides = [1, 1]} : vector<2x64xf32> to vector<2x32xf32>
    %50 = arith.mulf %48, %49 : vector<2x32xf32>
    %51 = vector.extract_strided_slice %40 {offsets = [0, 0], sizes = [2, 32], strides = [1, 1]} : vector<2x128xf32> to vector<2x32xf32>
    %52 = vector.extract_strided_slice %40 {offsets = [0, 64], sizes = [2, 32], strides = [1, 1]} : vector<2x128xf32> to vector<2x32xf32>
    %53 = arith.mulf %51, %52 : vector<2x32xf32>
    %54 = arith.addf %50, %53 : vector<2x32xf32>
    %55 = vector.extract_strided_slice %33 {offsets = [0, 96], sizes = [2, 32], strides = [1, 1]} : vector<2x128xf32> to vector<2x32xf32>
    %56 = math.tanh %47 : vector<2x32xf32>
    %57 = arith.mulf %55, %56 : vector<2x32xf32>
    %58 = vector.extract_strided_slice %40 {offsets = [0, 96], sizes = [2, 32], strides = [1, 1]} : vector<2x128xf32> to vector<2x32xf32>
    %59 = math.tanh %54 : vector<2x32xf32>
    %60 = arith.mulf %58, %59 : vector<2x32xf32>
    %c0_16 = arith.constant 0 : index
    %c0_17 = arith.constant 0 : index
    %61 = vector.load %arg8[%c0_16, %c0_17] : memref<2x64xf32, #tpu.memory_space<vmem>>, vector<2x32xf32>
    tpu.vector_store %arg8[%c0_16, %c0_17], %47 {strides = array<i32>} : memref<2x64xf32, #tpu.memory_space<vmem>>, vector<2x32xf32>,
    %c0_18 = arith.constant 0 : index
    %c32 = arith.constant 32 : index
    %62 = vector.load %arg8[%c0_18, %c32] : memref<2x64xf32, #tpu.memory_space<vmem>>, vector<2x32xf32>
    tpu.vector_store %arg8[%c0_18, %c32], %54 {strides = array<i32>} : memref<2x64xf32, #tpu.memory_space<vmem>>, vector<2x32xf32>,
    %c0_19 = arith.constant 0 : index
    %c0_20 = arith.constant 0 : index
    %63 = vector.load %arg7[%c0_19, %c0_20] : memref<2x64xf32, #tpu.memory_space<vmem>>, vector<2x32xf32>
    tpu.vector_store %arg7[%c0_19, %c0_20], %57 {strides = array<i32>} : memref<2x64xf32, #tpu.memory_space<vmem>>, vector<2x32xf32>,
    %c0_21 = arith.constant 0 : index
    %c32_22 = arith.constant 32 : index
    %64 = vector.load %arg7[%c0_21, %c32_22] : memref<2x64xf32, #tpu.memory_space<vmem>>, vector<2x32xf32>
    tpu.vector_store %arg7[%c0_21, %c32_22], %60 {strides = array<i32>} : memref<2x64xf32, #tpu.memory_space<vmem>>, vector<2x32xf32>,
    %65 = arith.index_cast %14 : i32 to index
    %c0_23 = arith.constant 0 : index
    %66 = vector.load %arg6[%65, %c0_23] : memref<16x64xf32, #tpu.memory_space<vmem>>, vector<2x32xf32>
    tpu.vector_store %arg6[%65, %c0_23], %57 {strides = array<i32>} : memref<16x64xf32, #tpu.memory_space<vmem>>, vector<2x32xf32>,
    %67 = arith.index_cast %16 : i32 to index
    %c32_24 = arith.constant 32 : index
    %68 = vector.load %arg6[%67, %c32_24] : memref<16x64xf32, #tpu.memory_space<vmem>>, vector<2x32xf32>
    tpu.vector_store %arg6[%67, %c32_24], %60 {strides = array<i32>} : memref<16x64xf32, #tpu.memory_space<vmem>>, vector<2x32xf32>,
    %c1_i32 = arith.constant 1 : i32
    %c0_25 = arith.constant 0 : index
    %c0_26 = arith.constant 0 : index
    %69 = vector.load %arg7[%c0_25, %c0_26] : memref<2x64xf32, #tpu.memory_space<vmem>>, vector<2x64xf32>
    %c0_27 = arith.constant 0 : index
    %c0_28 = arith.constant 0 : index
    %70 = vector.load %arg8[%c0_27, %c0_28] : memref<2x64xf32, #tpu.memory_space<vmem>>, vector<2x64xf32>
    %cst_29 = arith.constant dense<0.000000e+00> : vector<2x256xf32>
    %71 = tpu.matmul %69, %4, %cst_29 {dimension_numbers = #tpu.dot_dimension_numbers<[1], [0], [0], [1], [0, 0, 1, 1], [], []>} : vector<2x64xf32>, vector<64x256xf32>, vector<2x256xf32> -> vector<2x256xf32>
    %c2_i32_30 = arith.constant 2 : i32
    %72 = arith.muli %c1_i32, %c2_i32_30 : i32
    %c7_i32_31 = arith.constant 7 : i32
    %73 = arith.subi %c7_i32_31, %c1_i32 : i32
    %c2_i32_32 = arith.constant 2 : i32
    %74 = arith.muli %73, %c2_i32_32 : i32
    %75 = arith.index_cast %72 : i32 to index
    %c0_33 = arith.constant 0 : index
    %76 = vector.load %arg1[%75, %c0_33] : memref<16x256xf32, #tpu.memory_space<vmem>>, vector<2x256xf32>
    %77 = arith.index_cast %74 : i32 to index
    %c0_34 = arith.constant 0 : index
    %78 = vector.load %arg1[%77, %c0_34] : memref<16x256xf32, #tpu.memory_space<vmem>>, vector<2x256xf32>
    %79 = vector.extract_strided_slice %71 {offsets = [0, 0], sizes = [2, 128], strides = [1, 1]} : vector<2x256xf32> to vector<2x128xf32>
    %80 = vector.extract_strided_slice %76 {offsets = [0, 0], sizes = [2, 128], strides = [1, 1]} : vector<2x256xf32> to vector<2x128xf32>
    %81 = arith.addf %79, %80 : vector<2x128xf32>
    %82 = vector.extract_strided_slice %71 {offsets = [0, 128], sizes = [2, 128], strides = [1, 1]} : vector<2x256xf32> to vector<2x128xf32>
    %83 = vector.extract_strided_slice %78 {offsets = [0, 128], sizes = [2, 128], strides = [1, 1]} : vector<2x256xf32> to vector<2x128xf32>
    %84 = arith.addf %82, %83 : vector<2x128xf32>
    %85 = math.tanh %81 : vector<2x128xf32>
    %86 = arith.negf %81 : vector<2x128xf32>
    %87 = math.exp %86 : vector<2x128xf32>
    %cst_35 = arith.constant 1.000000e+00 : f32
    %88 = vector.broadcast %cst_35 : f32 to vector<2x128xf32>
    %89 = arith.addf %88, %87 : vector<2x128xf32>
    %90 = arith.divf %88, %89 : vector<2x128xf32>
    %91 = arith.select %10, %85, %90 : vector<2x128xi1>, vector<2x128xf32>
    %92 = math.tanh %84 : vector<2x128xf32>
    %93 = arith.negf %84 : vector<2x128xf32>
    %94 = math.exp %93 : vector<2x128xf32>
    %cst_36 = arith.constant 1.000000e+00 : f32
    %95 = vector.broadcast %cst_36 : f32 to vector<2x128xf32>
    %96 = arith.addf %95, %94 : vector<2x128xf32>
    %97 = arith.divf %95, %96 : vector<2x128xf32>
    %98 = arith.select %10, %92, %97 : vector<2x128xi1>, vector<2x128xf32>
    %99 = vector.extract_strided_slice %91 {offsets = [0, 32], sizes = [2, 32], strides = [1, 1]} : vector<2x128xf32> to vector<2x32xf32>
    %100 = vector.extract_strided_slice %70 {offsets = [0, 0], sizes = [2, 32], strides = [1, 1]} : vector<2x64xf32> to vector<2x32xf32>
    %101 = arith.mulf %99, %100 : vector<2x32xf32>
    %102 = vector.extract_strided_slice %91 {offsets = [0, 0], sizes = [2, 32], strides = [1, 1]} : vector<2x128xf32> to vector<2x32xf32>
    %103 = vector.extract_strided_slice %91 {offsets = [0, 64], sizes = [2, 32], strides = [1, 1]} : vector<2x128xf32> to vector<2x32xf32>
    %104 = arith.mulf %102, %103 : vector<2x32xf32>
    %105 = arith.addf %101, %104 : vector<2x32xf32>
    %106 = vector.extract_strided_slice %98 {offsets = [0, 32], sizes = [2, 32], strides = [1, 1]} : vector<2x128xf32> to vector<2x32xf32>
    %107 = vector.extract_strided_slice %70 {offsets = [0, 32], sizes = [2, 32], strides = [1, 1]} : vector<2x64xf32> to vector<2x32xf32>
    %108 = arith.mulf %106, %107 : vector<2x32xf32>
    %109 = vector.extract_strided_slice %98 {offsets = [0, 0], sizes = [2, 32], strides = [1, 1]} : vector<2x128xf32> to vector<2x32xf32>
    %110 = vector.extract_strided_slice %98 {offsets = [0, 64], sizes = [2, 32], strides = [1, 1]} : vector<2x128xf32> to vector<2x32xf32>
    %111 = arith.mulf %109, %110 : vector<2x32xf32>
    %112 = arith.addf %108, %111 : vector<2x32xf32>
    %113 = vector.extract_strided_slice %91 {offsets = [0, 96], sizes = [2, 32], strides = [1, 1]} : vector<2x128xf32> to vector<2x32xf32>
    %114 = math.tanh %105 : vector<2x32xf32>
    %115 = arith.mulf %113, %114 : vector<2x32xf32>
    %116 = vector.extract_strided_slice %98 {offsets = [0, 96], sizes = [2, 32], strides = [1, 1]} : vector<2x128xf32> to vector<2x32xf32>
    %117 = math.tanh %112 : vector<2x32xf32>
    %118 = arith.mulf %116, %117 : vector<2x32xf32>
    %c0_37 = arith.constant 0 : index
    %c0_38 = arith.constant 0 : index
    %119 = vector.load %arg8[%c0_37, %c0_38] : memref<2x64xf32, #tpu.memory_space<vmem>>, vector<2x32xf32>
    tpu.vector_store %arg8[%c0_37, %c0_38], %105 {strides = array<i32>} : memref<2x64xf32, #tpu.memory_space<vmem>>, vector<2x32xf32>,
    %c0_39 = arith.constant 0 : index
    %c32_40 = arith.constant 32 : index
    %120 = vector.load %arg8[%c0_39, %c32_40] : memref<2x64xf32, #tpu.memory_space<vmem>>, vector<2x32xf32>
    tpu.vector_store %arg8[%c0_39, %c32_40], %112 {strides = array<i32>} : memref<2x64xf32, #tpu.memory_space<vmem>>, vector<2x32xf32>,
    %c0_41 = arith.constant 0 : index
    %c0_42 = arith.constant 0 : index
    %121 = vector.load %arg7[%c0_41, %c0_42] : memref<2x64xf32, #tpu.memory_space<vmem>>, vector<2x32xf32>
    tpu.vector_store %arg7[%c0_41, %c0_42], %115 {strides = array<i32>} : memref<2x64xf32, #tpu.memory_space<vmem>>, vector<2x32xf32>,
    %c0_43 = arith.constant 0 : index
    %c32_44 = arith.constant 32 : index
    %122 = vector.load %arg7[%c0_43, %c32_44] : memref<2x64xf32, #tpu.memory_space<vmem>>, vector<2x32xf32>
    tpu.vector_store %arg7[%c0_43, %c32_44], %118 {strides = array<i32>} : memref<2x64xf32, #tpu.memory_space<vmem>>, vector<2x32xf32>,
    %123 = arith.index_cast %72 : i32 to index
    %c0_45 = arith.constant 0 : index
    %124 = vector.load %arg6[%123, %c0_45] : memref<16x64xf32, #tpu.memory_space<vmem>>, vector<2x32xf32>
    tpu.vector_store %arg6[%123, %c0_45], %115 {strides = array<i32>} : memref<16x64xf32, #tpu.memory_space<vmem>>, vector<2x32xf32>,
    %125 = arith.index_cast %74 : i32 to index
    %c32_46 = arith.constant 32 : index
    %126 = vector.load %arg6[%125, %c32_46] : memref<16x64xf32, #tpu.memory_space<vmem>>, vector<2x32xf32>
    tpu.vector_store %arg6[%125, %c32_46], %118 {strides = array<i32>} : memref<16x64xf32, #tpu.memory_space<vmem>>, vector<2x32xf32>,
    %c2_i32_47 = arith.constant 2 : i32
    %c0_48 = arith.constant 0 : index
    %c0_49 = arith.constant 0 : index
    %127 = vector.load %arg7[%c0_48, %c0_49] : memref<2x64xf32, #tpu.memory_space<vmem>>, vector<2x64xf32>
    %c0_50 = arith.constant 0 : index
    %c0_51 = arith.constant 0 : index
    %128 = vector.load %arg8[%c0_50, %c0_51] : memref<2x64xf32, #tpu.memory_space<vmem>>, vector<2x64xf32>
    %cst_52 = arith.constant dense<0.000000e+00> : vector<2x256xf32>
    %129 = tpu.matmul %127, %4, %cst_52 {dimension_numbers = #tpu.dot_dimension_numbers<[1], [0], [0], [1], [0, 0, 1, 1], [], []>} : vector<2x64xf32>, vector<64x256xf32>, vector<2x256xf32> -> vector<2x256xf32>
    %c2_i32_53 = arith.constant 2 : i32
    %130 = arith.muli %c2_i32_47, %c2_i32_53 : i32
    %c7_i32_54 = arith.constant 7 : i32
    %131 = arith.subi %c7_i32_54, %c2_i32_47 : i32
    %c2_i32_55 = arith.constant 2 : i32
    %132 = arith.muli %131, %c2_i32_55 : i32
    %133 = arith.index_cast %130 : i32 to index
    %c0_56 = arith.constant 0 : index
    %134 = vector.load %arg1[%133, %c0_56] : memref<16x256xf32, #tpu.memory_space<vmem>>, vector<2x256xf32>
    %135 = arith.index_cast %132 : i32 to index
    %c0_57 = arith.constant 0 : index
    %136 = vector.load %arg1[%135, %c0_57] : memref<16x256xf32, #tpu.memory_space<vmem>>, vector<2x256xf32>
    %137 = vector.extract_strided_slice %129 {offsets = [0, 0], sizes = [2, 128], strides = [1, 1]} : vector<2x256xf32> to vector<2x128xf32>
    %138 = vector.extract_strided_slice %134 {offsets = [0, 0], sizes = [2, 128], strides = [1, 1]} : vector<2x256xf32> to vector<2x128xf32>
    %139 = arith.addf %137, %138 : vector<2x128xf32>
    %140 = vector.extract_strided_slice %129 {offsets = [0, 128], sizes = [2, 128], strides = [1, 1]} : vector<2x256xf32> to vector<2x128xf32>
    %141 = vector.extract_strided_slice %136 {offsets = [0, 128], sizes = [2, 128], strides = [1, 1]} : vector<2x256xf32> to vector<2x128xf32>
    %142 = arith.addf %140, %141 : vector<2x128xf32>
    %143 = math.tanh %139 : vector<2x128xf32>
    %144 = arith.negf %139 : vector<2x128xf32>
    %145 = math.exp %144 : vector<2x128xf32>
    %cst_58 = arith.constant 1.000000e+00 : f32
    %146 = vector.broadcast %cst_58 : f32 to vector<2x128xf32>
    %147 = arith.addf %146, %145 : vector<2x128xf32>
    %148 = arith.divf %146, %147 : vector<2x128xf32>
    %149 = arith.select %10, %143, %148 : vector<2x128xi1>, vector<2x128xf32>
    %150 = math.tanh %142 : vector<2x128xf32>
    %151 = arith.negf %142 : vector<2x128xf32>
    %152 = math.exp %151 : vector<2x128xf32>
    %cst_59 = arith.constant 1.000000e+00 : f32
    %153 = vector.broadcast %cst_59 : f32 to vector<2x128xf32>
    %154 = arith.addf %153, %152 : vector<2x128xf32>
    %155 = arith.divf %153, %154 : vector<2x128xf32>
    %156 = arith.select %10, %150, %155 : vector<2x128xi1>, vector<2x128xf32>
    %157 = vector.extract_strided_slice %149 {offsets = [0, 32], sizes = [2, 32], strides = [1, 1]} : vector<2x128xf32> to vector<2x32xf32>
    %158 = vector.extract_strided_slice %128 {offsets = [0, 0], sizes = [2, 32], strides = [1, 1]} : vector<2x64xf32> to vector<2x32xf32>
    %159 = arith.mulf %157, %158 : vector<2x32xf32>
    %160 = vector.extract_strided_slice %149 {offsets = [0, 0], sizes = [2, 32], strides = [1, 1]} : vector<2x128xf32> to vector<2x32xf32>
    %161 = vector.extract_strided_slice %149 {offsets = [0, 64], sizes = [2, 32], strides = [1, 1]} : vector<2x128xf32> to vector<2x32xf32>
    %162 = arith.mulf %160, %161 : vector<2x32xf32>
    %163 = arith.addf %159, %162 : vector<2x32xf32>
    %164 = vector.extract_strided_slice %156 {offsets = [0, 32], sizes = [2, 32], strides = [1, 1]} : vector<2x128xf32> to vector<2x32xf32>
    %165 = vector.extract_strided_slice %128 {offsets = [0, 32], sizes = [2, 32], strides = [1, 1]} : vector<2x64xf32> to vector<2x32xf32>
    %166 = arith.mulf %164, %165 : vector<2x32xf32>
    %167 = vector.extract_strided_slice %156 {offsets = [0, 0], sizes = [2, 32], strides = [1, 1]} : vector<2x128xf32> to vector<2x32xf32>
    %168 = vector.extract_strided_slice %156 {offsets = [0, 64], sizes = [2, 32], strides = [1, 1]} : vector<2x128xf32> to vector<2x32xf32>
    %169 = arith.mulf %167, %168 : vector<2x32xf32>
    %170 = arith.addf %166, %169 : vector<2x32xf32>
    %171 = vector.extract_strided_slice %149 {offsets = [0, 96], sizes = [2, 32], strides = [1, 1]} : vector<2x128xf32> to vector<2x32xf32>
    %172 = math.tanh %163 : vector<2x32xf32>
    %173 = arith.mulf %171, %172 : vector<2x32xf32>
    %174 = vector.extract_strided_slice %156 {offsets = [0, 96], sizes = [2, 32], strides = [1, 1]} : vector<2x128xf32> to vector<2x32xf32>
    %175 = math.tanh %170 : vector<2x32xf32>
    %176 = arith.mulf %174, %175 : vector<2x32xf32>
    %c0_60 = arith.constant 0 : index
    %c0_61 = arith.constant 0 : index
    %177 = vector.load %arg8[%c0_60, %c0_61] : memref<2x64xf32, #tpu.memory_space<vmem>>, vector<2x32xf32>
    tpu.vector_store %arg8[%c0_60, %c0_61], %163 {strides = array<i32>} : memref<2x64xf32, #tpu.memory_space<vmem>>, vector<2x32xf32>,
    %c0_62 = arith.constant 0 : index
    %c32_63 = arith.constant 32 : index
    %178 = vector.load %arg8[%c0_62, %c32_63] : memref<2x64xf32, #tpu.memory_space<vmem>>, vector<2x32xf32>
    tpu.vector_store %arg8[%c0_62, %c32_63], %170 {strides = array<i32>} : memref<2x64xf32, #tpu.memory_space<vmem>>, vector<2x32xf32>,
    %c0_64 = arith.constant 0 : index
    %c0_65 = arith.constant 0 : index
    %179 = vector.load %arg7[%c0_64, %c0_65] : memref<2x64xf32, #tpu.memory_space<vmem>>, vector<2x32xf32>
    tpu.vector_store %arg7[%c0_64, %c0_65], %173 {strides = array<i32>} : memref<2x64xf32, #tpu.memory_space<vmem>>, vector<2x32xf32>,
    %c0_66 = arith.constant 0 : index
    %c32_67 = arith.constant 32 : index
    %180 = vector.load %arg7[%c0_66, %c32_67] : memref<2x64xf32, #tpu.memory_space<vmem>>, vector<2x32xf32>
    tpu.vector_store %arg7[%c0_66, %c32_67], %176 {strides = array<i32>} : memref<2x64xf32, #tpu.memory_space<vmem>>, vector<2x32xf32>,
    %181 = arith.index_cast %130 : i32 to index
    %c0_68 = arith.constant 0 : index
    %182 = vector.load %arg6[%181, %c0_68] : memref<16x64xf32, #tpu.memory_space<vmem>>, vector<2x32xf32>
    tpu.vector_store %arg6[%181, %c0_68], %173 {strides = array<i32>} : memref<16x64xf32, #tpu.memory_space<vmem>>, vector<2x32xf32>,
    %183 = arith.index_cast %132 : i32 to index
    %c32_69 = arith.constant 32 : index
    %184 = vector.load %arg6[%183, %c32_69] : memref<16x64xf32, #tpu.memory_space<vmem>>, vector<2x32xf32>
    tpu.vector_store %arg6[%183, %c32_69], %176 {strides = array<i32>} : memref<16x64xf32, #tpu.memory_space<vmem>>, vector<2x32xf32>,
    %c3_i32 = arith.constant 3 : i32
    %c0_70 = arith.constant 0 : index
    %c0_71 = arith.constant 0 : index
    %185 = vector.load %arg7[%c0_70, %c0_71] : memref<2x64xf32, #tpu.memory_space<vmem>>, vector<2x64xf32>
    %c0_72 = arith.constant 0 : index
    %c0_73 = arith.constant 0 : index
    %186 = vector.load %arg8[%c0_72, %c0_73] : memref<2x64xf32, #tpu.memory_space<vmem>>, vector<2x64xf32>
    %cst_74 = arith.constant dense<0.000000e+00> : vector<2x256xf32>
    %187 = tpu.matmul %185, %4, %cst_74 {dimension_numbers = #tpu.dot_dimension_numbers<[1], [0], [0], [1], [0, 0, 1, 1], [], []>} : vector<2x64xf32>, vector<64x256xf32>, vector<2x256xf32> -> vector<2x256xf32>
    %c2_i32_75 = arith.constant 2 : i32
    %188 = arith.muli %c3_i32, %c2_i32_75 : i32
    %c7_i32_76 = arith.constant 7 : i32
    %189 = arith.subi %c7_i32_76, %c3_i32 : i32
    %c2_i32_77 = arith.constant 2 : i32
    %190 = arith.muli %189, %c2_i32_77 : i32
    %191 = arith.index_cast %188 : i32 to index
    %c0_78 = arith.constant 0 : index
    %192 = vector.load %arg1[%191, %c0_78] : memref<16x256xf32, #tpu.memory_space<vmem>>, vector<2x256xf32>
    %193 = arith.index_cast %190 : i32 to index
    %c0_79 = arith.constant 0 : index
    %194 = vector.load %arg1[%193, %c0_79] : memref<16x256xf32, #tpu.memory_space<vmem>>, vector<2x256xf32>
    %195 = vector.extract_strided_slice %187 {offsets = [0, 0], sizes = [2, 128], strides = [1, 1]} : vector<2x256xf32> to vector<2x128xf32>
    %196 = vector.extract_strided_slice %192 {offsets = [0, 0], sizes = [2, 128], strides = [1, 1]} : vector<2x256xf32> to vector<2x128xf32>
    %197 = arith.addf %195, %196 : vector<2x128xf32>
    %198 = vector.extract_strided_slice %187 {offsets = [0, 128], sizes = [2, 128], strides = [1, 1]} : vector<2x256xf32> to vector<2x128xf32>
    %199 = vector.extract_strided_slice %194 {offsets = [0, 128], sizes = [2, 128], strides = [1, 1]} : vector<2x256xf32> to vector<2x128xf32>
    %200 = arith.addf %198, %199 : vector<2x128xf32>
    %201 = math.tanh %197 : vector<2x128xf32>
    %202 = arith.negf %197 : vector<2x128xf32>
    %203 = math.exp %202 : vector<2x128xf32>
    %cst_80 = arith.constant 1.000000e+00 : f32
    %204 = vector.broadcast %cst_80 : f32 to vector<2x128xf32>
    %205 = arith.addf %204, %203 : vector<2x128xf32>
    %206 = arith.divf %204, %205 : vector<2x128xf32>
    %207 = arith.select %10, %201, %206 : vector<2x128xi1>, vector<2x128xf32>
    %208 = math.tanh %200 : vector<2x128xf32>
    %209 = arith.negf %200 : vector<2x128xf32>
    %210 = math.exp %209 : vector<2x128xf32>
    %cst_81 = arith.constant 1.000000e+00 : f32
    %211 = vector.broadcast %cst_81 : f32 to vector<2x128xf32>
    %212 = arith.addf %211, %210 : vector<2x128xf32>
    %213 = arith.divf %211, %212 : vector<2x128xf32>
    %214 = arith.select %10, %208, %213 : vector<2x128xi1>, vector<2x128xf32>
    %215 = vector.extract_strided_slice %207 {offsets = [0, 32], sizes = [2, 32], strides = [1, 1]} : vector<2x128xf32> to vector<2x32xf32>
    %216 = vector.extract_strided_slice %186 {offsets = [0, 0], sizes = [2, 32], strides = [1, 1]} : vector<2x64xf32> to vector<2x32xf32>
    %217 = arith.mulf %215, %216 : vector<2x32xf32>
    %218 = vector.extract_strided_slice %207 {offsets = [0, 0], sizes = [2, 32], strides = [1, 1]} : vector<2x128xf32> to vector<2x32xf32>
    %219 = vector.extract_strided_slice %207 {offsets = [0, 64], sizes = [2, 32], strides = [1, 1]} : vector<2x128xf32> to vector<2x32xf32>
    %220 = arith.mulf %218, %219 : vector<2x32xf32>
    %221 = arith.addf %217, %220 : vector<2x32xf32>
    %222 = vector.extract_strided_slice %214 {offsets = [0, 32], sizes = [2, 32], strides = [1, 1]} : vector<2x128xf32> to vector<2x32xf32>
    %223 = vector.extract_strided_slice %186 {offsets = [0, 32], sizes = [2, 32], strides = [1, 1]} : vector<2x64xf32> to vector<2x32xf32>
    %224 = arith.mulf %222, %223 : vector<2x32xf32>
    %225 = vector.extract_strided_slice %214 {offsets = [0, 0], sizes = [2, 32], strides = [1, 1]} : vector<2x128xf32> to vector<2x32xf32>
    %226 = vector.extract_strided_slice %214 {offsets = [0, 64], sizes = [2, 32], strides = [1, 1]} : vector<2x128xf32> to vector<2x32xf32>
    %227 = arith.mulf %225, %226 : vector<2x32xf32>
    %228 = arith.addf %224, %227 : vector<2x32xf32>
    %229 = vector.extract_strided_slice %207 {offsets = [0, 96], sizes = [2, 32], strides = [1, 1]} : vector<2x128xf32> to vector<2x32xf32>
    %230 = math.tanh %221 : vector<2x32xf32>
    %231 = arith.mulf %229, %230 : vector<2x32xf32>
    %232 = vector.extract_strided_slice %214 {offsets = [0, 96], sizes = [2, 32], strides = [1, 1]} : vector<2x128xf32> to vector<2x32xf32>
    %233 = math.tanh %228 : vector<2x32xf32>
    %234 = arith.mulf %232, %233 : vector<2x32xf32>
    %c0_82 = arith.constant 0 : index
    %c0_83 = arith.constant 0 : index
    %235 = vector.load %arg8[%c0_82, %c0_83] : memref<2x64xf32, #tpu.memory_space<vmem>>, vector<2x32xf32>
    tpu.vector_store %arg8[%c0_82, %c0_83], %221 {strides = array<i32>} : memref<2x64xf32, #tpu.memory_space<vmem>>, vector<2x32xf32>,
    %c0_84 = arith.constant 0 : index
    %c32_85 = arith.constant 32 : index
    %236 = vector.load %arg8[%c0_84, %c32_85] : memref<2x64xf32, #tpu.memory_space<vmem>>, vector<2x32xf32>
    tpu.vector_store %arg8[%c0_84, %c32_85], %228 {strides = array<i32>} : memref<2x64xf32, #tpu.memory_space<vmem>>, vector<2x32xf32>,
    %c0_86 = arith.constant 0 : index
    %c0_87 = arith.constant 0 : index
    %237 = vector.load %arg7[%c0_86, %c0_87] : memref<2x64xf32, #tpu.memory_space<vmem>>, vector<2x32xf32>
    tpu.vector_store %arg7[%c0_86, %c0_87], %231 {strides = array<i32>} : memref<2x64xf32, #tpu.memory_space<vmem>>, vector<2x32xf32>,
    %c0_88 = arith.constant 0 : index
    %c32_89 = arith.constant 32 : index
    %238 = vector.load %arg7[%c0_88, %c32_89] : memref<2x64xf32, #tpu.memory_space<vmem>>, vector<2x32xf32>
    tpu.vector_store %arg7[%c0_88, %c32_89], %234 {strides = array<i32>} : memref<2x64xf32, #tpu.memory_space<vmem>>, vector<2x32xf32>,
    %239 = arith.index_cast %188 : i32 to index
    %c0_90 = arith.constant 0 : index
    %240 = vector.load %arg6[%239, %c0_90] : memref<16x64xf32, #tpu.memory_space<vmem>>, vector<2x32xf32>
    tpu.vector_store %arg6[%239, %c0_90], %231 {strides = array<i32>} : memref<16x64xf32, #tpu.memory_space<vmem>>, vector<2x32xf32>,
    %241 = arith.index_cast %190 : i32 to index
    %c32_91 = arith.constant 32 : index
    %242 = vector.load %arg6[%241, %c32_91] : memref<16x64xf32, #tpu.memory_space<vmem>>, vector<2x32xf32>
    tpu.vector_store %arg6[%241, %c32_91], %234 {strides = array<i32>} : memref<16x64xf32, #tpu.memory_space<vmem>>, vector<2x32xf32>,
    %c4_i32 = arith.constant 4 : i32
    %c0_92 = arith.constant 0 : index
    %c0_93 = arith.constant 0 : index
    %243 = vector.load %arg7[%c0_92, %c0_93] : memref<2x64xf32, #tpu.memory_space<vmem>>, vector<2x64xf32>
    %c0_94 = arith.constant 0 : index
    %c0_95 = arith.constant 0 : index
    %244 = vector.load %arg8[%c0_94, %c0_95] : memref<2x64xf32, #tpu.memory_space<vmem>>, vector<2x64xf32>
    %cst_96 = arith.constant dense<0.000000e+00> : vector<2x256xf32>
    %245 = tpu.matmul %243, %4, %cst_96 {dimension_numbers = #tpu.dot_dimension_numbers<[1], [0], [0], [1], [0, 0, 1, 1], [], []>} : vector<2x64xf32>, vector<64x256xf32>, vector<2x256xf32> -> vector<2x256xf32>
    %c2_i32_97 = arith.constant 2 : i32
    %246 = arith.muli %c4_i32, %c2_i32_97 : i32
    %c7_i32_98 = arith.constant 7 : i32
    %247 = arith.subi %c7_i32_98, %c4_i32 : i32
    %c2_i32_99 = arith.constant 2 : i32
    %248 = arith.muli %247, %c2_i32_99 : i32
    %249 = arith.index_cast %246 : i32 to index
    %c0_100 = arith.constant 0 : index
    %250 = vector.load %arg1[%249, %c0_100] : memref<16x256xf32, #tpu.memory_space<vmem>>, vector<2x256xf32>
    %251 = arith.index_cast %248 : i32 to index
    %c0_101 = arith.constant 0 : index
    %252 = vector.load %arg1[%251, %c0_101] : memref<16x256xf32, #tpu.memory_space<vmem>>, vector<2x256xf32>
    %253 = vector.extract_strided_slice %245 {offsets = [0, 0], sizes = [2, 128], strides = [1, 1]} : vector<2x256xf32> to vector<2x128xf32>
    %254 = vector.extract_strided_slice %250 {offsets = [0, 0], sizes = [2, 128], strides = [1, 1]} : vector<2x256xf32> to vector<2x128xf32>
    %255 = arith.addf %253, %254 : vector<2x128xf32>
    %256 = vector.extract_strided_slice %245 {offsets = [0, 128], sizes = [2, 128], strides = [1, 1]} : vector<2x256xf32> to vector<2x128xf32>
    %257 = vector.extract_strided_slice %252 {offsets = [0, 128], sizes = [2, 128], strides = [1, 1]} : vector<2x256xf32> to vector<2x128xf32>
    %258 = arith.addf %256, %257 : vector<2x128xf32>
    %259 = math.tanh %255 : vector<2x128xf32>
    %260 = arith.negf %255 : vector<2x128xf32>
    %261 = math.exp %260 : vector<2x128xf32>
    %cst_102 = arith.constant 1.000000e+00 : f32
    %262 = vector.broadcast %cst_102 : f32 to vector<2x128xf32>
    %263 = arith.addf %262, %261 : vector<2x128xf32>
    %264 = arith.divf %262, %263 : vector<2x128xf32>
    %265 = arith.select %10, %259, %264 : vector<2x128xi1>, vector<2x128xf32>
    %266 = math.tanh %258 : vector<2x128xf32>
    %267 = arith.negf %258 : vector<2x128xf32>
    %268 = math.exp %267 : vector<2x128xf32>
    %cst_103 = arith.constant 1.000000e+00 : f32
    %269 = vector.broadcast %cst_103 : f32 to vector<2x128xf32>
    %270 = arith.addf %269, %268 : vector<2x128xf32>
    %271 = arith.divf %269, %270 : vector<2x128xf32>
    %272 = arith.select %10, %266, %271 : vector<2x128xi1>, vector<2x128xf32>
    %273 = vector.extract_strided_slice %265 {offsets = [0, 32], sizes = [2, 32], strides = [1, 1]} : vector<2x128xf32> to vector<2x32xf32>
    %274 = vector.extract_strided_slice %244 {offsets = [0, 0], sizes = [2, 32], strides = [1, 1]} : vector<2x64xf32> to vector<2x32xf32>
    %275 = arith.mulf %273, %274 : vector<2x32xf32>
    %276 = vector.extract_strided_slice %265 {offsets = [0, 0], sizes = [2, 32], strides = [1, 1]} : vector<2x128xf32> to vector<2x32xf32>
    %277 = vector.extract_strided_slice %265 {offsets = [0, 64], sizes = [2, 32], strides = [1, 1]} : vector<2x128xf32> to vector<2x32xf32>
    %278 = arith.mulf %276, %277 : vector<2x32xf32>
    %279 = arith.addf %275, %278 : vector<2x32xf32>
    %280 = vector.extract_strided_slice %272 {offsets = [0, 32], sizes = [2, 32], strides = [1, 1]} : vector<2x128xf32> to vector<2x32xf32>
    %281 = vector.extract_strided_slice %244 {offsets = [0, 32], sizes = [2, 32], strides = [1, 1]} : vector<2x64xf32> to vector<2x32xf32>
    %282 = arith.mulf %280, %281 : vector<2x32xf32>
    %283 = vector.extract_strided_slice %272 {offsets = [0, 0], sizes = [2, 32], strides = [1, 1]} : vector<2x128xf32> to vector<2x32xf32>
    %284 = vector.extract_strided_slice %272 {offsets = [0, 64], sizes = [2, 32], strides = [1, 1]} : vector<2x128xf32> to vector<2x32xf32>
    %285 = arith.mulf %283, %284 : vector<2x32xf32>
    %286 = arith.addf %282, %285 : vector<2x32xf32>
    %287 = vector.extract_strided_slice %265 {offsets = [0, 96], sizes = [2, 32], strides = [1, 1]} : vector<2x128xf32> to vector<2x32xf32>
    %288 = math.tanh %279 : vector<2x32xf32>
    %289 = arith.mulf %287, %288 : vector<2x32xf32>
    %290 = vector.extract_strided_slice %272 {offsets = [0, 96], sizes = [2, 32], strides = [1, 1]} : vector<2x128xf32> to vector<2x32xf32>
    %291 = math.tanh %286 : vector<2x32xf32>
    %292 = arith.mulf %290, %291 : vector<2x32xf32>
    %c0_104 = arith.constant 0 : index
    %c0_105 = arith.constant 0 : index
    %293 = vector.load %arg8[%c0_104, %c0_105] : memref<2x64xf32, #tpu.memory_space<vmem>>, vector<2x32xf32>
    tpu.vector_store %arg8[%c0_104, %c0_105], %279 {strides = array<i32>} : memref<2x64xf32, #tpu.memory_space<vmem>>, vector<2x32xf32>,
    %c0_106 = arith.constant 0 : index
    %c32_107 = arith.constant 32 : index
    %294 = vector.load %arg8[%c0_106, %c32_107] : memref<2x64xf32, #tpu.memory_space<vmem>>, vector<2x32xf32>
    tpu.vector_store %arg8[%c0_106, %c32_107], %286 {strides = array<i32>} : memref<2x64xf32, #tpu.memory_space<vmem>>, vector<2x32xf32>,
    %c0_108 = arith.constant 0 : index
    %c0_109 = arith.constant 0 : index
    %295 = vector.load %arg7[%c0_108, %c0_109] : memref<2x64xf32, #tpu.memory_space<vmem>>, vector<2x32xf32>
    tpu.vector_store %arg7[%c0_108, %c0_109], %289 {strides = array<i32>} : memref<2x64xf32, #tpu.memory_space<vmem>>, vector<2x32xf32>,
    %c0_110 = arith.constant 0 : index
    %c32_111 = arith.constant 32 : index
    %296 = vector.load %arg7[%c0_110, %c32_111] : memref<2x64xf32, #tpu.memory_space<vmem>>, vector<2x32xf32>
    tpu.vector_store %arg7[%c0_110, %c32_111], %292 {strides = array<i32>} : memref<2x64xf32, #tpu.memory_space<vmem>>, vector<2x32xf32>,
    %297 = arith.index_cast %246 : i32 to index
    %c0_112 = arith.constant 0 : index
    %298 = vector.load %arg6[%297, %c0_112] : memref<16x64xf32, #tpu.memory_space<vmem>>, vector<2x32xf32>
    tpu.vector_store %arg6[%297, %c0_112], %289 {strides = array<i32>} : memref<16x64xf32, #tpu.memory_space<vmem>>, vector<2x32xf32>,
    %299 = arith.index_cast %248 : i32 to index
    %c32_113 = arith.constant 32 : index
    %300 = vector.load %arg6[%299, %c32_113] : memref<16x64xf32, #tpu.memory_space<vmem>>, vector<2x32xf32>
    tpu.vector_store %arg6[%299, %c32_113], %292 {strides = array<i32>} : memref<16x64xf32, #tpu.memory_space<vmem>>, vector<2x32xf32>,
    %c5_i32 = arith.constant 5 : i32
    %c0_114 = arith.constant 0 : index
    %c0_115 = arith.constant 0 : index
    %301 = vector.load %arg7[%c0_114, %c0_115] : memref<2x64xf32, #tpu.memory_space<vmem>>, vector<2x64xf32>
    %c0_116 = arith.constant 0 : index
    %c0_117 = arith.constant 0 : index
    %302 = vector.load %arg8[%c0_116, %c0_117] : memref<2x64xf32, #tpu.memory_space<vmem>>, vector<2x64xf32>
    %cst_118 = arith.constant dense<0.000000e+00> : vector<2x256xf32>
    %303 = tpu.matmul %301, %4, %cst_118 {dimension_numbers = #tpu.dot_dimension_numbers<[1], [0], [0], [1], [0, 0, 1, 1], [], []>} : vector<2x64xf32>, vector<64x256xf32>, vector<2x256xf32> -> vector<2x256xf32>
    %c2_i32_119 = arith.constant 2 : i32
    %304 = arith.muli %c5_i32, %c2_i32_119 : i32
    %c7_i32_120 = arith.constant 7 : i32
    %305 = arith.subi %c7_i32_120, %c5_i32 : i32
    %c2_i32_121 = arith.constant 2 : i32
    %306 = arith.muli %305, %c2_i32_121 : i32
    %307 = arith.index_cast %304 : i32 to index
    %c0_122 = arith.constant 0 : index
    %308 = vector.load %arg1[%307, %c0_122] : memref<16x256xf32, #tpu.memory_space<vmem>>, vector<2x256xf32>
    %309 = arith.index_cast %306 : i32 to index
    %c0_123 = arith.constant 0 : index
    %310 = vector.load %arg1[%309, %c0_123] : memref<16x256xf32, #tpu.memory_space<vmem>>, vector<2x256xf32>
    %311 = vector.extract_strided_slice %303 {offsets = [0, 0], sizes = [2, 128], strides = [1, 1]} : vector<2x256xf32> to vector<2x128xf32>
    %312 = vector.extract_strided_slice %308 {offsets = [0, 0], sizes = [2, 128], strides = [1, 1]} : vector<2x256xf32> to vector<2x128xf32>
    %313 = arith.addf %311, %312 : vector<2x128xf32>
    %314 = vector.extract_strided_slice %303 {offsets = [0, 128], sizes = [2, 128], strides = [1, 1]} : vector<2x256xf32> to vector<2x128xf32>
    %315 = vector.extract_strided_slice %310 {offsets = [0, 128], sizes = [2, 128], strides = [1, 1]} : vector<2x256xf32> to vector<2x128xf32>
    %316 = arith.addf %314, %315 : vector<2x128xf32>
    %317 = math.tanh %313 : vector<2x128xf32>
    %318 = arith.negf %313 : vector<2x128xf32>
    %319 = math.exp %318 : vector<2x128xf32>
    %cst_124 = arith.constant 1.000000e+00 : f32
    %320 = vector.broadcast %cst_124 : f32 to vector<2x128xf32>
    %321 = arith.addf %320, %319 : vector<2x128xf32>
    %322 = arith.divf %320, %321 : vector<2x128xf32>
    %323 = arith.select %10, %317, %322 : vector<2x128xi1>, vector<2x128xf32>
    %324 = math.tanh %316 : vector<2x128xf32>
    %325 = arith.negf %316 : vector<2x128xf32>
    %326 = math.exp %325 : vector<2x128xf32>
    %cst_125 = arith.constant 1.000000e+00 : f32
    %327 = vector.broadcast %cst_125 : f32 to vector<2x128xf32>
    %328 = arith.addf %327, %326 : vector<2x128xf32>
    %329 = arith.divf %327, %328 : vector<2x128xf32>
    %330 = arith.select %10, %324, %329 : vector<2x128xi1>, vector<2x128xf32>
    %331 = vector.extract_strided_slice %323 {offsets = [0, 32], sizes = [2, 32], strides = [1, 1]} : vector<2x128xf32> to vector<2x32xf32>
    %332 = vector.extract_strided_slice %302 {offsets = [0, 0], sizes = [2, 32], strides = [1, 1]} : vector<2x64xf32> to vector<2x32xf32>
    %333 = arith.mulf %331, %332 : vector<2x32xf32>
    %334 = vector.extract_strided_slice %323 {offsets = [0, 0], sizes = [2, 32], strides = [1, 1]} : vector<2x128xf32> to vector<2x32xf32>
    %335 = vector.extract_strided_slice %323 {offsets = [0, 64], sizes = [2, 32], strides = [1, 1]} : vector<2x128xf32> to vector<2x32xf32>
    %336 = arith.mulf %334, %335 : vector<2x32xf32>
    %337 = arith.addf %333, %336 : vector<2x32xf32>
    %338 = vector.extract_strided_slice %330 {offsets = [0, 32], sizes = [2, 32], strides = [1, 1]} : vector<2x128xf32> to vector<2x32xf32>
    %339 = vector.extract_strided_slice %302 {offsets = [0, 32], sizes = [2, 32], strides = [1, 1]} : vector<2x64xf32> to vector<2x32xf32>
    %340 = arith.mulf %338, %339 : vector<2x32xf32>
    %341 = vector.extract_strided_slice %330 {offsets = [0, 0], sizes = [2, 32], strides = [1, 1]} : vector<2x128xf32> to vector<2x32xf32>
    %342 = vector.extract_strided_slice %330 {offsets = [0, 64], sizes = [2, 32], strides = [1, 1]} : vector<2x128xf32> to vector<2x32xf32>
    %343 = arith.mulf %341, %342 : vector<2x32xf32>
    %344 = arith.addf %340, %343 : vector<2x32xf32>
    %345 = vector.extract_strided_slice %323 {offsets = [0, 96], sizes = [2, 32], strides = [1, 1]} : vector<2x128xf32> to vector<2x32xf32>
    %346 = math.tanh %337 : vector<2x32xf32>
    %347 = arith.mulf %345, %346 : vector<2x32xf32>
    %348 = vector.extract_strided_slice %330 {offsets = [0, 96], sizes = [2, 32], strides = [1, 1]} : vector<2x128xf32> to vector<2x32xf32>
    %349 = math.tanh %344 : vector<2x32xf32>
    %350 = arith.mulf %348, %349 : vector<2x32xf32>
    %c0_126 = arith.constant 0 : index
    %c0_127 = arith.constant 0 : index
    %351 = vector.load %arg8[%c0_126, %c0_127] : memref<2x64xf32, #tpu.memory_space<vmem>>, vector<2x32xf32>
    tpu.vector_store %arg8[%c0_126, %c0_127], %337 {strides = array<i32>} : memref<2x64xf32, #tpu.memory_space<vmem>>, vector<2x32xf32>,
    %c0_128 = arith.constant 0 : index
    %c32_129 = arith.constant 32 : index
    %352 = vector.load %arg8[%c0_128, %c32_129] : memref<2x64xf32, #tpu.memory_space<vmem>>, vector<2x32xf32>
    tpu.vector_store %arg8[%c0_128, %c32_129], %344 {strides = array<i32>} : memref<2x64xf32, #tpu.memory_space<vmem>>, vector<2x32xf32>,
    %c0_130 = arith.constant 0 : index
    %c0_131 = arith.constant 0 : index
    %353 = vector.load %arg7[%c0_130, %c0_131] : memref<2x64xf32, #tpu.memory_space<vmem>>, vector<2x32xf32>
    tpu.vector_store %arg7[%c0_130, %c0_131], %347 {strides = array<i32>} : memref<2x64xf32, #tpu.memory_space<vmem>>, vector<2x32xf32>,
    %c0_132 = arith.constant 0 : index
    %c32_133 = arith.constant 32 : index
    %354 = vector.load %arg7[%c0_132, %c32_133] : memref<2x64xf32, #tpu.memory_space<vmem>>, vector<2x32xf32>
    tpu.vector_store %arg7[%c0_132, %c32_133], %350 {strides = array<i32>} : memref<2x64xf32, #tpu.memory_space<vmem>>, vector<2x32xf32>,
    %355 = arith.index_cast %304 : i32 to index
    %c0_134 = arith.constant 0 : index
    %356 = vector.load %arg6[%355, %c0_134] : memref<16x64xf32, #tpu.memory_space<vmem>>, vector<2x32xf32>
    tpu.vector_store %arg6[%355, %c0_134], %347 {strides = array<i32>} : memref<16x64xf32, #tpu.memory_space<vmem>>, vector<2x32xf32>,
    %357 = arith.index_cast %306 : i32 to index
    %c32_135 = arith.constant 32 : index
    %358 = vector.load %arg6[%357, %c32_135] : memref<16x64xf32, #tpu.memory_space<vmem>>, vector<2x32xf32>
    tpu.vector_store %arg6[%357, %c32_135], %350 {strides = array<i32>} : memref<16x64xf32, #tpu.memory_space<vmem>>, vector<2x32xf32>,
    %c6_i32 = arith.constant 6 : i32
    %c0_136 = arith.constant 0 : index
    %c0_137 = arith.constant 0 : index
    %359 = vector.load %arg7[%c0_136, %c0_137] : memref<2x64xf32, #tpu.memory_space<vmem>>, vector<2x64xf32>
    %c0_138 = arith.constant 0 : index
    %c0_139 = arith.constant 0 : index
    %360 = vector.load %arg8[%c0_138, %c0_139] : memref<2x64xf32, #tpu.memory_space<vmem>>, vector<2x64xf32>
    %cst_140 = arith.constant dense<0.000000e+00> : vector<2x256xf32>
    %361 = tpu.matmul %359, %4, %cst_140 {dimension_numbers = #tpu.dot_dimension_numbers<[1], [0], [0], [1], [0, 0, 1, 1], [], []>} : vector<2x64xf32>, vector<64x256xf32>, vector<2x256xf32> -> vector<2x256xf32>
    %c2_i32_141 = arith.constant 2 : i32
    %362 = arith.muli %c6_i32, %c2_i32_141 : i32
    %c7_i32_142 = arith.constant 7 : i32
    %363 = arith.subi %c7_i32_142, %c6_i32 : i32
    %c2_i32_143 = arith.constant 2 : i32
    %364 = arith.muli %363, %c2_i32_143 : i32
    %365 = arith.index_cast %362 : i32 to index
    %c0_144 = arith.constant 0 : index
    %366 = vector.load %arg1[%365, %c0_144] : memref<16x256xf32, #tpu.memory_space<vmem>>, vector<2x256xf32>
    %367 = arith.index_cast %364 : i32 to index
    %c0_145 = arith.constant 0 : index
    %368 = vector.load %arg1[%367, %c0_145] : memref<16x256xf32, #tpu.memory_space<vmem>>, vector<2x256xf32>
    %369 = vector.extract_strided_slice %361 {offsets = [0, 0], sizes = [2, 128], strides = [1, 1]} : vector<2x256xf32> to vector<2x128xf32>
    %370 = vector.extract_strided_slice %366 {offsets = [0, 0], sizes = [2, 128], strides = [1, 1]} : vector<2x256xf32> to vector<2x128xf32>
    %371 = arith.addf %369, %370 : vector<2x128xf32>
    %372 = vector.extract_strided_slice %361 {offsets = [0, 128], sizes = [2, 128], strides = [1, 1]} : vector<2x256xf32> to vector<2x128xf32>
    %373 = vector.extract_strided_slice %368 {offsets = [0, 128], sizes = [2, 128], strides = [1, 1]} : vector<2x256xf32> to vector<2x128xf32>
    %374 = arith.addf %372, %373 : vector<2x128xf32>
    %375 = math.tanh %371 : vector<2x128xf32>
    %376 = arith.negf %371 : vector<2x128xf32>
    %377 = math.exp %376 : vector<2x128xf32>
    %cst_146 = arith.constant 1.000000e+00 : f32
    %378 = vector.broadcast %cst_146 : f32 to vector<2x128xf32>
    %379 = arith.addf %378, %377 : vector<2x128xf32>
    %380 = arith.divf %378, %379 : vector<2x128xf32>
    %381 = arith.select %10, %375, %380 : vector<2x128xi1>, vector<2x128xf32>
    %382 = math.tanh %374 : vector<2x128xf32>
    %383 = arith.negf %374 : vector<2x128xf32>
    %384 = math.exp %383 : vector<2x128xf32>
    %cst_147 = arith.constant 1.000000e+00 : f32
    %385 = vector.broadcast %cst_147 : f32 to vector<2x128xf32>
    %386 = arith.addf %385, %384 : vector<2x128xf32>
    %387 = arith.divf %385, %386 : vector<2x128xf32>
    %388 = arith.select %10, %382, %387 : vector<2x128xi1>, vector<2x128xf32>
    %389 = vector.extract_strided_slice %381 {offsets = [0, 32], sizes = [2, 32], strides = [1, 1]} : vector<2x128xf32> to vector<2x32xf32>
    %390 = vector.extract_strided_slice %360 {offsets = [0, 0], sizes = [2, 32], strides = [1, 1]} : vector<2x64xf32> to vector<2x32xf32>
    %391 = arith.mulf %389, %390 : vector<2x32xf32>
    %392 = vector.extract_strided_slice %381 {offsets = [0, 0], sizes = [2, 32], strides = [1, 1]} : vector<2x128xf32> to vector<2x32xf32>
    %393 = vector.extract_strided_slice %381 {offsets = [0, 64], sizes = [2, 32], strides = [1, 1]} : vector<2x128xf32> to vector<2x32xf32>
    %394 = arith.mulf %392, %393 : vector<2x32xf32>
    %395 = arith.addf %391, %394 : vector<2x32xf32>
    %396 = vector.extract_strided_slice %388 {offsets = [0, 32], sizes = [2, 32], strides = [1, 1]} : vector<2x128xf32> to vector<2x32xf32>
    %397 = vector.extract_strided_slice %360 {offsets = [0, 32], sizes = [2, 32], strides = [1, 1]} : vector<2x64xf32> to vector<2x32xf32>
    %398 = arith.mulf %396, %397 : vector<2x32xf32>
    %399 = vector.extract_strided_slice %388 {offsets = [0, 0], sizes = [2, 32], strides = [1, 1]} : vector<2x128xf32> to vector<2x32xf32>
    %400 = vector.extract_strided_slice %388 {offsets = [0, 64], sizes = [2, 32], strides = [1, 1]} : vector<2x128xf32> to vector<2x32xf32>
    %401 = arith.mulf %399, %400 : vector<2x32xf32>
    %402 = arith.addf %398, %401 : vector<2x32xf32>
    %403 = vector.extract_strided_slice %381 {offsets = [0, 96], sizes = [2, 32], strides = [1, 1]} : vector<2x128xf32> to vector<2x32xf32>
    %404 = math.tanh %395 : vector<2x32xf32>
    %405 = arith.mulf %403, %404 : vector<2x32xf32>
    %406 = vector.extract_strided_slice %388 {offsets = [0, 96], sizes = [2, 32], strides = [1, 1]} : vector<2x128xf32> to vector<2x32xf32>
    %407 = math.tanh %402 : vector<2x32xf32>
    %408 = arith.mulf %406, %407 : vector<2x32xf32>
    %c0_148 = arith.constant 0 : index
    %c0_149 = arith.constant 0 : index
    %409 = vector.load %arg8[%c0_148, %c0_149] : memref<2x64xf32, #tpu.memory_space<vmem>>, vector<2x32xf32>
    tpu.vector_store %arg8[%c0_148, %c0_149], %395 {strides = array<i32>} : memref<2x64xf32, #tpu.memory_space<vmem>>, vector<2x32xf32>,
    %c0_150 = arith.constant 0 : index
    %c32_151 = arith.constant 32 : index
    %410 = vector.load %arg8[%c0_150, %c32_151] : memref<2x64xf32, #tpu.memory_space<vmem>>, vector<2x32xf32>
    tpu.vector_store %arg8[%c0_150, %c32_151], %402 {strides = array<i32>} : memref<2x64xf32, #tpu.memory_space<vmem>>, vector<2x32xf32>,
    %c0_152 = arith.constant 0 : index
    %c0_153 = arith.constant 0 : index
    %411 = vector.load %arg7[%c0_152, %c0_153] : memref<2x64xf32, #tpu.memory_space<vmem>>, vector<2x32xf32>
    tpu.vector_store %arg7[%c0_152, %c0_153], %405 {strides = array<i32>} : memref<2x64xf32, #tpu.memory_space<vmem>>, vector<2x32xf32>,
    %c0_154 = arith.constant 0 : index
    %c32_155 = arith.constant 32 : index
    %412 = vector.load %arg7[%c0_154, %c32_155] : memref<2x64xf32, #tpu.memory_space<vmem>>, vector<2x32xf32>
    tpu.vector_store %arg7[%c0_154, %c32_155], %408 {strides = array<i32>} : memref<2x64xf32, #tpu.memory_space<vmem>>, vector<2x32xf32>,
    %413 = arith.index_cast %362 : i32 to index
    %c0_156 = arith.constant 0 : index
    %414 = vector.load %arg6[%413, %c0_156] : memref<16x64xf32, #tpu.memory_space<vmem>>, vector<2x32xf32>
    tpu.vector_store %arg6[%413, %c0_156], %405 {strides = array<i32>} : memref<16x64xf32, #tpu.memory_space<vmem>>, vector<2x32xf32>,
    %415 = arith.index_cast %364 : i32 to index
    %c32_157 = arith.constant 32 : index
    %416 = vector.load %arg6[%415, %c32_157] : memref<16x64xf32, #tpu.memory_space<vmem>>, vector<2x32xf32>
    tpu.vector_store %arg6[%415, %c32_157], %408 {strides = array<i32>} : memref<16x64xf32, #tpu.memory_space<vmem>>, vector<2x32xf32>,
    %c7_i32_158 = arith.constant 7 : i32
    %c0_159 = arith.constant 0 : index
    %c0_160 = arith.constant 0 : index
    %417 = vector.load %arg7[%c0_159, %c0_160] : memref<2x64xf32, #tpu.memory_space<vmem>>, vector<2x64xf32>
    %c0_161 = arith.constant 0 : index
    %c0_162 = arith.constant 0 : index
    %418 = vector.load %arg8[%c0_161, %c0_162] : memref<2x64xf32, #tpu.memory_space<vmem>>, vector<2x64xf32>
    %cst_163 = arith.constant dense<0.000000e+00> : vector<2x256xf32>
    %419 = tpu.matmul %417, %4, %cst_163 {dimension_numbers = #tpu.dot_dimension_numbers<[1], [0], [0], [1], [0, 0, 1, 1], [], []>} : vector<2x64xf32>, vector<64x256xf32>, vector<2x256xf32> -> vector<2x256xf32>
    %c2_i32_164 = arith.constant 2 : i32
    %420 = arith.muli %c7_i32_158, %c2_i32_164 : i32
    %c7_i32_165 = arith.constant 7 : i32
    %421 = arith.subi %c7_i32_165, %c7_i32_158 : i32
    %c2_i32_166 = arith.constant 2 : i32
    %422 = arith.muli %421, %c2_i32_166 : i32
    %423 = arith.index_cast %420 : i32 to index
    %c0_167 = arith.constant 0 : index
    %424 = vector.load %arg1[%423, %c0_167] : memref<16x256xf32, #tpu.memory_space<vmem>>, vector<2x256xf32>
    %425 = arith.index_cast %422 : i32 to index
    %c0_168 = arith.constant 0 : index
    %426 = vector.load %arg1[%425, %c0_168] : memref<16x256xf32, #tpu.memory_space<vmem>>, vector<2x256xf32>
    %427 = vector.extract_strided_slice %419 {offsets = [0, 0], sizes = [2, 128], strides = [1, 1]} : vector<2x256xf32> to vector<2x128xf32>
    %428 = vector.extract_strided_slice %424 {offsets = [0, 0], sizes = [2, 128], strides = [1, 1]} : vector<2x256xf32> to vector<2x128xf32>
    %429 = arith.addf %427, %428 : vector<2x128xf32>
    %430 = vector.extract_strided_slice %419 {offsets = [0, 128], sizes = [2, 128], strides = [1, 1]} : vector<2x256xf32> to vector<2x128xf32>
    %431 = vector.extract_strided_slice %426 {offsets = [0, 128], sizes = [2, 128], strides = [1, 1]} : vector<2x256xf32> to vector<2x128xf32>
    %432 = arith.addf %430, %431 : vector<2x128xf32>
    %433 = math.tanh %429 : vector<2x128xf32>
    %434 = arith.negf %429 : vector<2x128xf32>
    %435 = math.exp %434 : vector<2x128xf32>
    %cst_169 = arith.constant 1.000000e+00 : f32
    %436 = vector.broadcast %cst_169 : f32 to vector<2x128xf32>
    %437 = arith.addf %436, %435 : vector<2x128xf32>
    %438 = arith.divf %436, %437 : vector<2x128xf32>
    %439 = arith.select %10, %433, %438 : vector<2x128xi1>, vector<2x128xf32>
    %440 = math.tanh %432 : vector<2x128xf32>
    %441 = arith.negf %432 : vector<2x128xf32>
    %442 = math.exp %441 : vector<2x128xf32>
    %cst_170 = arith.constant 1.000000e+00 : f32
    %443 = vector.broadcast %cst_170 : f32 to vector<2x128xf32>
    %444 = arith.addf %443, %442 : vector<2x128xf32>
    %445 = arith.divf %443, %444 : vector<2x128xf32>
    %446 = arith.select %10, %440, %445 : vector<2x128xi1>, vector<2x128xf32>
    %447 = vector.extract_strided_slice %439 {offsets = [0, 32], sizes = [2, 32], strides = [1, 1]} : vector<2x128xf32> to vector<2x32xf32>
    %448 = vector.extract_strided_slice %418 {offsets = [0, 0], sizes = [2, 32], strides = [1, 1]} : vector<2x64xf32> to vector<2x32xf32>
    %449 = arith.mulf %447, %448 : vector<2x32xf32>
    %450 = vector.extract_strided_slice %439 {offsets = [0, 0], sizes = [2, 32], strides = [1, 1]} : vector<2x128xf32> to vector<2x32xf32>
    %451 = vector.extract_strided_slice %439 {offsets = [0, 64], sizes = [2, 32], strides = [1, 1]} : vector<2x128xf32> to vector<2x32xf32>
    %452 = arith.mulf %450, %451 : vector<2x32xf32>
    %453 = arith.addf %449, %452 : vector<2x32xf32>
    %454 = vector.extract_strided_slice %446 {offsets = [0, 32], sizes = [2, 32], strides = [1, 1]} : vector<2x128xf32> to vector<2x32xf32>
    %455 = vector.extract_strided_slice %418 {offsets = [0, 32], sizes = [2, 32], strides = [1, 1]} : vector<2x64xf32> to vector<2x32xf32>
    %456 = arith.mulf %454, %455 : vector<2x32xf32>
    %457 = vector.extract_strided_slice %446 {offsets = [0, 0], sizes = [2, 32], strides = [1, 1]} : vector<2x128xf32> to vector<2x32xf32>
    %458 = vector.extract_strided_slice %446 {offsets = [0, 64], sizes = [2, 32], strides = [1, 1]} : vector<2x128xf32> to vector<2x32xf32>
    %459 = arith.mulf %457, %458 : vector<2x32xf32>
    %460 = arith.addf %456, %459 : vector<2x32xf32>
    %461 = vector.extract_strided_slice %439 {offsets = [0, 96], sizes = [2, 32], strides = [1, 1]} : vector<2x128xf32> to vector<2x32xf32>
    %462 = math.tanh %453 : vector<2x32xf32>
    %463 = arith.mulf %461, %462 : vector<2x32xf32>
    %464 = vector.extract_strided_slice %446 {offsets = [0, 96], sizes = [2, 32], strides = [1, 1]} : vector<2x128xf32> to vector<2x32xf32>
    %465 = math.tanh %460 : vector<2x32xf32>
    %466 = arith.mulf %464, %465 : vector<2x32xf32>
    %c0_171 = arith.constant 0 : index
    %c0_172 = arith.constant 0 : index
    %467 = vector.load %arg8[%c0_171, %c0_172] : memref<2x64xf32, #tpu.memory_space<vmem>>, vector<2x32xf32>
    tpu.vector_store %arg8[%c0_171, %c0_172], %453 {strides = array<i32>} : memref<2x64xf32, #tpu.memory_space<vmem>>, vector<2x32xf32>,
    %c0_173 = arith.constant 0 : index
    %c32_174 = arith.constant 32 : index
    %468 = vector.load %arg8[%c0_173, %c32_174] : memref<2x64xf32, #tpu.memory_space<vmem>>, vector<2x32xf32>
    tpu.vector_store %arg8[%c0_173, %c32_174], %460 {strides = array<i32>} : memref<2x64xf32, #tpu.memory_space<vmem>>, vector<2x32xf32>,
    %c0_175 = arith.constant 0 : index
    %c0_176 = arith.constant 0 : index
    %469 = vector.load %arg7[%c0_175, %c0_176] : memref<2x64xf32, #tpu.memory_space<vmem>>, vector<2x32xf32>
    tpu.vector_store %arg7[%c0_175, %c0_176], %463 {strides = array<i32>} : memref<2x64xf32, #tpu.memory_space<vmem>>, vector<2x32xf32>,
    %c0_177 = arith.constant 0 : index
    %c32_178 = arith.constant 32 : index
    %470 = vector.load %arg7[%c0_177, %c32_178] : memref<2x64xf32, #tpu.memory_space<vmem>>, vector<2x32xf32>
    tpu.vector_store %arg7[%c0_177, %c32_178], %466 {strides = array<i32>} : memref<2x64xf32, #tpu.memory_space<vmem>>, vector<2x32xf32>,
    %471 = arith.index_cast %420 : i32 to index
    %c0_179 = arith.constant 0 : index
    %472 = vector.load %arg6[%471, %c0_179] : memref<16x64xf32, #tpu.memory_space<vmem>>, vector<2x32xf32>
    tpu.vector_store %arg6[%471, %c0_179], %463 {strides = array<i32>} : memref<16x64xf32, #tpu.memory_space<vmem>>, vector<2x32xf32>,
    %473 = arith.index_cast %422 : i32 to index
    %c32_180 = arith.constant 32 : index
    %474 = vector.load %arg6[%473, %c32_180] : memref<16x64xf32, #tpu.memory_space<vmem>>, vector<2x32xf32>
    tpu.vector_store %arg6[%473, %c32_180], %466 {strides = array<i32>} : memref<16x64xf32, #tpu.memory_space<vmem>>, vector<2x32xf32>,
    %c8_i32 = arith.constant 8 : i32
    %c0_181 = arith.constant 0 : index
    %c0_182 = arith.constant 0 : index
    %475 = vector.load %arg6[%c0_181, %c0_182] : memref<16x64xf32, #tpu.memory_space<vmem>>, vector<16x64xf32>
    %c0_183 = arith.constant 0 : index
    %c0_184 = arith.constant 0 : index
    %476 = vector.load %arg3[%c0_183, %c0_184] : memref<64x2xf32, #tpu.memory_space<vmem>>, vector<64x2xf32>
    %cst_185 = arith.constant dense<0.000000e+00> : vector<16x2xf32>
    %477 = tpu.matmul %475, %476, %cst_185 {dimension_numbers = #tpu.dot_dimension_numbers<[1], [0], [0], [1], [0, 0, 1, 1], [], []>} : vector<16x64xf32>, vector<64x2xf32>, vector<16x2xf32> -> vector<16x2xf32>
    %c0_186 = arith.constant 0 : index
    %c0_187 = arith.constant 0 : index
    %478 = vector.load %arg4[%c0_186, %c0_187] : memref<1x2xf32, #tpu.memory_space<vmem>>, vector<1x2xf32>
    %479 = vector.broadcast %478 : vector<1x2xf32> to vector<16x2xf32>
    %480 = arith.addf %477, %479 : vector<16x2xf32>
    %c0_188 = arith.constant 0 : index
    %c0_189 = arith.constant 0 : index
    %481 = vector.load %arg5[%c0_188, %c0_189] : memref<16x2xf32, #tpu.memory_space<vmem>>, vector<16x2xf32>
    tpu.vector_store %arg5[%c0_188, %c0_189], %480 {strides = array<i32>} : memref<16x2xf32, #tpu.memory_space<vmem>>, vector<16x2xf32>,
    return
  }
  func.func @transform_0(%arg0: i32) -> (i32, i32) {
    %c0_i32 = arith.constant 0 : i32
    %c0_i32_0 = arith.constant 0 : i32
    %c0_i32_1 = arith.constant 0 : i32
    return %c0_i32, %c0_i32_0 : i32, i32
  }
  func.func @transform_1(%arg0: i32) -> (i32, i32) {
    %c0_i32 = arith.constant 0 : i32
    %c0_i32_0 = arith.constant 0 : i32
    %c0_i32_1 = arith.constant 0 : i32
    return %c0_i32, %c0_i32_0 : i32, i32
  }
  func.func @transform_2(%arg0: i32) -> (i32, i32) {
    %c0_i32 = arith.constant 0 : i32
    %c0_i32_0 = arith.constant 0 : i32
    %c0_i32_1 = arith.constant 0 : i32
    return %c0_i32, %c0_i32_0 : i32, i32
  }
  func.func @transform_3(%arg0: i32) -> (i32, i32) {
    %c0_i32 = arith.constant 0 : i32
    %c0_i32_0 = arith.constant 0 : i32
    %c0_i32_1 = arith.constant 0 : i32
    return %c0_i32, %c0_i32_0 : i32, i32
  }
  func.func @transform_4(%arg0: i32) -> (i32, i32) {
    %c0_i32 = arith.constant 0 : i32
    %c0_i32_0 = arith.constant 0 : i32
    %c0_i32_1 = arith.constant 0 : i32
    return %c0_i32, %c0_i32_0 : i32, i32
  }
}

</mosaic_0001>

<bundles_post_ra>
// kernel: forward.6
= control target key start
LH: loop header
LB: loop body
LE: loop exit
PB: predicated region body
PF: predicated region fallthrough
CT: control target
= control target key end

     0   :  { %v163_v3 = vmov 0.0   ;;  %vm44_vm0 = vcmask 523264   ;;  %v34_v27 = vlaneseq  ;;  %s253_s1 = inlined_call_operand.vmem [shape: f32[64,256], index: 1, kind: input, shape index: {}]   ;;  %s254_s0 = inlined_call_operand.vmem [shape: f32[16,64], index: 0, kind: input, shape index: {}]   ;;  %s255_s2 = inlined_call_operand.vmem [shape: f32[1,256], index: 2, kind: input, shape index: {}]   ;;  %s256_s3 = inlined_call_operand.vmem [shape: f32[16,256], index: 3, kind: output, shape index: {}]  }
   0x1   :  { %v17_v0 = vld [vmem:[%s253_s1 + $0x8] sm:$0xff]  ;;  %v19_v1 = vld [vmem:[%s253_s1 + $0x18] sm:$0xff]  ;;  %v16_v2 = vld [vmem:[%s253_s1] sm:$0xff]  ;;  %115 = vmatprep.mubr.f32.mxu0 %v163_v3  ;;  %121 = vmatprep.mubr.f32.mxu1 %v163_v3 }
   0x2   :  { %v138_v4 = vpack.c.bf16 %v19_v1, %v17_v0  ;;  %v18_v5 = vld [vmem:[%s253_s1 + $0x10] sm:$0xff]  ;;  %v21_v6 = vld [vmem:[%s253_s1 + $0x28] sm:$0xff]  ;;  %v23_v7 = vld [vmem:[%s253_s1 + $0x38] sm:$0xff]  ;;  %v35_v28 = vshrl.u32 %v34_v27, 7 }
   0x3   :  { %v140_v8 = vpack.c.bf16 %v18_v5, %v16_v2  ;;  %v142_v9 = vpack.c.bf16 %v23_v7, %v21_v6  ;;  %v20_v10 = vld [vmem:[%s253_s1 + $0x20] sm:$0xff]  ;;  %v22_v11 = vld [vmem:[%s253_s1 + $0x30] sm:$0xff]  ;;  %v25_v12 = vld [vmem:[%s253_s1 + $0x48] sm:$0xff] }
   0x4   :  { %139 = vmatprep.subr.bf16.mxu0 %v138_v4  ;;  %154 = vmatprep.subr.bf16.mxu1 %v138_v4  ;;  %v27_v13 = vld [vmem:[%s253_s1 + $0x58] sm:$0xff]  ;;  %v144_v14 = vpack.c.bf16 %v22_v11, %v20_v10  ;;  %v24_v16 = vld [vmem:[%s253_s1 + $0x40] sm:$0xff]  ;;  %v26_v17 = vld [vmem:[%s253_s1 + $0x50] sm:$0xff]  ;;  %v36_v29 = vsub.s32 0, %v35_v28  ;;  %v40_v31 = vsub.s32 1, %v35_v28 }
   0x5   :  { %141 = vmatpush1.bf16.msra.mxu0 %v140_v8  ;;  %158 = vmatpush1.bf16.msra.mxu1 %v140_v8  ;;  %v146_v15 = vpack.c.bf16 %v27_v13, %v25_v12  ;;  %v29_v18 = vld [vmem:[%s253_s1 + $0x68] sm:$0xff]  ;;  %v31_v19 = vld [vmem:[%s253_s1 + $0x78] sm:$0xff]  ;;  %v148_v20 = vpack.c.bf16 %v26_v17, %v24_v16  ;;  %v28_v22 = vld [vmem:[%s253_s1 + $0x60] sm:$0xff] }
   0x6   :  { %143 = vmatprep.subr.bf16.mxu0 %v142_v9  ;;  %155 = vmatprep.subr.bf16.mxu1 %v142_v9  ;;  %v150_v21 = vpack.c.bf16 %v31_v19, %v29_v18  ;;  %v30_v23 = vld [vmem:[%s253_s1 + $0x70] sm:$0xff]  ;;  %v14_v25 = vld [vmem:[%s254_s0] sm:$0xff]  ;;  %v15_v26 = vld [vmem:[%s254_s0 + $0x8] sm:$0xff] }
   0x7   :  { %v152_v24 = vpack.c.bf16 %v30_v23, %v28_v22  ;;  %v32_v30 = vld [vmem:[%s255_s2] sm:$0x3] }
   0x8   :  { %v37_v32 = vrot.slane %v32_v30, %v36_v29  ;;  %v41_v33 = vrot.slane %v32_v30, %v40_v31 }
   0x9   :  { %145 = vmatpush1.bf16.msra.mxu0 %v144_v14  ;;  %159 = vmatpush1.bf16.msra.mxu1 %v144_v14 }
   0xa   :  { %147 = vmatprep.subr.bf16.mxu0 %v146_v15  ;;  %156 = vmatprep.subr.bf16.mxu1 %v146_v15 }
   0xd   :  { %149 = vmatpush1.bf16.msra.mxu0 %v148_v20  ;;  %160 = vmatpush1.bf16.msra.mxu1 %v148_v20 }
   0xe   :  { %151 = vmatprep.subr.bf16.mxu0 %v150_v21  ;;  %157 = vmatprep.subr.bf16.mxu1 %v150_v21 }
  0x11   :  { %153 = vmatpush1.bf16.msra.mxu0 %v152_v24  ;;  %161 = vmatpush1.bf16.msra.mxu1 %v152_v24 }
  0x14   :  { %136 = vmatmul.mubr.msk.f32.vlgmr.msra.gmra.mrb[0].mxu0 %vm44_vm0, %v14_v25  ;;  %137 = vmatmul.mubr.msk.f32.vlgmr.msra.gmra.mrb[0].mxu1 %vm44_vm0, %v15_v26 }
  0xe7   :  { %v117_v34 = vpop.f32.mrb[0].mxu0  ;;  %v123_v35 = vpop.f32.mrb[0].mxu1 }
  0xe8   :  { %v118_v36 = vadd.f32 %v117_v34, %v37_v32  ;;  %v124_v37 = vadd.f32 %v123_v35, %v37_v32  ;;  %v119_v38 = vpop.f32.mrb[1].mxu0  ;;  %v125_v39 = vpop.f32.mrb[1].mxu1 }
  0xe9   :  { %v120_v40 = vadd.f32 %v119_v38, %v41_v33  ;;  %v126_v41 = vadd.f32 %v125_v39, %v41_v33 }
  0xea   :  { %128 = vst [vmem:[%s256_s3] sm:$0xff] %v118_v36  ;;  %130 = vst [vmem:[%s256_s3 + $0x10] sm:$0xff] %v124_v37 }
  0xeb   :  { %129 = vst [vmem:[%s256_s3 + $0x8] sm:$0xff] %v120_v40  ;;  %131 = vst [vmem:[%s256_s3 + $0x18] sm:$0xff] %v126_v41 }

// kernel: forward.4
= control target key start
LH: loop header
LB: loop body
LE: loop exit
PB: predicated region body
PF: predicated region fallthrough
CT: control target
= control target key end

     0   :  { %v133_v3 = vmov 0.0   ;;  %vm32_vm0 = vcmask 130048   ;;  %v22_v9 = vlaneseq  ;;  %s187_s1 = inlined_call_operand.vmem [shape: f32[16,256], index: 1, kind: input, shape index: {}]   ;;  %s188_s0 = inlined_call_operand.vmem [shape: f32[16,16], index: 0, kind: input, shape index: {}]   ;;  %s189_s2 = inlined_call_operand.vmem [shape: f32[1,256], index: 2, kind: input, shape index: {}]   ;;  %s190_s3 = inlined_call_operand.vmem [shape: f32[16,256], index: 3, kind: output, shape index: {}]  }
   0x1   :  { %v17_v0 = vld [vmem:[%s187_s1 + $0x8] sm:$0xff]  ;;  %v19_v1 = vld [vmem:[%s187_s1 + $0x18] sm:$0xff]  ;;  %v16_v2 = vld [vmem:[%s187_s1] sm:$0xff]  ;;  %103 = vmatprep.mubr.f32.mxu0 %v133_v3  ;;  %109 = vmatprep.mubr.f32.mxu1 %v133_v3 }
   0x2   :  { %v126_v4 = vpack.c.bf16 %v19_v1, %v17_v0  ;;  %v18_v5 = vld [vmem:[%s187_s1 + $0x10] sm:$0xff]  ;;  %v14_v7 = vld [vmem:[%s188_s0] sm:$0xff]  ;;  %v15_v8 = vld [vmem:[%s188_s0 + $0x8] sm:$0xff]  ;;  %v23_v10 = vshrl.u32 %v22_v9, 7 }
   0x3   :  { %v128_v6 = vpack.c.bf16 %v18_v5, %v16_v2  ;;  %v20_v12 = vld [vmem:[%s189_s2] sm:$0x3] }
   0x4   :  { %127 = vmatprep.subr.bf16.mxu0 %v126_v4  ;;  %130 = vmatprep.subr.bf16.mxu1 %v126_v4  ;;  %v24_v11 = vsub.s32 0, %v23_v10  ;;  %v28_v13 = vsub.s32 1, %v23_v10 }
   0x5   :  { %129 = vmatpush1.bf16.msra.mxu0 %v128_v6  ;;  %131 = vmatpush1.bf16.msra.mxu1 %v128_v6 }
   0x6   :  { %v25_v14 = vrot.slane %v20_v12, %v24_v11  ;;  %v29_v15 = vrot.slane %v20_v12, %v28_v13 }
   0x8   :  { %124 = vmatmul.mubr.msk.f32.vlgmr.msra.gmra.mrb[0].mxu0 %vm32_vm0, %v14_v7  ;;  %125 = vmatmul.mubr.msk.f32.vlgmr.msra.gmra.mrb[0].mxu1 %vm32_vm0, %v15_v8 }
  0xdb   :  { %v105_v16 = vpop.f32.mrb[0].mxu0  ;;  %v111_v17 = vpop.f32.mrb[0].mxu1 }
  0xdc   :  { %v106_v18 = vadd.f32 %v105_v16, %v25_v14  ;;  %v112_v19 = vadd.f32 %v111_v17, %v25_v14  ;;  %v107_v20 = vpop.f32.mrb[1].mxu0  ;;  %v113_v21 = vpop.f32.mrb[1].mxu1 }
  0xdd   :  { %v108_v22 = vadd.f32 %v107_v20, %v29_v15  ;;  %v114_v23 = vadd.f32 %v113_v21, %v29_v15 }
  0xde   :  { %116 = vst [vmem:[%s190_s3] sm:$0xff] %v106_v18  ;;  %118 = vst [vmem:[%s190_s3 + $0x10] sm:$0xff] %v112_v19 }
  0xdf   :  { %117 = vst [vmem:[%s190_s3 + $0x8] sm:$0xff] %v108_v22  ;;  %119 = vst [vmem:[%s190_s3 + $0x18] sm:$0xff] %v114_v23 }

// kernel: forward.5
= control target key start
LH: loop header
LB: loop body
LE: loop exit
PB: predicated region body
PF: predicated region fallthrough
CT: control target
= control target key end

     0   :  { %vm11_vm0 = vcmask 517120   ;;  %v1578_v3 = vmov 0.0   ;;  %s1579_s9 = smov 32   ;;  %vm37_vm1 = vcmask 523264   ;;  %v30_v37 = vlaneseq  ;;  %s1580_s17 = smov 64   ;;  %s2007_s1 = inlined_call_operand.vmem [shape: f32[64,256], index: 1, kind: input, shape index: {}]   ;;  %s2008_s0 = inlined_call_operand.vmem [shape: f32[16,256], index: 0, kind: input, shape index: {}]   ;;  %s2009_s2 = inlined_call_operand.vmem [shape: f32[16,64], index: 2, kind: output, shape index: {}]  }
   0x1   :  { %v15_v0 = vld [vmem:[%s2007_s1 + $0x8] sm:$0xff]  ;;  %v17_v1 = vld [vmem:[%s2007_s1 + $0x18] sm:$0xff]  ;;  %v14_v2 = vld [vmem:[%s2007_s1] sm:$0xff]  ;;  %12 = vst.msk [vmem:[#allocation2] sm:$0x3] %vm11_vm0, %v1578_v3  ;;  %105 = vmatprep.mubr.f32.mxu0 %v1578_v3  ;;  %262 = vmatprep.mubr.f32.mxu1 %v1578_v3  ;;  %s1581_s18 = smov 96  }
   0x2   :  { %13 = vst.msk [vmem:[#allocation3] sm:$0x3] %vm11_vm0, %v1578_v3  ;;  %v1610_v4 = vpack.c.bf16 %v17_v1, %v15_v0  ;;  %v16_v5 = vld [vmem:[%s2007_s1 + $0x10] sm:$0xff]  ;;  %v19_v6 = vld [vmem:[%s2007_s1 + $0x28] sm:$0xff]  ;;  %v21_v7 = vld [vmem:[%s2007_s1 + $0x38] sm:$0xff]  ;;  %v31_v41 = vand.u32 127, %v30_v37 }
   0x3   :  { %v1621_v8 = vpack.c.bf16 %v16_v5, %v14_v2  ;;  %v1623_v9 = vpack.c.bf16 %v21_v7, %v19_v6  ;;  %v18_v10 = vld [vmem:[%s2007_s1 + $0x20] sm:$0xff]  ;;  %v20_v11 = vld [vmem:[%s2007_s1 + $0x30] sm:$0xff]  ;;  %v23_v12 = vld [vmem:[%s2007_s1 + $0x48] sm:$0xff]  ;;  %vm177_vm5 = vcmask 254976   ;;  %vm179_vm6 = vcmask 517376  }
   0x4   :  { %1319 = vmatprep.subr.bf16.mxu0 %v1610_v4  ;;  %v25_v13 = vld [vmem:[%s2007_s1 + $0x58] sm:$0xff]  ;;  %1335 = vmatprep.subr.bf16.mxu1 %v1610_v4  ;;  %v1640_v14 = vpack.c.bf16 %v20_v11, %v18_v10  ;;  %v22_v16 = vld [vmem:[%s2007_s1 + $0x40] sm:$0xff]  ;;  %v24_v17 = vld [vmem:[%s2007_s1 + $0x50] sm:$0xff]  ;;  %vm32_vm2 = vcmp.ge.s32.totalorder %v31_v41, 64  ;;  %vm33_vm3 = vcmp.lt.s32.totalorder %v31_v41, 96 }
   0x5   :  { %1321 = vmatpush1.bf16.msra.mxu0 %v1621_v8  ;;  %1337 = vmatpush1.bf16.msra.mxu1 %v1621_v8  ;;  %v1644_v15 = vpack.c.bf16 %v25_v13, %v23_v12  ;;  %v27_v18 = vld [vmem:[%s2007_s1 + $0x68] sm:$0xff]  ;;  %v29_v19 = vld [vmem:[%s2007_s1 + $0x78] sm:$0xff]  ;;  %v1662_v21 = vpack.c.bf16 %v24_v17, %v22_v16  ;;  %v26_v23 = vld [vmem:[%s2007_s1 + $0x60] sm:$0xff] }
   0x6   :  { %1323 = vmatprep.subr.bf16.mxu0 %v1623_v9  ;;  %1339 = vmatprep.subr.bf16.mxu1 %v1623_v9  ;;  %v1667_v22 = vpack.c.bf16 %v29_v19, %v27_v18  ;;  %v28_v24 = vld [vmem:[%s2007_s1 + $0x70] sm:$0xff]  ;;  %v113_v27 = vld [vmem:[%s2008_s0 + $0x18] sm:$0xc0]  ;;  %v112_v28 = vld [vmem:[%s2008_s0] sm:$0x3] }
   0x7   :  { %v1678_v25 = vpack.c.bf16 %v28_v24, %v26_v23  ;;  %v116_v29 = vrot.slane %v113_v27, 6  ;;  %vm1703_vm4 = vmand %vm32_vm2, %vm33_vm3  ;;  %v269_v10 = vld [vmem:[%s2008_s0] sm:$0xc]  ;;  %v270_v11 = vld [vmem:[%s2008_s0 + $0x18] sm:$0x30] }
   0x8   :  { %v35_v26 = vld [vmem:[#allocation2] sm:$0x3]  ;;  %v272_v12 = vrot.slane %v269_v10, 2  ;;  %v276_v13 = vrot.slane %v270_v11, 4 }
   0x9   :  { %v1659_v20 = vld [vmem:[#allocation3] sm:$0x3]  ;;  %1325 = vmatpush1.bf16.msra.mxu0 %v1640_v14  ;;  %1341 = vmatpush1.bf16.msra.mxu1 %v1640_v14 }
   0xa   :  { %136 = vrot.lane.b32.xlu1 %v1659_v20, %s1579_s9  ;;  %1327 = vmatprep.subr.bf16.mxu0 %v1644_v15 }
   0xb   :  { %1343 = vmatprep.subr.bf16.mxu1 %v1644_v15 }
   0xd   :  { %1329 = vmatpush1.bf16.msra.mxu0 %v1662_v21  ;;  %1345 = vmatpush1.bf16.msra.mxu1 %v1662_v21 }
   0xe   :  { %1331 = vmatprep.subr.bf16.mxu0 %v1667_v22  ;;  %1347 = vmatprep.subr.bf16.mxu1 %v1667_v22 }
  0x11   :  { %1333 = vmatpush1.bf16.msra.mxu0 %v1678_v25  ;;  %1349 = vmatpush1.bf16.msra.mxu1 %v1678_v25 }
  0x12   :  { %1351 = vmatprep.subr.bf16.mxu0 %v1610_v4  ;;  %1367 = vmatprep.subr.bf16.mxu1 %v1610_v4 }
  0x14   :  { %1294 = vmatmul.mubr.msk.f32.vlgmr.msra.gmra.mrb[0].mxu0 %vm37_vm1, %v35_v26 }
  0x15   :  { %1353 = vmatpush1.bf16.msra.mxu0 %v1621_v8  ;;  %420 = vmatprep.mubr.f32.mxu0 %v1578_v3 }
  0x16   :  { %1355 = vmatprep.subr.bf16.mxu0 %v1623_v9 }
  0x19   :  { %1357 = vmatpush1.bf16.msra.mxu0 %v1640_v14 }
  0x1a   :  { %1359 = vmatprep.subr.bf16.mxu0 %v1644_v15 }
  0x1d   :  { %1361 = vmatpush1.bf16.msra.mxu0 %v1662_v21 }
  0x1e   :  { %1363 = vmatprep.subr.bf16.mxu0 %v1667_v22 }
  0x21   :  { %1365 = vmatpush1.bf16.msra.mxu0 %v1678_v25 }
  0x22   :  { %1383 = vmatprep.subr.bf16.mxu0 %v1610_v4 }
  0x7c   :  { %v137_v53 = vpop.permute.xlu1 %136 }
  0xe7   :  { %v107_v30 = vpop.f32.mrb[0].mxu0 }
  0xe8   :  { %v114_v31 = vadd.f32 %v112_v28, %v107_v30  ;;  %v109_v32 = vpop.f32.mrb[1].mxu0 }
  0xe9   :  { %v118_v33 = vadd.f32 %v116_v29, %v109_v32 }
  0xea   :  { %v1295_v34 = vmul.f32 -1.442695, %v114_v31 }
  0xeb   :  { %v1296_v35 = vmul.f32 -1.442695, %v118_v33 }
  0xec   :  { %1450 = vpow2.f32 %v1295_v34 }
  0xed   :  { %1452 = vpow2.f32 %v1296_v35 }
  0xee   :  { %1454 = vtanh.f32 %v114_v31 }
  0xf6   :  { %v1451_v36 = vpop.eup %1450 }
  0xf7   :  { %v1453_v38 = vpop.eup %1452  ;;  %v123_v39 = vadd.f32 1.0, %v1451_v36 }
  0xf8   :  { %v131_v40 = vadd.f32 1.0, %v1453_v38  ;;  %v1455_v43 = vpop.eup %1454 }
  0xf9   :  { %1456 = vrcp.f32 %v123_v39 }
  0xfa   :  { %1458 = vrcp.f32 %v131_v40 }
  0xfb   :  { %1460 = vtanh.f32 %v118_v33 }
 0x103   :  { %v1457_v44 = vpop.eup %1456 }
 0x104   :  { %v126_v45 = vsel %vm1703_vm4, %v1455_v43, %v1457_v44  ;;  %v1459_v46 = vpop.eup %1458 }
 0x105   :  { %141 = vrot.lane.b32.xlu0 %v126_v45, %s1580_s17  ;;  %v1461_v47 = vpop.eup %1460  ;;  %v139_v54 = vmul.f32 %v137_v53, %v126_v45 }
 0x106   :  { %v134_v48 = vsel %vm1703_vm4, %v1461_v47, %v1459_v46 }
 0x107   :  { %v150_v57 = vmul.f32 %v134_v48, %v1659_v20 }
 0x109   :  { %152 = vrot.lane.b32.xlu0 %v134_v48, %s1580_s17 }
 0x177   :  { %v142_v49 = vpop.permute.xlu0 %141 }
 0x178   :  { %v144_v50 = vmul.f32 %v142_v49, %v126_v45 }
 0x17a   :  { %146 = vrot.lane.b32.xlu1 %v144_v50, %s1579_s9 }
 0x17b   :  { %v153_v51 = vpop.permute.xlu0 %152 }
 0x17c   :  { %v155_v52 = vmul.f32 %v153_v51, %v134_v48 }
 0x17e   :  { %157 = vrot.lane.b32.xlu0 %v155_v52, %s1579_s9 }
 0x1ec   :  { %v147_v55 = vpop.permute.xlu1 %146 }
 0x1ed   :  { %v149_v56 = vadd.f32 %v147_v55, %v139_v54 }
 0x1ef   :  { %1462 = vtanh.f32 %v149_v56 }
 0x1f0   :  { %v158_v58 = vpop.permute.xlu0 %157 }
 0x1f1   :  { %v160_v59 = vadd.f32 %v158_v58, %v150_v57  ;;  %v427_v58 = vld [vmem:[%s2008_s0] sm:$0x30] }
 0x1f3   :  { %1464 = vtanh.f32 %v160_v59 }
 0x1f9   :  { %v1463_v60 = vpop.eup %1462 }
 0x1fa   :  { %163 = vrot.lane.b32.xlu1 %v1463_v60, %s1580_s17  ;;  %v430_v60 = vrot.slane %v427_v58, 4 }
 0x1fd   :  { %v1465_v61 = vpop.eup %1464 }
 0x1fe   :  { %169 = vrot.lane.b32.xlu0 %v1465_v61, %s1580_s17 }
 0x26c   :  { %v164_v62 = vpop.permute.xlu1 %163 }
 0x26d   :  { %v166_v63 = vmul.f32 %v164_v62, %v126_v45 }
 0x26f   :  { %182 = vrot.lane.b32.xlu1 %v166_v63, %s1579_s9 }
 0x270   :  { %v170_v0 = vpop.permute.xlu0 %169 }
 0x271   :  { %v172_v1 = vmul.f32 %v170_v0, %v134_v48 }
 0x273   :  { %187 = vrot.lane.b32.xlu0 %v172_v1, %s1580_s17  ;;  %174 = vrot.lane.b32.xlu1 %v149_v56, %s1581_s18 }
 0x2e1   :  { %v183_v2 = vpop.permute.xlu1 %182 }
 0x2e2   :  { %185 = vst.msk [vmem:[#allocation2] sm:$0x3] %vm177_vm5, %v183_v2  ;;  %191 = vst.msk [vmem:[%s2009_s2] sm:$0x3] %vm177_vm5, %v183_v2 }
 0x2e5   :  { %v188_v5 = vpop.permute.xlu0 %187  ;;  %v175_v6 = vpop.permute.xlu1 %174 }
 0x2e6   :  { %190 = vst.msk [vmem:[#allocation2] sm:$0x3] %vm179_vm6, %v188_v5  ;;  %192 = vst.msk [vmem:[%s2009_s2 + $0xe] sm:$0x3] %vm179_vm6, %v188_v5 }
 0x2e7   :  { %178 = vst.msk [vmem:[#allocation3] sm:$0x3] %vm177_vm5, %v175_v6 }
 0x2e8   :  { %180 = vst.msk [vmem:[#allocation3] sm:$0x3] %vm179_vm6, %v160_v59  ;;  %v428_v59 = vld [vmem:[%s2008_s0 + $0x18] sm:$0xc] }
 0x2e9   :  { %v434_v61 = vrot.slane %v428_v59, 2 }
 0x2ed   :  { %v193_v7 = vld [vmem:[#allocation2] sm:$0x3] }
 0x2ee   :  { %1297 = vmatmul.mubr.msk.f32.vlgmr.msra.gmra.mrb[0].mxu1 %vm37_vm1, %v193_v7 }
 0x2ef   :  { %1369 = vmatpush1.bf16.msra.mxu1 %v1621_v8  ;;  %578 = vmatprep.mubr.f32.mxu1 %v1578_v3  ;;  %v194_v35 = vld [vmem:[#allocation3] sm:$0x3] }
 0x2f0   :  { %1371 = vmatprep.subr.bf16.mxu1 %v1623_v9 }
 0x2f3   :  { %1373 = vmatpush1.bf16.msra.mxu1 %v1640_v14 }
 0x2f4   :  { %1375 = vmatprep.subr.bf16.mxu1 %v1644_v15 }
 0x2f7   :  { %1377 = vmatpush1.bf16.msra.mxu1 %v1662_v21 }
 0x2f8   :  { %1379 = vmatprep.subr.bf16.mxu1 %v1667_v22 }
 0x2fb   :  { %1381 = vmatpush1.bf16.msra.mxu1 %v1678_v25 }
 0x2fc   :  { %1399 = vmatprep.subr.bf16.mxu1 %v1610_v4 }
 0x3c1   :  { %v264_v16 = vpop.f32.mrb[0].mxu1 }
 0x3c2   :  { %v274_v17 = vadd.f32 %v272_v12, %v264_v16  ;;  %v266_v18 = vpop.f32.mrb[1].mxu1 }
 0x3c3   :  { %v278_v19 = vadd.f32 %v276_v13, %v266_v18 }
 0x3c4   :  { %v1298_v20 = vmul.f32 -1.442695, %v274_v17 }
 0x3c5   :  { %v1299_v23 = vmul.f32 -1.442695, %v278_v19 }
 0x3c6   :  { %1466 = vpow2.f32 %v1298_v20 }
 0x3c7   :  { %1468 = vpow2.f32 %v1299_v23 }
 0x3c8   :  { %1470 = vtanh.f32 %v274_v17 }
 0x3c9   :  { %1472 = vtanh.f32 %v278_v19 }
 0x3d0   :  { %v1467_v24 = vpop.eup %1466 }
 0x3d1   :  { %v1469_v26 = vpop.eup %1468  ;;  %v283_v27 = vadd.f32 1.0, %v1467_v24 }
 0x3d2   :  { %v291_v28 = vadd.f32 1.0, %v1469_v26  ;;  %v1471_v29 = vpop.eup %1470 }
 0x3d3   :  { %1474 = vrcp.f32 %v283_v27  ;;  %v1473_v30 = vpop.eup %1472 }
 0x3d4   :  { %1476 = vrcp.f32 %v291_v28 }
 0x3dd   :  { %v1475_v31 = vpop.eup %1474 }
 0x3de   :  { %v1477_v32 = vpop.eup %1476  ;;  %v286_v33 = vsel %vm1703_vm4, %v1471_v29, %v1475_v31 }
 0x3df   :  { %301 = vrot.lane.b32.xlu0 %v286_v33, %s1580_s17  ;;  %v294_v34 = vsel %vm1703_vm4, %v1473_v30, %v1477_v32 }
 0x3e0   :  { %312 = vrot.lane.b32.xlu1 %v294_v34, %s1580_s17  ;;  %v310_v44 = vmul.f32 %v294_v34, %v194_v35 }
 0x3e3   :  { %296 = vrot.lane.b32.xlu0 %v194_v35, %s1579_s9 }
 0x451   :  { %v302_v36 = vpop.permute.xlu0 %301 }
 0x452   :  { %v304_v37 = vmul.f32 %v302_v36, %v286_v33  ;;  %v313_v38 = vpop.permute.xlu1 %312 }
 0x453   :  { %v315_v39 = vmul.f32 %v313_v38, %v294_v34 }
 0x454   :  { %306 = vrot.lane.b32.xlu1 %v304_v37, %s1579_s9 }
 0x455   :  { %317 = vrot.lane.b32.xlu0 %v315_v39, %s1579_s9  ;;  %v297_v40 = vpop.permute.xlu0 %296 }
 0x456   :  { %v299_v41 = vmul.f32 %v297_v40, %v286_v33 }
 0x4c6   :  { %v307_v43 = vpop.permute.xlu1 %306 }
 0x4c7   :  { %v309_v45 = vadd.f32 %v307_v43, %v299_v41  ;;  %v318_v46 = vpop.permute.xlu0 %317 }
 0x4c8   :  { %v320_v47 = vadd.f32 %v318_v46, %v310_v44  ;;  %v585_v46 = vld [vmem:[%s2008_s0] sm:$0xc0] }
 0x4c9   :  { %1478 = vtanh.f32 %v309_v45 }
 0x4ca   :  { %1480 = vtanh.f32 %v320_v47 }
 0x4d3   :  { %v1479_v48 = vpop.eup %1478 }
 0x4d4   :  { %v1481_v49 = vpop.eup %1480  ;;  %323 = vrot.lane.b32.xlu1 %v1479_v48, %s1580_s17  ;;  %v586_v48 = vld [vmem:[%s2008_s0 + $0x18] sm:$0x3] }
 0x4d5   :  { %329 = vrot.lane.b32.xlu0 %v1481_v49, %s1580_s17 }
 0x546   :  { %v324_v50 = vpop.permute.xlu1 %323 }
 0x547   :  { %v326_v51 = vmul.f32 %v324_v50, %v286_v33  ;;  %v330_v52 = vpop.permute.xlu0 %329 }
 0x548   :  { %v332_v53 = vmul.f32 %v330_v52, %v294_v34 }
 0x549   :  { %340 = vrot.lane.b32.xlu1 %v326_v51, %s1579_s9 }
 0x54a   :  { %345 = vrot.lane.b32.xlu0 %v332_v53, %s1580_s17 }
 0x54d   :  { %334 = vrot.lane.b32.xlu1 %v309_v45, %s1581_s18 }
 0x5bb   :  { %v341_v54 = vpop.permute.xlu1 %340 }
 0x5bc   :  { %343 = vst.msk [vmem:[#allocation2] sm:$0x3] %vm177_vm5, %v341_v54  ;;  %349 = vst.msk [vmem:[%s2009_s2 + $0x2] sm:$0x3] %vm177_vm5, %v341_v54  ;;  %v346_v55 = vpop.permute.xlu0 %345 }
 0x5bd   :  { %348 = vst.msk [vmem:[#allocation2] sm:$0x3] %vm179_vm6, %v346_v55  ;;  %350 = vst.msk [vmem:[%s2009_s2 + $0xc] sm:$0x3] %vm179_vm6, %v346_v55 }
 0x5bf   :  { %v335_v56 = vpop.permute.xlu1 %334 }
 0x5c0   :  { %337 = vst.msk [vmem:[#allocation3] sm:$0x3] %vm177_vm5, %v335_v56 }
 0x5c1   :  { %338 = vst.msk [vmem:[#allocation3] sm:$0x3] %vm179_vm6, %v320_v47  ;;  %v588_v47 = vrot.slane %v585_v46, 6 }
 0x5c4   :  { %v351_v57 = vld [vmem:[#allocation2] sm:$0x3] }
 0x5c5   :  { %1300 = vmatmul.mubr.msk.f32.vlgmr.msra.gmra.mrb[2].mxu0 %vm37_vm1, %v351_v57 }
 0x5c6   :  { %1385 = vmatpush1.bf16.msra.mxu0 %v1621_v8  ;;  %733 = vmatprep.mubr.f32.mxu0 %v1578_v3 }
 0x5c7   :  { %1387 = vmatprep.subr.bf16.mxu0 %v1623_v9 }
 0x5c8   :  { %v352_v20 = vld [vmem:[#allocation3] sm:$0x3] }
 0x5ca   :  { %1389 = vmatpush1.bf16.msra.mxu0 %v1640_v14 }
 0x5cb   :  { %1391 = vmatprep.subr.bf16.mxu0 %v1644_v15 }
 0x5ce   :  { %1393 = vmatpush1.bf16.msra.mxu0 %v1662_v21 }
 0x5cf   :  { %1395 = vmatprep.subr.bf16.mxu0 %v1667_v22 }
 0x5d2   :  { %1397 = vmatpush1.bf16.msra.mxu0 %v1678_v25 }
 0x5d3   :  { %1415 = vmatprep.subr.bf16.mxu0 %v1610_v4 }
 0x698   :  { %v422_v62 = vpop.f32.mrb[2].mxu0 }
 0x699   :  { %v432_v63 = vadd.f32 %v430_v60, %v422_v62  ;;  %v424_v0 = vpop.f32.mrb[3].mxu0 }
 0x69a   :  { %v436_v1 = vadd.f32 %v434_v61, %v424_v0 }
 0x69b   :  { %v1301_v2 = vmul.f32 -1.442695, %v432_v63 }
 0x69c   :  { %v1302_v5 = vmul.f32 -1.442695, %v436_v1 }
 0x69d   :  { %1482 = vpow2.f32 %v1301_v2 }
 0x69e   :  { %1484 = vpow2.f32 %v1302_v5 }
 0x69f   :  { %1486 = vtanh.f32 %v432_v63 }
 0x6a0   :  { %1488 = vtanh.f32 %v436_v1 }
 0x6a7   :  { %v1483_v6 = vpop.eup %1482 }
 0x6a8   :  { %v1485_v7 = vpop.eup %1484  ;;  %v441_v10 = vadd.f32 1.0, %v1483_v6 }
 0x6a9   :  { %v449_v11 = vadd.f32 1.0, %v1485_v7  ;;  %v1487_v12 = vpop.eup %1486 }
 0x6aa   :  { %1490 = vrcp.f32 %v441_v10  ;;  %v1489_v13 = vpop.eup %1488 }
 0x6ab   :  { %1492 = vrcp.f32 %v449_v11 }
 0x6b4   :  { %v1491_v16 = vpop.eup %1490 }
 0x6b5   :  { %v1493_v17 = vpop.eup %1492  ;;  %v444_v18 = vsel %vm1703_vm4, %v1487_v12, %v1491_v16 }
 0x6b6   :  { %459 = vrot.lane.b32.xlu0 %v444_v18, %s1580_s17  ;;  %v452_v19 = vsel %vm1703_vm4, %v1489_v13, %v1493_v17 }
 0x6b7   :  { %470 = vrot.lane.b32.xlu1 %v452_v19, %s1580_s17  ;;  %v468_v31 = vmul.f32 %v452_v19, %v352_v20 }
 0x6ba   :  { %454 = vrot.lane.b32.xlu0 %v352_v20, %s1579_s9 }
 0x728   :  { %v460_v23 = vpop.permute.xlu0 %459 }
 0x729   :  { %v462_v24 = vmul.f32 %v460_v23, %v444_v18  ;;  %v471_v26 = vpop.permute.xlu1 %470 }
 0x72a   :  { %v473_v27 = vmul.f32 %v471_v26, %v452_v19 }
 0x72b   :  { %464 = vrot.lane.b32.xlu1 %v462_v24, %s1579_s9 }
 0x72c   :  { %475 = vrot.lane.b32.xlu0 %v473_v27, %s1579_s9  ;;  %v455_v28 = vpop.permute.xlu0 %454 }
 0x72d   :  { %v457_v29 = vmul.f32 %v455_v28, %v444_v18 }
 0x79d   :  { %v465_v30 = vpop.permute.xlu1 %464 }
 0x79e   :  { %v467_v32 = vadd.f32 %v465_v30, %v457_v29  ;;  %v476_v33 = vpop.permute.xlu0 %475 }
 0x79f   :  { %v478_v34 = vadd.f32 %v476_v33, %v468_v31  ;;  %v741_v31 = vld [vmem:[%s2008_s0 + $0x8] sm:$0xc0] }
 0x7a0   :  { %1494 = vtanh.f32 %v467_v32  ;;  %v744_v33 = vrot.slane %v741_v31, 6 }
 0x7a1   :  { %1496 = vtanh.f32 %v478_v34 }
 0x7aa   :  { %v1495_v35 = vpop.eup %1494 }
 0x7ab   :  { %v1497_v36 = vpop.eup %1496  ;;  %481 = vrot.lane.b32.xlu1 %v1495_v35, %s1580_s17 }
 0x7ac   :  { %487 = vrot.lane.b32.xlu0 %v1497_v36, %s1580_s17 }
 0x81d   :  { %v482_v37 = vpop.permute.xlu1 %481 }
 0x81e   :  { %v484_v38 = vmul.f32 %v482_v37, %v444_v18  ;;  %v488_v39 = vpop.permute.xlu0 %487 }
 0x81f   :  { %v490_v40 = vmul.f32 %v488_v39, %v452_v19 }
 0x820   :  { %498 = vrot.lane.b32.xlu1 %v484_v38, %s1579_s9 }
 0x821   :  { %503 = vrot.lane.b32.xlu0 %v490_v40, %s1580_s17 }
 0x824   :  { %492 = vrot.lane.b32.xlu1 %v467_v32, %s1581_s18  ;;  %v740_v32 = vld [vmem:[%s2008_s0 + $0x10] sm:$0x3] }
 0x892   :  { %v499_v41 = vpop.permute.xlu1 %498 }
 0x893   :  { %501 = vst.msk [vmem:[#allocation2] sm:$0x3] %vm177_vm5, %v499_v41  ;;  %507 = vst.msk [vmem:[%s2009_s2 + $0x4] sm:$0x3] %vm177_vm5, %v499_v41  ;;  %v504_v43 = vpop.permute.xlu0 %503 }
 0x894   :  { %506 = vst.msk [vmem:[#allocation2] sm:$0x3] %vm179_vm6, %v504_v43  ;;  %508 = vst.msk [vmem:[%s2009_s2 + $0xa] sm:$0x3] %vm179_vm6, %v504_v43 }
 0x896   :  { %v493_v44 = vpop.permute.xlu1 %492 }
 0x897   :  { %495 = vst.msk [vmem:[#allocation3] sm:$0x3] %vm177_vm5, %v493_v44 }
 0x898   :  { %496 = vst.msk [vmem:[#allocation3] sm:$0x3] %vm179_vm6, %v478_v34 }
 0x89b   :  { %v509_v45 = vld [vmem:[#allocation2] sm:$0x3] }
 0x89c   :  { %1303 = vmatmul.mubr.msk.f32.vlgmr.msra.gmra.mrb[2].mxu1 %vm37_vm1, %v509_v45 }
 0x89d   :  { %1401 = vmatpush1.bf16.msra.mxu1 %v1621_v8  ;;  %888 = vmatprep.mubr.f32.mxu1 %v1578_v3 }
 0x89e   :  { %1403 = vmatprep.subr.bf16.mxu1 %v1623_v9 }
 0x89f   :  { %v510_v0 = vld [vmem:[#allocation3] sm:$0x3] }
 0x8a1   :  { %1405 = vmatpush1.bf16.msra.mxu1 %v1640_v14 }
 0x8a2   :  { %1407 = vmatprep.subr.bf16.mxu1 %v1644_v15 }
 0x8a5   :  { %1409 = vmatpush1.bf16.msra.mxu1 %v1662_v21 }
 0x8a6   :  { %1411 = vmatprep.subr.bf16.mxu1 %v1667_v22 }
 0x8a9   :  { %1413 = vmatpush1.bf16.msra.mxu1 %v1678_v25 }
 0x8aa   :  { %1431 = vmatprep.subr.bf16.mxu1 %v1610_v4 }
 0x96f   :  { %v580_v49 = vpop.f32.mrb[2].mxu1 }
 0x970   :  { %v590_v50 = vadd.f32 %v588_v47, %v580_v49  ;;  %v582_v51 = vpop.f32.mrb[3].mxu1 }
 0x971   :  { %v591_v52 = vadd.f32 %v586_v48, %v582_v51 }
 0x972   :  { %v1304_v53 = vmul.f32 -1.442695, %v590_v50 }
 0x973   :  { %v1305_v54 = vmul.f32 -1.442695, %v591_v52 }
 0x974   :  { %1498 = vpow2.f32 %v1304_v53 }
 0x975   :  { %1500 = vpow2.f32 %v1305_v54 }
 0x976   :  { %1502 = vtanh.f32 %v590_v50 }
 0x977   :  { %1504 = vtanh.f32 %v591_v52 }
 0x97e   :  { %v1499_v55 = vpop.eup %1498 }
 0x97f   :  { %v1501_v56 = vpop.eup %1500  ;;  %v596_v4 = vadd.f32 1.0, %v1499_v55 }
 0x980   :  { %v604_v57 = vadd.f32 1.0, %v1501_v56  ;;  %v1503_v58 = vpop.eup %1502 }
 0x981   :  { %1506 = vrcp.f32 %v596_v4  ;;  %v1505_v59 = vpop.eup %1504 }
 0x982   :  { %1508 = vrcp.f32 %v604_v57 }
 0x98b   :  { %v1507_v60 = vpop.eup %1506 }
 0x98c   :  { %v1509_v61 = vpop.eup %1508  ;;  %v599_v62 = vsel %vm1703_vm4, %v1503_v58, %v1507_v60 }
 0x98d   :  { %614 = vrot.lane.b32.xlu0 %v599_v62, %s1580_s17  ;;  %v607_v63 = vsel %vm1703_vm4, %v1505_v59, %v1509_v61 }
 0x98e   :  { %625 = vrot.lane.b32.xlu1 %v607_v63, %s1580_s17  ;;  %v623_v12 = vmul.f32 %v607_v63, %v510_v0 }
 0x991   :  { %609 = vrot.lane.b32.xlu0 %v510_v0, %s1579_s9 }
 0x9ff   :  { %v615_v1 = vpop.permute.xlu0 %614 }
 0xa00   :  { %v617_v2 = vmul.f32 %v615_v1, %v599_v62  ;;  %v626_v5 = vpop.permute.xlu1 %625 }
 0xa01   :  { %v628_v6 = vmul.f32 %v626_v5, %v607_v63 }
 0xa02   :  { %619 = vrot.lane.b32.xlu1 %v617_v2, %s1579_s9 }
 0xa03   :  { %630 = vrot.lane.b32.xlu0 %v628_v6, %s1579_s9  ;;  %v610_v7 = vpop.permute.xlu0 %609 }
 0xa04   :  { %v612_v10 = vmul.f32 %v610_v7, %v599_v62 }
 0xa74   :  { %v620_v11 = vpop.permute.xlu1 %619 }
 0xa75   :  { %v622_v13 = vadd.f32 %v620_v11, %v612_v10  ;;  %v631_v16 = vpop.permute.xlu0 %630 }
 0xa76   :  { %v633_v17 = vadd.f32 %v631_v16, %v623_v12  ;;  %v895_v12 = vld [vmem:[%s2008_s0 + $0x10] sm:$0xc] }
 0xa77   :  { %1510 = vtanh.f32 %v622_v13 }
 0xa78   :  { %1512 = vtanh.f32 %v633_v17 }
 0xa81   :  { %v1511_v18 = vpop.eup %1510 }
 0xa82   :  { %v1513_v19 = vpop.eup %1512  ;;  %636 = vrot.lane.b32.xlu1 %v1511_v18, %s1580_s17 }
 0xa83   :  { %642 = vrot.lane.b32.xlu0 %v1513_v19, %s1580_s17 }
 0xaf4   :  { %v637_v20 = vpop.permute.xlu1 %636 }
 0xaf5   :  { %v639_v23 = vmul.f32 %v637_v20, %v599_v62  ;;  %v643_v24 = vpop.permute.xlu0 %642 }
 0xaf6   :  { %v645_v26 = vmul.f32 %v643_v24, %v607_v63 }
 0xaf7   :  { %653 = vrot.lane.b32.xlu1 %v639_v23, %s1579_s9 }
 0xaf8   :  { %658 = vrot.lane.b32.xlu0 %v645_v26, %s1580_s17 }
 0xafb   :  { %647 = vrot.lane.b32.xlu1 %v622_v13, %s1581_s18 }
 0xb69   :  { %v654_v27 = vpop.permute.xlu1 %653 }
 0xb6a   :  { %656 = vst.msk [vmem:[#allocation2] sm:$0x3] %vm177_vm5, %v654_v27  ;;  %662 = vst.msk [vmem:[%s2009_s2 + $0x6] sm:$0x3] %vm177_vm5, %v654_v27  ;;  %v659_v28 = vpop.permute.xlu0 %658 }
 0xb6b   :  { %661 = vst.msk [vmem:[#allocation2] sm:$0x3] %vm179_vm6, %v659_v28  ;;  %663 = vst.msk [vmem:[%s2009_s2 + $0x8] sm:$0x3] %vm179_vm6, %v659_v28 }
 0xb6d   :  { %v648_v29 = vpop.permute.xlu1 %647 }
 0xb6e   :  { %650 = vst.msk [vmem:[#allocation3] sm:$0x3] %vm177_vm5, %v648_v29 }
 0xb6f   :  { %651 = vst.msk [vmem:[#allocation3] sm:$0x3] %vm179_vm6, %v633_v17 }
 0xb72   :  { %v664_v30 = vld [vmem:[#allocation2] sm:$0x3] }
 0xb73   :  { %1306 = vmatmul.mubr.msk.f32.vlgmr.msra.gmra.mrb[4].mxu0 %vm37_vm1, %v664_v30 }
 0xb74   :  { %1417 = vmatpush1.bf16.msra.mxu0 %v1621_v8  ;;  %1046 = vmatprep.mubr.f32.mxu0 %v1578_v3 }
 0xb75   :  { %1419 = vmatprep.subr.bf16.mxu0 %v1623_v9 }
 0xb76   :  { %v665_v51 = vld [vmem:[#allocation3] sm:$0x3] }
 0xb78   :  { %1421 = vmatpush1.bf16.msra.mxu0 %v1640_v14 }
 0xb79   :  { %1423 = vmatprep.subr.bf16.mxu0 %v1644_v15 }
 0xb7c   :  { %1425 = vmatpush1.bf16.msra.mxu0 %v1662_v21 }
 0xb7d   :  { %1427 = vmatprep.subr.bf16.mxu0 %v1667_v22 }
 0xb80   :  { %1429 = vmatpush1.bf16.msra.mxu0 %v1678_v25 }
 0xc46   :  { %v735_v34 = vpop.f32.mrb[4].mxu0 }
 0xc47   :  { %v742_v35 = vadd.f32 %v740_v32, %v735_v34  ;;  %v737_v36 = vpop.f32.mrb[5].mxu0 }
 0xc48   :  { %v746_v37 = vadd.f32 %v744_v33, %v737_v36 }
 0xc49   :  { %v1307_v38 = vmul.f32 -1.442695, %v742_v35 }
 0xc4a   :  { %v1308_v39 = vmul.f32 -1.442695, %v746_v37 }
 0xc4b   :  { %1514 = vpow2.f32 %v1307_v38 }
 0xc4c   :  { %1516 = vpow2.f32 %v1308_v39 }
 0xc4d   :  { %1518 = vtanh.f32 %v742_v35 }
 0xc4e   :  { %1520 = vtanh.f32 %v746_v37 }
 0xc55   :  { %v1515_v40 = vpop.eup %1514 }
 0xc56   :  { %v1517_v41 = vpop.eup %1516  ;;  %v751_v43 = vadd.f32 1.0, %v1515_v40 }
 0xc57   :  { %v759_v44 = vadd.f32 1.0, %v1517_v41  ;;  %v1519_v45 = vpop.eup %1518 }
 0xc58   :  { %1522 = vrcp.f32 %v751_v43  ;;  %v1521_v46 = vpop.eup %1520 }
 0xc59   :  { %1524 = vrcp.f32 %v759_v44 }
 0xc62   :  { %v1523_v47 = vpop.eup %1522 }
 0xc63   :  { %v1525_v48 = vpop.eup %1524  ;;  %v754_v49 = vsel %vm1703_vm4, %v1519_v45, %v1523_v47 }
 0xc64   :  { %769 = vrot.lane.b32.xlu0 %v754_v49, %s1580_s17  ;;  %v762_v50 = vsel %vm1703_vm4, %v1521_v46, %v1525_v48 }
 0xc65   :  { %780 = vrot.lane.b32.xlu1 %v762_v50, %s1580_s17  ;;  %v778_v58 = vmul.f32 %v762_v50, %v665_v51 }
 0xc68   :  { %764 = vrot.lane.b32.xlu0 %v665_v51, %s1579_s9 }
 0xcd6   :  { %v770_v52 = vpop.permute.xlu0 %769 }
 0xcd7   :  { %v772_v53 = vmul.f32 %v770_v52, %v754_v49  ;;  %v781_v54 = vpop.permute.xlu1 %780  ;;  %v1053_v52 = vld [vmem:[%s2008_s0 + $0x10] sm:$0x30] }
 0xcd8   :  { %v783_v55 = vmul.f32 %v781_v54, %v762_v50  ;;  %v1056_v54 = vrot.slane %v1053_v52, 4 }
 0xcd9   :  { %774 = vrot.lane.b32.xlu1 %v772_v53, %s1579_s9  ;;  %v1054_v53 = vld [vmem:[%s2008_s0 + $0x8] sm:$0xc] }
 0xcda   :  { %785 = vrot.lane.b32.xlu0 %v783_v55, %s1579_s9  ;;  %v765_v56 = vpop.permute.xlu0 %764  ;;  %v1060_v55 = vrot.slane %v1054_v53, 2 }
 0xcdb   :  { %v767_v4 = vmul.f32 %v765_v56, %v754_v49 }
 0xd4b   :  { %v775_v57 = vpop.permute.xlu1 %774 }
 0xd4c   :  { %v777_v59 = vadd.f32 %v775_v57, %v767_v4  ;;  %v786_v60 = vpop.permute.xlu0 %785 }
 0xd4d   :  { %v788_v61 = vadd.f32 %v786_v60, %v778_v58 }
 0xd4e   :  { %1526 = vtanh.f32 %v777_v59 }
 0xd4f   :  { %1528 = vtanh.f32 %v788_v61 }
 0xd58   :  { %v1527_v62 = vpop.eup %1526 }
 0xd59   :  { %v1529_v63 = vpop.eup %1528  ;;  %791 = vrot.lane.b32.xlu1 %v1527_v62, %s1580_s17 }
 0xd5a   :  { %797 = vrot.lane.b32.xlu0 %v1529_v63, %s1580_s17 }
 0xdcb   :  { %v792_v0 = vpop.permute.xlu1 %791 }
 0xdcc   :  { %v794_v1 = vmul.f32 %v792_v0, %v754_v49  ;;  %v798_v2 = vpop.permute.xlu0 %797 }
 0xdcd   :  { %v800_v5 = vmul.f32 %v798_v2, %v762_v50 }
 0xdce   :  { %808 = vrot.lane.b32.xlu1 %v794_v1, %s1579_s9 }
 0xdcf   :  { %813 = vrot.lane.b32.xlu0 %v800_v5, %s1580_s17 }
 0xdd2   :  { %802 = vrot.lane.b32.xlu1 %v777_v59, %s1581_s18 }
 0xe40   :  { %v809_v6 = vpop.permute.xlu1 %808 }
 0xe41   :  { %811 = vst.msk [vmem:[#allocation2] sm:$0x3] %vm177_vm5, %v809_v6  ;;  %817 = vst.msk [vmem:[%s2009_s2 + $0x8] sm:$0x3] %vm177_vm5, %v809_v6  ;;  %v814_v7 = vpop.permute.xlu0 %813 }
 0xe42   :  { %816 = vst.msk [vmem:[#allocation2] sm:$0x3] %vm179_vm6, %v814_v7  ;;  %818 = vst.msk [vmem:[%s2009_s2 + $0x6] sm:$0x3] %vm179_vm6, %v814_v7 }
 0xe44   :  { %v803_v10 = vpop.permute.xlu1 %802 }
 0xe45   :  { %805 = vst.msk [vmem:[#allocation3] sm:$0x3] %vm177_vm5, %v803_v10 }
 0xe46   :  { %806 = vst.msk [vmem:[#allocation3] sm:$0x3] %vm179_vm6, %v788_v61 }
 0xe49   :  { %v819_v11 = vld [vmem:[#allocation2] sm:$0x3] }
 0xe4a   :  { %1309 = vmatmul.mubr.msk.f32.vlgmr.msra.gmra.mrb[4].mxu1 %vm37_vm1, %v819_v11 }
 0xe4b   :  { %1433 = vmatpush1.bf16.msra.mxu1 %v1621_v8  ;;  %1204 = vmatprep.mubr.f32.mxu1 %v1578_v3  ;;  %v896_v3 = vld [vmem:[%s2008_s0 + $0x8] sm:$0x30]  ;;  %v898_v8 = vrot.slane %v895_v12, 2 }
 0xe4c   :  { %1435 = vmatprep.subr.bf16.mxu1 %v1623_v9  ;;  %v902_v9 = vrot.slane %v896_v3, 4 }
 0xe4d   :  { %v820_v29 = vld [vmem:[#allocation3] sm:$0x3] }
 0xe4f   :  { %1437 = vmatpush1.bf16.msra.mxu1 %v1640_v14 }
 0xe50   :  { %1439 = vmatprep.subr.bf16.mxu1 %v1644_v15 }
 0xe53   :  { %1441 = vmatpush1.bf16.msra.mxu1 %v1662_v21 }
 0xe54   :  { %1443 = vmatprep.subr.bf16.mxu1 %v1667_v22 }
 0xe57   :  { %1445 = vmatpush1.bf16.msra.mxu1 %v1678_v25 }
 0xf1d   :  { %v890_v13 = vpop.f32.mrb[4].mxu1 }
 0xf1e   :  { %v900_v14 = vadd.f32 %v898_v8, %v890_v13  ;;  %v892_v16 = vpop.f32.mrb[5].mxu1 }
 0xf1f   :  { %v904_v15 = vadd.f32 %v902_v9, %v892_v16 }
 0xf20   :  { %v1310_v17 = vmul.f32 -1.442695, %v900_v14 }
 0xf21   :  { %v1311_v21 = vmul.f32 -1.442695, %v904_v15 }
 0xf22   :  { %1530 = vpow2.f32 %v1310_v17 }
 0xf23   :  { %1532 = vpow2.f32 %v1311_v21 }
 0xf24   :  { %1534 = vtanh.f32 %v900_v14 }
 0xf25   :  { %1536 = vtanh.f32 %v904_v15 }
 0xf2c   :  { %v1531_v22 = vpop.eup %1530 }
 0xf2d   :  { %v1533_v25 = vpop.eup %1532  ;;  %v909_v18 = vadd.f32 1.0, %v1531_v22 }
 0xf2e   :  { %v917_v19 = vadd.f32 1.0, %v1533_v25  ;;  %v1535_v20 = vpop.eup %1534 }
 0xf2f   :  { %1538 = vrcp.f32 %v909_v18  ;;  %v1537_v23 = vpop.eup %1536 }
 0xf30   :  { %1540 = vrcp.f32 %v917_v19 }
 0xf39   :  { %v1539_v24 = vpop.eup %1538 }
 0xf3a   :  { %v1541_v26 = vpop.eup %1540  ;;  %v912_v27 = vsel %vm1703_vm4, %v1535_v20, %v1539_v24 }
 0xf3b   :  { %927 = vrot.lane.b32.xlu0 %v912_v27, %s1580_s17  ;;  %v920_v28 = vsel %vm1703_vm4, %v1537_v23, %v1541_v26 }
 0xf3c   :  { %938 = vrot.lane.b32.xlu1 %v920_v28, %s1580_s17  ;;  %v936_v37 = vmul.f32 %v920_v28, %v820_v29 }
 0xf3f   :  { %922 = vrot.lane.b32.xlu0 %v820_v29, %s1579_s9 }
 0xfad   :  { %v928_v30 = vpop.permute.xlu0 %927 }
 0xfae   :  { %v930_v31 = vmul.f32 %v928_v30, %v912_v27  ;;  %v939_v32 = vpop.permute.xlu1 %938  ;;  %v1211_v30 = vld [vmem:[%s2008_s0 + $0x10] sm:$0xc0] }
 0xfaf   :  { %v941_v33 = vmul.f32 %v939_v32, %v920_v28  ;;  %v1212_v32 = vld [vmem:[%s2008_s0 + $0x8] sm:$0x3] }
 0xfb0   :  { %932 = vrot.lane.b32.xlu1 %v930_v31, %s1579_s9  ;;  %v1214_v31 = vrot.slane %v1211_v30, 6 }
 0xfb1   :  { %943 = vrot.lane.b32.xlu0 %v941_v33, %s1579_s9  ;;  %v923_v34 = vpop.permute.xlu0 %922 }
 0xfb2   :  { %v925_v35 = vmul.f32 %v923_v34, %v912_v27 }
0x1022   :  { %v933_v36 = vpop.permute.xlu1 %932 }
0x1023   :  { %v935_v38 = vadd.f32 %v933_v36, %v925_v35  ;;  %v944_v39 = vpop.permute.xlu0 %943 }
0x1024   :  { %v946_v40 = vadd.f32 %v944_v39, %v936_v37 }
0x1025   :  { %1542 = vtanh.f32 %v935_v38 }
0x1026   :  { %1544 = vtanh.f32 %v946_v40 }
0x102f   :  { %v1543_v41 = vpop.eup %1542 }
0x1030   :  { %v1545_v43 = vpop.eup %1544  ;;  %949 = vrot.lane.b32.xlu1 %v1543_v41, %s1580_s17 }
0x1031   :  { %955 = vrot.lane.b32.xlu0 %v1545_v43, %s1580_s17 }
0x10a2   :  { %v950_v44 = vpop.permute.xlu1 %949 }
0x10a3   :  { %v952_v45 = vmul.f32 %v950_v44, %v912_v27  ;;  %v956_v46 = vpop.permute.xlu0 %955 }
0x10a4   :  { %v958_v47 = vmul.f32 %v956_v46, %v920_v28 }
0x10a5   :  { %966 = vrot.lane.b32.xlu1 %v952_v45, %s1579_s9 }
0x10a6   :  { %971 = vrot.lane.b32.xlu0 %v958_v47, %s1580_s17 }
0x10a9   :  { %960 = vrot.lane.b32.xlu1 %v935_v38, %s1581_s18 }
0x1117   :  { %v967_v48 = vpop.permute.xlu1 %966 }
0x1118   :  { %969 = vst.msk [vmem:[#allocation2] sm:$0x3] %vm177_vm5, %v967_v48  ;;  %975 = vst.msk [vmem:[%s2009_s2 + $0xa] sm:$0x3] %vm177_vm5, %v967_v48  ;;  %v972_v49 = vpop.permute.xlu0 %971 }
0x1119   :  { %974 = vst.msk [vmem:[#allocation2] sm:$0x3] %vm179_vm6, %v972_v49  ;;  %976 = vst.msk [vmem:[%s2009_s2 + $0x4] sm:$0x3] %vm179_vm6, %v972_v49 }
0x111b   :  { %v961_v50 = vpop.permute.xlu1 %960 }
0x111c   :  { %963 = vst.msk [vmem:[#allocation3] sm:$0x3] %vm177_vm5, %v961_v50 }
0x111d   :  { %964 = vst.msk [vmem:[#allocation3] sm:$0x3] %vm179_vm6, %v946_v40 }
0x1120   :  { %v977_v51 = vld [vmem:[#allocation2] sm:$0x3] }
0x1121   :  { %1312 = vmatmul.mubr.msk.f32.vlgmr.msra.gmra.mrb[6].mxu0 %vm37_vm1, %v977_v51 }
0x1124   :  { %v978_v11 = vld [vmem:[#allocation3] sm:$0x3] }
0x11f4   :  { %v1048_v56 = vpop.f32.mrb[6].mxu0 }
0x11f5   :  { %v1058_v4 = vadd.f32 %v1056_v54, %v1048_v56  ;;  %v1050_v57 = vpop.f32.mrb[7].mxu0 }
0x11f6   :  { %v1062_v58 = vadd.f32 %v1060_v55, %v1050_v57 }
0x11f7   :  { %v1313_v59 = vmul.f32 -1.442695, %v1058_v4 }
0x11f8   :  { %v1314_v60 = vmul.f32 -1.442695, %v1062_v58 }
0x11f9   :  { %1546 = vpow2.f32 %v1313_v59 }
0x11fa   :  { %1548 = vpow2.f32 %v1314_v60 }
0x11fb   :  { %1550 = vtanh.f32 %v1058_v4 }
0x11fc   :  { %1552 = vtanh.f32 %v1062_v58 }
0x1203   :  { %v1547_v61 = vpop.eup %1546 }
0x1204   :  { %v1549_v62 = vpop.eup %1548  ;;  %v1067_v63 = vadd.f32 1.0, %v1547_v61 }
0x1205   :  { %v1075_v0 = vadd.f32 1.0, %v1549_v62  ;;  %v1551_v1 = vpop.eup %1550 }
0x1206   :  { %1554 = vrcp.f32 %v1067_v63  ;;  %v1553_v2 = vpop.eup %1552 }
0x1207   :  { %1556 = vrcp.f32 %v1075_v0 }
0x1210   :  { %v1555_v5 = vpop.eup %1554 }
0x1211   :  { %v1557_v6 = vpop.eup %1556  ;;  %v1070_v7 = vsel %vm1703_vm4, %v1551_v1, %v1555_v5 }
0x1212   :  { %1085 = vrot.lane.b32.xlu0 %v1070_v7, %s1580_s17  ;;  %v1078_v10 = vsel %vm1703_vm4, %v1553_v2, %v1557_v6 }
0x1213   :  { %1096 = vrot.lane.b32.xlu1 %v1078_v10, %s1580_s17  ;;  %v1094_v15 = vmul.f32 %v1078_v10, %v978_v11 }
0x1216   :  { %1080 = vrot.lane.b32.xlu0 %v978_v11, %s1579_s9 }
0x1284   :  { %v1086_v12 = vpop.permute.xlu0 %1085 }
0x1285   :  { %v1088_v3 = vmul.f32 %v1086_v12, %v1070_v7  ;;  %v1097_v8 = vpop.permute.xlu1 %1096 }
0x1286   :  { %v1099_v9 = vmul.f32 %v1097_v8, %v1078_v10 }
0x1287   :  { %1090 = vrot.lane.b32.xlu1 %v1088_v3, %s1579_s9 }
0x1288   :  { %1101 = vrot.lane.b32.xlu0 %v1099_v9, %s1579_s9  ;;  %v1081_v13 = vpop.permute.xlu0 %1080 }
0x1289   :  { %v1083_v14 = vmul.f32 %v1081_v13, %v1070_v7 }
0x12f9   :  { %v1091_v16 = vpop.permute.xlu1 %1090 }
0x12fa   :  { %v1093_v17 = vadd.f32 %v1091_v16, %v1083_v14  ;;  %v1102_v21 = vpop.permute.xlu0 %1101 }
0x12fb   :  { %v1104_v22 = vadd.f32 %v1102_v21, %v1094_v15 }
0x12fc   :  { %1558 = vtanh.f32 %v1093_v17 }
0x12fd   :  { %1560 = vtanh.f32 %v1104_v22 }
0x1306   :  { %v1559_v25 = vpop.eup %1558 }
0x1307   :  { %v1561_v18 = vpop.eup %1560  ;;  %1107 = vrot.lane.b32.xlu1 %v1559_v25, %s1580_s17 }
0x1308   :  { %1113 = vrot.lane.b32.xlu0 %v1561_v18, %s1580_s17 }
0x1379   :  { %v1108_v19 = vpop.permute.xlu1 %1107 }
0x137a   :  { %v1110_v20 = vmul.f32 %v1108_v19, %v1070_v7  ;;  %v1114_v23 = vpop.permute.xlu0 %1113 }
0x137b   :  { %v1116_v24 = vmul.f32 %v1114_v23, %v1078_v10 }
0x137c   :  { %1124 = vrot.lane.b32.xlu1 %v1110_v20, %s1579_s9 }
0x137d   :  { %1129 = vrot.lane.b32.xlu0 %v1116_v24, %s1580_s17 }
0x1380   :  { %1118 = vrot.lane.b32.xlu1 %v1093_v17, %s1581_s18 }
0x13ee   :  { %v1125_v26 = vpop.permute.xlu1 %1124 }
0x13ef   :  { %1127 = vst.msk [vmem:[#allocation2] sm:$0x3] %vm177_vm5, %v1125_v26  ;;  %1133 = vst.msk [vmem:[%s2009_s2 + $0xc] sm:$0x3] %vm177_vm5, %v1125_v26  ;;  %v1130_v27 = vpop.permute.xlu0 %1129 }
0x13f0   :  { %1132 = vst.msk [vmem:[#allocation2] sm:$0x3] %vm179_vm6, %v1130_v27  ;;  %1134 = vst.msk [vmem:[%s2009_s2 + $0x2] sm:$0x3] %vm179_vm6, %v1130_v27 }
0x13f2   :  { %v1119_v28 = vpop.permute.xlu1 %1118 }
0x13f3   :  { %1121 = vst.msk [vmem:[#allocation3] sm:$0x3] %vm177_vm5, %v1119_v28 }
0x13f4   :  { %1122 = vst.msk [vmem:[#allocation3] sm:$0x3] %vm179_vm6, %v1104_v22 }
0x13f7   :  { %v1135_v29 = vld [vmem:[#allocation2] sm:$0x3] }
0x13f8   :  { %1315 = vmatmul.mubr.msk.f32.vlgmr.msra.gmra.mrb[6].mxu1 %vm37_vm1, %v1135_v29 }
0x13fb   :  { %v1136_v50 = vld [vmem:[#allocation3] sm:$0x3] }
0x14cb   :  { %v1206_v33 = vpop.f32.mrb[6].mxu1 }
0x14cc   :  { %v1216_v34 = vadd.f32 %v1214_v31, %v1206_v33  ;;  %v1208_v35 = vpop.f32.mrb[7].mxu1 }
0x14cd   :  { %v1217_v36 = vadd.f32 %v1212_v32, %v1208_v35 }
0x14ce   :  { %v1316_v37 = vmul.f32 -1.442695, %v1216_v34 }
0x14cf   :  { %v1317_v38 = vmul.f32 -1.442695, %v1217_v36 }
0x14d0   :  { %1562 = vpow2.f32 %v1316_v37 }
0x14d1   :  { %1564 = vpow2.f32 %v1317_v38 }
0x14d2   :  { %1566 = vtanh.f32 %v1216_v34 }
0x14d3   :  { %1568 = vtanh.f32 %v1217_v36 }
0x14da   :  { %v1563_v39 = vpop.eup %1562 }
0x14db   :  { %v1565_v40 = vpop.eup %1564  ;;  %v1222_v41 = vadd.f32 1.0, %v1563_v39 }
0x14dc   :  { %v1230_v43 = vadd.f32 1.0, %v1565_v40  ;;  %v1567_v44 = vpop.eup %1566 }
0x14dd   :  { %1570 = vrcp.f32 %v1222_v41  ;;  %v1569_v45 = vpop.eup %1568 }
0x14de   :  { %1572 = vrcp.f32 %v1230_v43 }
0x14e7   :  { %v1571_v46 = vpop.eup %1570 }
0x14e8   :  { %v1573_v47 = vpop.eup %1572  ;;  %v1225_v48 = vsel %vm1703_vm4, %v1567_v44, %v1571_v46 }
0x14e9   :  { %1240 = vrot.lane.b32.xlu0 %v1225_v48, %s1580_s17  ;;  %v1233_v49 = vsel %vm1703_vm4, %v1569_v45, %v1573_v47 }
0x14ea   :  { %1251 = vrot.lane.b32.xlu1 %v1233_v49, %s1580_s17  ;;  %v1249_v57 = vmul.f32 %v1233_v49, %v1136_v50 }
0x14ed   :  { %1235 = vrot.lane.b32.xlu0 %v1136_v50, %s1579_s9 }
0x155b   :  { %v1241_v51 = vpop.permute.xlu0 %1240 }
0x155c   :  { %v1243_v52 = vmul.f32 %v1241_v51, %v1225_v48  ;;  %v1252_v53 = vpop.permute.xlu1 %1251 }
0x155d   :  { %v1254_v54 = vmul.f32 %v1252_v53, %v1233_v49 }
0x155e   :  { %1245 = vrot.lane.b32.xlu1 %v1243_v52, %s1579_s9 }
0x155f   :  { %1256 = vrot.lane.b32.xlu0 %v1254_v54, %s1579_s9  ;;  %v1236_v55 = vpop.permute.xlu0 %1235 }
0x1560   :  { %v1238_v56 = vmul.f32 %v1236_v55, %v1225_v48 }
0x15d0   :  { %v1246_v4 = vpop.permute.xlu1 %1245 }
0x15d1   :  { %v1248_v58 = vadd.f32 %v1246_v4, %v1238_v56  ;;  %v1257_v42 = vpop.permute.xlu0 %1256 }
0x15d2   :  { %v1259_v59 = vadd.f32 %v1257_v42, %v1249_v57 }
0x15d3   :  { %1574 = vtanh.f32 %v1248_v58 }
0x15d4   :  { %1576 = vtanh.f32 %v1259_v59 }
0x15dd   :  { %v1575_v60 = vpop.eup %1574 }
0x15de   :  { %v1577_v61 = vpop.eup %1576  ;;  %1262 = vrot.lane.b32.xlu1 %v1575_v60, %s1580_s17 }
0x15df   :  { %1268 = vrot.lane.b32.xlu0 %v1577_v61, %s1580_s17 }
0x15e2   :  { %1273 = vrot.lane.b32.xlu1 %v1248_v58, %s1581_s18 }
0x1650   :  { %v1263_v62 = vpop.permute.xlu1 %1262 }
0x1651   :  { %v1265_v63 = vmul.f32 %v1263_v62, %v1225_v48  ;;  %v1269_v0 = vpop.permute.xlu0 %1268 }
0x1652   :  { %v1271_v1 = vmul.f32 %v1269_v0, %v1233_v49 }
0x1653   :  { %1279 = vrot.lane.b32.xlu0 %v1265_v63, %s1579_s9 }
0x1654   :  { %1284 = vrot.lane.b32.xlu1 %v1271_v1, %s1580_s17  ;;  %v1274_v2 = vpop.permute.xlu1 %1273 }
0x1655   :  { %1276 = vst.msk [vmem:[#allocation3] sm:$0x3] %vm177_vm5, %v1274_v2 }
0x1656   :  { %1277 = vst.msk [vmem:[#allocation3] sm:$0x3] %vm179_vm6, %v1259_v59 }
0x16c5   :  { %v1280_v5 = vpop.permute.xlu0 %1279 }
0x16c6   :  { %1282 = vst.msk [vmem:[#allocation2] sm:$0x3] %vm177_vm5, %v1280_v5  ;;  %1288 = vst.msk [vmem:[%s2009_s2 + $0xe] sm:$0x3] %vm177_vm5, %v1280_v5  ;;  %v1285_v6 = vpop.permute.xlu1 %1284 }
0x16c7   :  { %1287 = vst.msk [vmem:[#allocation2] sm:$0x3] %vm179_vm6, %v1285_v6  ;;  %1289 = vst.msk [vmem:[%s2009_s2] sm:$0x3] %vm179_vm6, %v1285_v6 }

// kernel: forward.7
= control target key start
LH: loop header
LB: loop body
LE: loop exit
PB: predicated region body
PF: predicated region fallthrough
CT: control target
= control target key end

     0   :  { %vm17_vm0 = vcmask 517120   ;;  %v1733_v3 = vmov 0.0   ;;  %s1734_s17 = smov 32   ;;  %vm43_vm1 = vcmask 523264   ;;  %v36_v37 = vlaneseq  ;;  %s1735_s25 = smov 64   ;;  %s2159_s1 = inlined_call_operand.vmem [shape: f32[64,256], index: 1, kind: input, shape index: {}]   ;;  %s2160_s0 = inlined_call_operand.vmem [shape: f32[16,256], index: 0, kind: input, shape index: {}]   ;;  %s2161_s2 = inlined_call_operand.vmem [shape: f32[64,2], index: 2, kind: input, shape index: {}]   ;;  %s2162_s3 = inlined_call_operand.vmem [shape: f32[1,2], index: 3, kind: input, shape index: {}]   ;;  %s2163_s4 = inlined_call_operand.vmem [shape: f32[16,2], index: 4, kind: output, shape index: {}]  }
   0x1   :  { %v21_v0 = vld [vmem:[%s2159_s1 + $0x8] sm:$0xff]  ;;  %v23_v1 = vld [vmem:[%s2159_s1 + $0x18] sm:$0xff]  ;;  %v20_v2 = vld [vmem:[%s2159_s1] sm:$0xff]  ;;  %18 = vst.msk [vmem:[#allocation3] sm:$0x3] %vm17_vm0, %v1733_v3  ;;  %111 = vmatprep.mubr.f32.mxu0 %v1733_v3  ;;  %268 = vmatprep.mubr.f32.mxu1 %v1733_v3  ;;  %s1736_s26 = smov 96  }
   0x2   :  { %19 = vst.msk [vmem:[#allocation4] sm:$0x3] %vm17_vm0, %v1733_v3  ;;  %v1775_v4 = vpack.c.bf16 %v23_v1, %v21_v0  ;;  %v22_v5 = vld [vmem:[%s2159_s1 + $0x10] sm:$0xff]  ;;  %v25_v6 = vld [vmem:[%s2159_s1 + $0x28] sm:$0xff]  ;;  %v27_v7 = vld [vmem:[%s2159_s1 + $0x38] sm:$0xff]  ;;  %v37_v41 = vand.u32 127, %v36_v37 }
   0x3   :  { %v1786_v8 = vpack.c.bf16 %v22_v5, %v20_v2  ;;  %v1788_v9 = vpack.c.bf16 %v27_v7, %v25_v6  ;;  %v24_v10 = vld [vmem:[%s2159_s1 + $0x20] sm:$0xff]  ;;  %v26_v11 = vld [vmem:[%s2159_s1 + $0x30] sm:$0xff]  ;;  %v29_v12 = vld [vmem:[%s2159_s1 + $0x48] sm:$0xff]  ;;  %vm183_vm5 = vcmask 254976   ;;  %vm185_vm6 = vcmask 517376  }
   0x4   :  { %1458 = vmatprep.subr.bf16.mxu0 %v1775_v4  ;;  %v31_v13 = vld [vmem:[%s2159_s1 + $0x58] sm:$0xff]  ;;  %1474 = vmatprep.subr.bf16.mxu1 %v1775_v4  ;;  %v1805_v14 = vpack.c.bf16 %v26_v11, %v24_v10  ;;  %v28_v16 = vld [vmem:[%s2159_s1 + $0x40] sm:$0xff]  ;;  %v30_v17 = vld [vmem:[%s2159_s1 + $0x50] sm:$0xff]  ;;  %vm38_vm2 = vcmp.ge.s32.totalorder %v37_v41, 64  ;;  %vm39_vm3 = vcmp.lt.s32.totalorder %v37_v41, 96  ;;  %vm1394_vm7 = vcmask 15360  }
   0x5   :  { %1460 = vmatpush1.bf16.msra.mxu0 %v1786_v8  ;;  %1476 = vmatpush1.bf16.msra.mxu1 %v1786_v8  ;;  %v1809_v15 = vpack.c.bf16 %v31_v13, %v29_v12  ;;  %v33_v18 = vld [vmem:[%s2159_s1 + $0x68] sm:$0xff]  ;;  %v35_v19 = vld [vmem:[%s2159_s1 + $0x78] sm:$0xff]  ;;  %v1827_v21 = vpack.c.bf16 %v30_v17, %v28_v16  ;;  %v32_v23 = vld [vmem:[%s2159_s1 + $0x60] sm:$0xff] }
   0x6   :  { %1462 = vmatprep.subr.bf16.mxu0 %v1788_v9  ;;  %1478 = vmatprep.subr.bf16.mxu1 %v1788_v9  ;;  %v1832_v22 = vpack.c.bf16 %v35_v19, %v33_v18  ;;  %v34_v24 = vld [vmem:[%s2159_s1 + $0x70] sm:$0xff]  ;;  %v119_v27 = vld [vmem:[%s2160_s0 + $0x18] sm:$0xc0]  ;;  %v118_v28 = vld [vmem:[%s2160_s0] sm:$0x3] }
   0x7   :  { %v1843_v25 = vpack.c.bf16 %v34_v24, %v32_v23  ;;  %v122_v29 = vrot.slane %v119_v27, 6  ;;  %vm1868_vm4 = vmand %vm38_vm2, %vm39_vm3  ;;  %v275_v10 = vld [vmem:[%s2160_s0] sm:$0xc]  ;;  %v276_v11 = vld [vmem:[%s2160_s0 + $0x18] sm:$0x30] }
   0x8   :  { %v41_v26 = vld [vmem:[#allocation3] sm:$0x3]  ;;  %v278_v12 = vrot.slane %v275_v10, 2  ;;  %v282_v13 = vrot.slane %v276_v11, 4 }
   0x9   :  { %v1824_v20 = vld [vmem:[#allocation4] sm:$0x3]  ;;  %1464 = vmatpush1.bf16.msra.mxu0 %v1805_v14  ;;  %1480 = vmatpush1.bf16.msra.mxu1 %v1805_v14 }
   0xa   :  { %142 = vrot.lane.b32.xlu1 %v1824_v20, %s1734_s17  ;;  %1466 = vmatprep.subr.bf16.mxu0 %v1809_v15 }
   0xb   :  { %1482 = vmatprep.subr.bf16.mxu1 %v1809_v15 }
   0xd   :  { %1468 = vmatpush1.bf16.msra.mxu0 %v1827_v21  ;;  %1484 = vmatpush1.bf16.msra.mxu1 %v1827_v21 }
   0xe   :  { %1470 = vmatprep.subr.bf16.mxu0 %v1832_v22  ;;  %1486 = vmatprep.subr.bf16.mxu1 %v1832_v22 }
  0x11   :  { %1472 = vmatpush1.bf16.msra.mxu0 %v1843_v25  ;;  %1488 = vmatpush1.bf16.msra.mxu1 %v1843_v25 }
  0x12   :  { %1490 = vmatprep.subr.bf16.mxu0 %v1775_v4  ;;  %1506 = vmatprep.subr.bf16.mxu1 %v1775_v4 }
  0x14   :  { %1401 = vmatmul.mubr.msk.f32.vlgmr.msra.gmra.mrb[0].mxu0 %vm43_vm1, %v41_v26 }
  0x15   :  { %1492 = vmatpush1.bf16.msra.mxu0 %v1786_v8  ;;  %426 = vmatprep.mubr.f32.mxu0 %v1733_v3 }
  0x16   :  { %1494 = vmatprep.subr.bf16.mxu0 %v1788_v9 }
  0x19   :  { %1496 = vmatpush1.bf16.msra.mxu0 %v1805_v14 }
  0x1a   :  { %1498 = vmatprep.subr.bf16.mxu0 %v1809_v15 }
  0x1d   :  { %1500 = vmatpush1.bf16.msra.mxu0 %v1827_v21 }
  0x1e   :  { %1502 = vmatprep.subr.bf16.mxu0 %v1832_v22 }
  0x21   :  { %1504 = vmatpush1.bf16.msra.mxu0 %v1843_v25 }
  0x22   :  { %1522 = vmatprep.subr.bf16.mxu0 %v1775_v4 }
  0x7c   :  { %v143_v53 = vpop.permute.xlu1 %142 }
  0xe7   :  { %v113_v30 = vpop.f32.mrb[0].mxu0 }
  0xe8   :  { %v120_v31 = vadd.f32 %v118_v28, %v113_v30  ;;  %v115_v32 = vpop.f32.mrb[1].mxu0 }
  0xe9   :  { %v124_v33 = vadd.f32 %v122_v29, %v115_v32 }
  0xea   :  { %v1402_v34 = vmul.f32 -1.442695, %v120_v31 }
  0xeb   :  { %v1403_v35 = vmul.f32 -1.442695, %v124_v33 }
  0xec   :  { %1605 = vpow2.f32 %v1402_v34 }
  0xed   :  { %1607 = vpow2.f32 %v1403_v35 }
  0xee   :  { %1609 = vtanh.f32 %v120_v31 }
  0xf6   :  { %v1606_v36 = vpop.eup %1605 }
  0xf7   :  { %v1608_v38 = vpop.eup %1607  ;;  %v129_v39 = vadd.f32 1.0, %v1606_v36 }
  0xf8   :  { %v137_v40 = vadd.f32 1.0, %v1608_v38  ;;  %v1610_v43 = vpop.eup %1609 }
  0xf9   :  { %1611 = vrcp.f32 %v129_v39 }
  0xfa   :  { %1613 = vrcp.f32 %v137_v40 }
  0xfb   :  { %1615 = vtanh.f32 %v124_v33 }
 0x103   :  { %v1612_v44 = vpop.eup %1611 }
 0x104   :  { %v132_v45 = vsel %vm1868_vm4, %v1610_v43, %v1612_v44  ;;  %v1614_v46 = vpop.eup %1613 }
 0x105   :  { %147 = vrot.lane.b32.xlu0 %v132_v45, %s1735_s25  ;;  %v1616_v47 = vpop.eup %1615  ;;  %v145_v54 = vmul.f32 %v143_v53, %v132_v45 }
 0x106   :  { %v140_v48 = vsel %vm1868_vm4, %v1616_v47, %v1614_v46 }
 0x107   :  { %v156_v57 = vmul.f32 %v140_v48, %v1824_v20 }
 0x109   :  { %158 = vrot.lane.b32.xlu0 %v140_v48, %s1735_s25 }
 0x177   :  { %v148_v49 = vpop.permute.xlu0 %147 }
 0x178   :  { %v150_v50 = vmul.f32 %v148_v49, %v132_v45 }
 0x17a   :  { %152 = vrot.lane.b32.xlu1 %v150_v50, %s1734_s17 }
 0x17b   :  { %v159_v51 = vpop.permute.xlu0 %158 }
 0x17c   :  { %v161_v52 = vmul.f32 %v159_v51, %v140_v48 }
 0x17e   :  { %163 = vrot.lane.b32.xlu0 %v161_v52, %s1734_s17 }
 0x1ec   :  { %v153_v55 = vpop.permute.xlu1 %152 }
 0x1ed   :  { %v155_v56 = vadd.f32 %v153_v55, %v145_v54 }
 0x1ef   :  { %1617 = vtanh.f32 %v155_v56 }
 0x1f0   :  { %v164_v58 = vpop.permute.xlu0 %163 }
 0x1f1   :  { %v166_v59 = vadd.f32 %v164_v58, %v156_v57  ;;  %v433_v58 = vld [vmem:[%s2160_s0] sm:$0x30] }
 0x1f3   :  { %1619 = vtanh.f32 %v166_v59 }
 0x1f9   :  { %v1618_v60 = vpop.eup %1617 }
 0x1fa   :  { %169 = vrot.lane.b32.xlu1 %v1618_v60, %s1735_s25  ;;  %v436_v60 = vrot.slane %v433_v58, 4 }
 0x1fd   :  { %v1620_v61 = vpop.eup %1619 }
 0x1fe   :  { %175 = vrot.lane.b32.xlu0 %v1620_v61, %s1735_s25 }
 0x26c   :  { %v170_v62 = vpop.permute.xlu1 %169 }
 0x26d   :  { %v172_v63 = vmul.f32 %v170_v62, %v132_v45 }
 0x26f   :  { %188 = vrot.lane.b32.xlu1 %v172_v63, %s1734_s17 }
 0x270   :  { %v176_v0 = vpop.permute.xlu0 %175 }
 0x271   :  { %v178_v1 = vmul.f32 %v176_v0, %v140_v48 }
 0x273   :  { %193 = vrot.lane.b32.xlu0 %v178_v1, %s1735_s25  ;;  %180 = vrot.lane.b32.xlu1 %v155_v56, %s1736_s26 }
 0x2e1   :  { %v189_v2 = vpop.permute.xlu1 %188 }
 0x2e2   :  { %191 = vst.msk [vmem:[#allocation3] sm:$0x3] %vm183_vm5, %v189_v2  ;;  %197 = vst.msk [vmem:[#allocation2] sm:$0x3] %vm183_vm5, %v189_v2 }
 0x2e5   :  { %v194_v5 = vpop.permute.xlu0 %193  ;;  %v181_v6 = vpop.permute.xlu1 %180 }
 0x2e6   :  { %196 = vst.msk [vmem:[#allocation3] sm:$0x3] %vm185_vm6, %v194_v5  ;;  %198 = vst.msk [vmem:[#allocation2 + $0xe] sm:$0x3] %vm185_vm6, %v194_v5 }
 0x2e7   :  { %184 = vst.msk [vmem:[#allocation4] sm:$0x3] %vm183_vm5, %v181_v6 }
 0x2e8   :  { %186 = vst.msk [vmem:[#allocation4] sm:$0x3] %vm185_vm6, %v166_v59  ;;  %v434_v59 = vld [vmem:[%s2160_s0 + $0x18] sm:$0xc] }
 0x2e9   :  { %v440_v61 = vrot.slane %v434_v59, 2 }
 0x2ed   :  { %v199_v7 = vld [vmem:[#allocation3] sm:$0x3] }
 0x2ee   :  { %1404 = vmatmul.mubr.msk.f32.vlgmr.msra.gmra.mrb[0].mxu1 %vm43_vm1, %v199_v7 }
 0x2ef   :  { %1508 = vmatpush1.bf16.msra.mxu1 %v1786_v8  ;;  %584 = vmatprep.mubr.f32.mxu1 %v1733_v3  ;;  %v200_v35 = vld [vmem:[#allocation4] sm:$0x3] }
 0x2f0   :  { %1510 = vmatprep.subr.bf16.mxu1 %v1788_v9 }
 0x2f3   :  { %1512 = vmatpush1.bf16.msra.mxu1 %v1805_v14 }
 0x2f4   :  { %1514 = vmatprep.subr.bf16.mxu1 %v1809_v15 }
 0x2f7   :  { %1516 = vmatpush1.bf16.msra.mxu1 %v1827_v21 }
 0x2f8   :  { %1518 = vmatprep.subr.bf16.mxu1 %v1832_v22 }
 0x2fb   :  { %1520 = vmatpush1.bf16.msra.mxu1 %v1843_v25 }
 0x2fc   :  { %1538 = vmatprep.subr.bf16.mxu1 %v1775_v4 }
 0x3c1   :  { %v270_v16 = vpop.f32.mrb[0].mxu1 }
 0x3c2   :  { %v280_v17 = vadd.f32 %v278_v12, %v270_v16  ;;  %v272_v18 = vpop.f32.mrb[1].mxu1 }
 0x3c3   :  { %v284_v19 = vadd.f32 %v282_v13, %v272_v18 }
 0x3c4   :  { %v1405_v20 = vmul.f32 -1.442695, %v280_v17 }
 0x3c5   :  { %v1406_v23 = vmul.f32 -1.442695, %v284_v19 }
 0x3c6   :  { %1621 = vpow2.f32 %v1405_v20 }
 0x3c7   :  { %1623 = vpow2.f32 %v1406_v23 }
 0x3c8   :  { %1625 = vtanh.f32 %v280_v17 }
 0x3c9   :  { %1627 = vtanh.f32 %v284_v19 }
 0x3d0   :  { %v1622_v24 = vpop.eup %1621 }
 0x3d1   :  { %v1624_v26 = vpop.eup %1623  ;;  %v289_v27 = vadd.f32 1.0, %v1622_v24 }
 0x3d2   :  { %v297_v28 = vadd.f32 1.0, %v1624_v26  ;;  %v1626_v29 = vpop.eup %1625 }
 0x3d3   :  { %1629 = vrcp.f32 %v289_v27  ;;  %v1628_v30 = vpop.eup %1627 }
 0x3d4   :  { %1631 = vrcp.f32 %v297_v28 }
 0x3dd   :  { %v1630_v31 = vpop.eup %1629 }
 0x3de   :  { %v1632_v32 = vpop.eup %1631  ;;  %v292_v33 = vsel %vm1868_vm4, %v1626_v29, %v1630_v31 }
 0x3df   :  { %307 = vrot.lane.b32.xlu0 %v292_v33, %s1735_s25  ;;  %v300_v34 = vsel %vm1868_vm4, %v1628_v30, %v1632_v32 }
 0x3e0   :  { %318 = vrot.lane.b32.xlu1 %v300_v34, %s1735_s25  ;;  %v316_v44 = vmul.f32 %v300_v34, %v200_v35 }
 0x3e3   :  { %302 = vrot.lane.b32.xlu0 %v200_v35, %s1734_s17 }
 0x451   :  { %v308_v36 = vpop.permute.xlu0 %307 }
 0x452   :  { %v310_v37 = vmul.f32 %v308_v36, %v292_v33  ;;  %v319_v38 = vpop.permute.xlu1 %318 }
 0x453   :  { %v321_v39 = vmul.f32 %v319_v38, %v300_v34 }
 0x454   :  { %312 = vrot.lane.b32.xlu1 %v310_v37, %s1734_s17 }
 0x455   :  { %323 = vrot.lane.b32.xlu0 %v321_v39, %s1734_s17  ;;  %v303_v40 = vpop.permute.xlu0 %302 }
 0x456   :  { %v305_v41 = vmul.f32 %v303_v40, %v292_v33 }
 0x4c6   :  { %v313_v43 = vpop.permute.xlu1 %312 }
 0x4c7   :  { %v315_v45 = vadd.f32 %v313_v43, %v305_v41  ;;  %v324_v46 = vpop.permute.xlu0 %323 }
 0x4c8   :  { %v326_v47 = vadd.f32 %v324_v46, %v316_v44  ;;  %v591_v46 = vld [vmem:[%s2160_s0] sm:$0xc0] }
 0x4c9   :  { %1633 = vtanh.f32 %v315_v45 }
 0x4ca   :  { %1635 = vtanh.f32 %v326_v47 }
 0x4d3   :  { %v1634_v48 = vpop.eup %1633 }
 0x4d4   :  { %v1636_v49 = vpop.eup %1635  ;;  %329 = vrot.lane.b32.xlu1 %v1634_v48, %s1735_s25  ;;  %v592_v48 = vld [vmem:[%s2160_s0 + $0x18] sm:$0x3] }
 0x4d5   :  { %335 = vrot.lane.b32.xlu0 %v1636_v49, %s1735_s25 }
 0x546   :  { %v330_v50 = vpop.permute.xlu1 %329 }
 0x547   :  { %v332_v51 = vmul.f32 %v330_v50, %v292_v33  ;;  %v336_v52 = vpop.permute.xlu0 %335 }
 0x548   :  { %v338_v53 = vmul.f32 %v336_v52, %v300_v34 }
 0x549   :  { %346 = vrot.lane.b32.xlu1 %v332_v51, %s1734_s17 }
 0x54a   :  { %351 = vrot.lane.b32.xlu0 %v338_v53, %s1735_s25 }
 0x54d   :  { %340 = vrot.lane.b32.xlu1 %v315_v45, %s1736_s26 }
 0x5bb   :  { %v347_v54 = vpop.permute.xlu1 %346 }
 0x5bc   :  { %349 = vst.msk [vmem:[#allocation3] sm:$0x3] %vm183_vm5, %v347_v54  ;;  %355 = vst.msk [vmem:[#allocation2 + $0x2] sm:$0x3] %vm183_vm5, %v347_v54  ;;  %v352_v55 = vpop.permute.xlu0 %351 }
 0x5bd   :  { %354 = vst.msk [vmem:[#allocation3] sm:$0x3] %vm185_vm6, %v352_v55  ;;  %356 = vst.msk [vmem:[#allocation2 + $0xc] sm:$0x3] %vm185_vm6, %v352_v55 }
 0x5bf   :  { %v341_v56 = vpop.permute.xlu1 %340 }
 0x5c0   :  { %343 = vst.msk [vmem:[#allocation4] sm:$0x3] %vm183_vm5, %v341_v56 }
 0x5c1   :  { %344 = vst.msk [vmem:[#allocation4] sm:$0x3] %vm185_vm6, %v326_v47  ;;  %v594_v47 = vrot.slane %v591_v46, 6 }
 0x5c4   :  { %v357_v57 = vld [vmem:[#allocation3] sm:$0x3] }
 0x5c5   :  { %1407 = vmatmul.mubr.msk.f32.vlgmr.msra.gmra.mrb[2].mxu0 %vm43_vm1, %v357_v57 }
 0x5c6   :  { %1524 = vmatpush1.bf16.msra.mxu0 %v1786_v8  ;;  %739 = vmatprep.mubr.f32.mxu0 %v1733_v3 }
 0x5c7   :  { %1526 = vmatprep.subr.bf16.mxu0 %v1788_v9 }
 0x5c8   :  { %v358_v20 = vld [vmem:[#allocation4] sm:$0x3] }
 0x5ca   :  { %1528 = vmatpush1.bf16.msra.mxu0 %v1805_v14 }
 0x5cb   :  { %1530 = vmatprep.subr.bf16.mxu0 %v1809_v15 }
 0x5ce   :  { %1532 = vmatpush1.bf16.msra.mxu0 %v1827_v21 }
 0x5cf   :  { %1534 = vmatprep.subr.bf16.mxu0 %v1832_v22 }
 0x5d2   :  { %1536 = vmatpush1.bf16.msra.mxu0 %v1843_v25 }
 0x5d3   :  { %1554 = vmatprep.subr.bf16.mxu0 %v1775_v4 }
 0x698   :  { %v428_v62 = vpop.f32.mrb[2].mxu0 }
 0x699   :  { %v438_v63 = vadd.f32 %v436_v60, %v428_v62  ;;  %v430_v0 = vpop.f32.mrb[3].mxu0 }
 0x69a   :  { %v442_v1 = vadd.f32 %v440_v61, %v430_v0 }
 0x69b   :  { %v1408_v2 = vmul.f32 -1.442695, %v438_v63 }
 0x69c   :  { %v1409_v5 = vmul.f32 -1.442695, %v442_v1 }
 0x69d   :  { %1637 = vpow2.f32 %v1408_v2 }
 0x69e   :  { %1639 = vpow2.f32 %v1409_v5 }
 0x69f   :  { %1641 = vtanh.f32 %v438_v63 }
 0x6a0   :  { %1643 = vtanh.f32 %v442_v1 }
 0x6a7   :  { %v1638_v6 = vpop.eup %1637 }
 0x6a8   :  { %v1640_v7 = vpop.eup %1639  ;;  %v447_v10 = vadd.f32 1.0, %v1638_v6 }
 0x6a9   :  { %v455_v11 = vadd.f32 1.0, %v1640_v7  ;;  %v1642_v12 = vpop.eup %1641 }
 0x6aa   :  { %1645 = vrcp.f32 %v447_v10  ;;  %v1644_v13 = vpop.eup %1643 }
 0x6ab   :  { %1647 = vrcp.f32 %v455_v11 }
 0x6b4   :  { %v1646_v16 = vpop.eup %1645 }
 0x6b5   :  { %v1648_v17 = vpop.eup %1647  ;;  %v450_v18 = vsel %vm1868_vm4, %v1642_v12, %v1646_v16 }
 0x6b6   :  { %465 = vrot.lane.b32.xlu0 %v450_v18, %s1735_s25  ;;  %v458_v19 = vsel %vm1868_vm4, %v1644_v13, %v1648_v17 }
 0x6b7   :  { %476 = vrot.lane.b32.xlu1 %v458_v19, %s1735_s25  ;;  %v474_v31 = vmul.f32 %v458_v19, %v358_v20 }
 0x6ba   :  { %460 = vrot.lane.b32.xlu0 %v358_v20, %s1734_s17 }
 0x728   :  { %v466_v23 = vpop.permute.xlu0 %465 }
 0x729   :  { %v468_v24 = vmul.f32 %v466_v23, %v450_v18  ;;  %v477_v26 = vpop.permute.xlu1 %476 }
 0x72a   :  { %v479_v27 = vmul.f32 %v477_v26, %v458_v19 }
 0x72b   :  { %470 = vrot.lane.b32.xlu1 %v468_v24, %s1734_s17 }
 0x72c   :  { %481 = vrot.lane.b32.xlu0 %v479_v27, %s1734_s17  ;;  %v461_v28 = vpop.permute.xlu0 %460 }
 0x72d   :  { %v463_v29 = vmul.f32 %v461_v28, %v450_v18 }
 0x79d   :  { %v471_v30 = vpop.permute.xlu1 %470 }
 0x79e   :  { %v473_v32 = vadd.f32 %v471_v30, %v463_v29  ;;  %v482_v33 = vpop.permute.xlu0 %481 }
 0x79f   :  { %v484_v34 = vadd.f32 %v482_v33, %v474_v31  ;;  %v747_v31 = vld [vmem:[%s2160_s0 + $0x8] sm:$0xc0] }
 0x7a0   :  { %1649 = vtanh.f32 %v473_v32  ;;  %v750_v33 = vrot.slane %v747_v31, 6 }
 0x7a1   :  { %1651 = vtanh.f32 %v484_v34 }
 0x7aa   :  { %v1650_v35 = vpop.eup %1649 }
 0x7ab   :  { %v1652_v36 = vpop.eup %1651  ;;  %487 = vrot.lane.b32.xlu1 %v1650_v35, %s1735_s25 }
 0x7ac   :  { %493 = vrot.lane.b32.xlu0 %v1652_v36, %s1735_s25 }
 0x81d   :  { %v488_v37 = vpop.permute.xlu1 %487 }
 0x81e   :  { %v490_v38 = vmul.f32 %v488_v37, %v450_v18  ;;  %v494_v39 = vpop.permute.xlu0 %493 }
 0x81f   :  { %v496_v40 = vmul.f32 %v494_v39, %v458_v19 }
 0x820   :  { %504 = vrot.lane.b32.xlu1 %v490_v38, %s1734_s17 }
 0x821   :  { %509 = vrot.lane.b32.xlu0 %v496_v40, %s1735_s25 }
 0x824   :  { %498 = vrot.lane.b32.xlu1 %v473_v32, %s1736_s26  ;;  %v746_v32 = vld [vmem:[%s2160_s0 + $0x10] sm:$0x3] }
 0x892   :  { %v505_v41 = vpop.permute.xlu1 %504 }
 0x893   :  { %507 = vst.msk [vmem:[#allocation3] sm:$0x3] %vm183_vm5, %v505_v41  ;;  %513 = vst.msk [vmem:[#allocation2 + $0x4] sm:$0x3] %vm183_vm5, %v505_v41  ;;  %v510_v43 = vpop.permute.xlu0 %509 }
 0x894   :  { %512 = vst.msk [vmem:[#allocation3] sm:$0x3] %vm185_vm6, %v510_v43  ;;  %514 = vst.msk [vmem:[#allocation2 + $0xa] sm:$0x3] %vm185_vm6, %v510_v43 }
 0x896   :  { %v499_v44 = vpop.permute.xlu1 %498 }
 0x897   :  { %501 = vst.msk [vmem:[#allocation4] sm:$0x3] %vm183_vm5, %v499_v44 }
 0x898   :  { %502 = vst.msk [vmem:[#allocation4] sm:$0x3] %vm185_vm6, %v484_v34 }
 0x89b   :  { %v515_v45 = vld [vmem:[#allocation3] sm:$0x3] }
 0x89c   :  { %1410 = vmatmul.mubr.msk.f32.vlgmr.msra.gmra.mrb[2].mxu1 %vm43_vm1, %v515_v45 }
 0x89d   :  { %1540 = vmatpush1.bf16.msra.mxu1 %v1786_v8  ;;  %894 = vmatprep.mubr.f32.mxu1 %v1733_v3 }
 0x89e   :  { %1542 = vmatprep.subr.bf16.mxu1 %v1788_v9 }
 0x89f   :  { %v516_v0 = vld [vmem:[#allocation4] sm:$0x3] }
 0x8a1   :  { %1544 = vmatpush1.bf16.msra.mxu1 %v1805_v14 }
 0x8a2   :  { %1546 = vmatprep.subr.bf16.mxu1 %v1809_v15 }
 0x8a5   :  { %1548 = vmatpush1.bf16.msra.mxu1 %v1827_v21 }
 0x8a6   :  { %1550 = vmatprep.subr.bf16.mxu1 %v1832_v22 }
 0x8a9   :  { %1552 = vmatpush1.bf16.msra.mxu1 %v1843_v25 }
 0x8aa   :  { %1570 = vmatprep.subr.bf16.mxu1 %v1775_v4 }
 0x96f   :  { %v586_v49 = vpop.f32.mrb[2].mxu1 }
 0x970   :  { %v596_v50 = vadd.f32 %v594_v47, %v586_v49  ;;  %v588_v51 = vpop.f32.mrb[3].mxu1 }
 0x971   :  { %v597_v52 = vadd.f32 %v592_v48, %v588_v51 }
 0x972   :  { %v1411_v53 = vmul.f32 -1.442695, %v596_v50 }
 0x973   :  { %v1412_v54 = vmul.f32 -1.442695, %v597_v52 }
 0x974   :  { %1653 = vpow2.f32 %v1411_v53 }
 0x975   :  { %1655 = vpow2.f32 %v1412_v54 }
 0x976   :  { %1657 = vtanh.f32 %v596_v50 }
 0x977   :  { %1659 = vtanh.f32 %v597_v52 }
 0x97e   :  { %v1654_v55 = vpop.eup %1653 }
 0x97f   :  { %v1656_v56 = vpop.eup %1655  ;;  %v602_v4 = vadd.f32 1.0, %v1654_v55 }
 0x980   :  { %v610_v57 = vadd.f32 1.0, %v1656_v56  ;;  %v1658_v58 = vpop.eup %1657 }
 0x981   :  { %1661 = vrcp.f32 %v602_v4  ;;  %v1660_v59 = vpop.eup %1659 }
 0x982   :  { %1663 = vrcp.f32 %v610_v57 }
 0x98b   :  { %v1662_v60 = vpop.eup %1661 }
 0x98c   :  { %v1664_v61 = vpop.eup %1663  ;;  %v605_v62 = vsel %vm1868_vm4, %v1658_v58, %v1662_v60 }
 0x98d   :  { %620 = vrot.lane.b32.xlu0 %v605_v62, %s1735_s25  ;;  %v613_v63 = vsel %vm1868_vm4, %v1660_v59, %v1664_v61 }
 0x98e   :  { %631 = vrot.lane.b32.xlu1 %v613_v63, %s1735_s25  ;;  %v629_v12 = vmul.f32 %v613_v63, %v516_v0 }
 0x991   :  { %615 = vrot.lane.b32.xlu0 %v516_v0, %s1734_s17 }
 0x9ff   :  { %v621_v1 = vpop.permute.xlu0 %620 }
 0xa00   :  { %v623_v2 = vmul.f32 %v621_v1, %v605_v62  ;;  %v632_v5 = vpop.permute.xlu1 %631 }
 0xa01   :  { %v634_v6 = vmul.f32 %v632_v5, %v613_v63 }
 0xa02   :  { %625 = vrot.lane.b32.xlu1 %v623_v2, %s1734_s17 }
 0xa03   :  { %636 = vrot.lane.b32.xlu0 %v634_v6, %s1734_s17  ;;  %v616_v7 = vpop.permute.xlu0 %615 }
 0xa04   :  { %v618_v10 = vmul.f32 %v616_v7, %v605_v62 }
 0xa74   :  { %v626_v11 = vpop.permute.xlu1 %625 }
 0xa75   :  { %v628_v13 = vadd.f32 %v626_v11, %v618_v10  ;;  %v637_v16 = vpop.permute.xlu0 %636 }
 0xa76   :  { %v639_v17 = vadd.f32 %v637_v16, %v629_v12  ;;  %v901_v12 = vld [vmem:[%s2160_s0 + $0x10] sm:$0xc] }
 0xa77   :  { %1665 = vtanh.f32 %v628_v13 }
 0xa78   :  { %1667 = vtanh.f32 %v639_v17 }
 0xa81   :  { %v1666_v18 = vpop.eup %1665 }
 0xa82   :  { %v1668_v19 = vpop.eup %1667  ;;  %642 = vrot.lane.b32.xlu1 %v1666_v18, %s1735_s25 }
 0xa83   :  { %648 = vrot.lane.b32.xlu0 %v1668_v19, %s1735_s25 }
 0xaf4   :  { %v643_v20 = vpop.permute.xlu1 %642 }
 0xaf5   :  { %v645_v23 = vmul.f32 %v643_v20, %v605_v62  ;;  %v649_v24 = vpop.permute.xlu0 %648 }
 0xaf6   :  { %v651_v26 = vmul.f32 %v649_v24, %v613_v63 }
 0xaf7   :  { %659 = vrot.lane.b32.xlu1 %v645_v23, %s1734_s17 }
 0xaf8   :  { %664 = vrot.lane.b32.xlu0 %v651_v26, %s1735_s25 }
 0xafb   :  { %653 = vrot.lane.b32.xlu1 %v628_v13, %s1736_s26 }
 0xb69   :  { %v660_v27 = vpop.permute.xlu1 %659 }
 0xb6a   :  { %662 = vst.msk [vmem:[#allocation3] sm:$0x3] %vm183_vm5, %v660_v27  ;;  %668 = vst.msk [vmem:[#allocation2 + $0x6] sm:$0x3] %vm183_vm5, %v660_v27  ;;  %v665_v28 = vpop.permute.xlu0 %664 }
 0xb6b   :  { %667 = vst.msk [vmem:[#allocation3] sm:$0x3] %vm185_vm6, %v665_v28  ;;  %669 = vst.msk [vmem:[#allocation2 + $0x8] sm:$0x3] %vm185_vm6, %v665_v28 }
 0xb6d   :  { %v654_v29 = vpop.permute.xlu1 %653 }
 0xb6e   :  { %656 = vst.msk [vmem:[#allocation4] sm:$0x3] %vm183_vm5, %v654_v29 }
 0xb6f   :  { %657 = vst.msk [vmem:[#allocation4] sm:$0x3] %vm185_vm6, %v639_v17 }
 0xb72   :  { %v670_v30 = vld [vmem:[#allocation3] sm:$0x3] }
 0xb73   :  { %1413 = vmatmul.mubr.msk.f32.vlgmr.msra.gmra.mrb[4].mxu0 %vm43_vm1, %v670_v30 }
 0xb74   :  { %1556 = vmatpush1.bf16.msra.mxu0 %v1786_v8  ;;  %1052 = vmatprep.mubr.f32.mxu0 %v1733_v3 }
 0xb75   :  { %1558 = vmatprep.subr.bf16.mxu0 %v1788_v9 }
 0xb76   :  { %v671_v51 = vld [vmem:[#allocation4] sm:$0x3] }
 0xb78   :  { %1560 = vmatpush1.bf16.msra.mxu0 %v1805_v14 }
 0xb79   :  { %1562 = vmatprep.subr.bf16.mxu0 %v1809_v15 }
 0xb7c   :  { %1564 = vmatpush1.bf16.msra.mxu0 %v1827_v21 }
 0xb7d   :  { %1566 = vmatprep.subr.bf16.mxu0 %v1832_v22 }
 0xb80   :  { %1568 = vmatpush1.bf16.msra.mxu0 %v1843_v25 }
 0xc46   :  { %v741_v34 = vpop.f32.mrb[4].mxu0 }
 0xc47   :  { %v748_v35 = vadd.f32 %v746_v32, %v741_v34  ;;  %v743_v36 = vpop.f32.mrb[5].mxu0 }
 0xc48   :  { %v752_v37 = vadd.f32 %v750_v33, %v743_v36 }
 0xc49   :  { %v1414_v38 = vmul.f32 -1.442695, %v748_v35 }
 0xc4a   :  { %v1415_v39 = vmul.f32 -1.442695, %v752_v37 }
 0xc4b   :  { %1669 = vpow2.f32 %v1414_v38 }
 0xc4c   :  { %1671 = vpow2.f32 %v1415_v39 }
 0xc4d   :  { %1673 = vtanh.f32 %v748_v35 }
 0xc4e   :  { %1675 = vtanh.f32 %v752_v37 }
 0xc55   :  { %v1670_v40 = vpop.eup %1669 }
 0xc56   :  { %v1672_v41 = vpop.eup %1671  ;;  %v757_v43 = vadd.f32 1.0, %v1670_v40 }
 0xc57   :  { %v765_v44 = vadd.f32 1.0, %v1672_v41  ;;  %v1674_v45 = vpop.eup %1673 }
 0xc58   :  { %1677 = vrcp.f32 %v757_v43  ;;  %v1676_v46 = vpop.eup %1675 }
 0xc59   :  { %1679 = vrcp.f32 %v765_v44 }
 0xc62   :  { %v1678_v47 = vpop.eup %1677 }
 0xc63   :  { %v1680_v48 = vpop.eup %1679  ;;  %v760_v49 = vsel %vm1868_vm4, %v1674_v45, %v1678_v47 }
 0xc64   :  { %775 = vrot.lane.b32.xlu0 %v760_v49, %s1735_s25  ;;  %v768_v50 = vsel %vm1868_vm4, %v1676_v46, %v1680_v48 }
 0xc65   :  { %786 = vrot.lane.b32.xlu1 %v768_v50, %s1735_s25  ;;  %v784_v58 = vmul.f32 %v768_v50, %v671_v51 }
 0xc68   :  { %770 = vrot.lane.b32.xlu0 %v671_v51, %s1734_s17 }
 0xcd6   :  { %v776_v52 = vpop.permute.xlu0 %775 }
 0xcd7   :  { %v778_v53 = vmul.f32 %v776_v52, %v760_v49  ;;  %v787_v54 = vpop.permute.xlu1 %786  ;;  %v1059_v52 = vld [vmem:[%s2160_s0 + $0x10] sm:$0x30] }
 0xcd8   :  { %v789_v55 = vmul.f32 %v787_v54, %v768_v50  ;;  %v1062_v54 = vrot.slane %v1059_v52, 4 }
 0xcd9   :  { %780 = vrot.lane.b32.xlu1 %v778_v53, %s1734_s17  ;;  %v1060_v53 = vld [vmem:[%s2160_s0 + $0x8] sm:$0xc] }
 0xcda   :  { %791 = vrot.lane.b32.xlu0 %v789_v55, %s1734_s17  ;;  %v771_v56 = vpop.permute.xlu0 %770  ;;  %v1066_v55 = vrot.slane %v1060_v53, 2 }
 0xcdb   :  { %v773_v4 = vmul.f32 %v771_v56, %v760_v49 }
 0xd4b   :  { %v781_v57 = vpop.permute.xlu1 %780 }
 0xd4c   :  { %v783_v59 = vadd.f32 %v781_v57, %v773_v4  ;;  %v792_v60 = vpop.permute.xlu0 %791 }
 0xd4d   :  { %v794_v61 = vadd.f32 %v792_v60, %v784_v58 }
 0xd4e   :  { %1681 = vtanh.f32 %v783_v59 }
 0xd4f   :  { %1683 = vtanh.f32 %v794_v61 }
 0xd58   :  { %v1682_v62 = vpop.eup %1681 }
 0xd59   :  { %v1684_v63 = vpop.eup %1683  ;;  %797 = vrot.lane.b32.xlu1 %v1682_v62, %s1735_s25 }
 0xd5a   :  { %803 = vrot.lane.b32.xlu0 %v1684_v63, %s1735_s25 }
 0xdcb   :  { %v798_v0 = vpop.permute.xlu1 %797 }
 0xdcc   :  { %v800_v1 = vmul.f32 %v798_v0, %v760_v49  ;;  %v804_v2 = vpop.permute.xlu0 %803 }
 0xdcd   :  { %v806_v5 = vmul.f32 %v804_v2, %v768_v50 }
 0xdce   :  { %814 = vrot.lane.b32.xlu1 %v800_v1, %s1734_s17 }
 0xdcf   :  { %819 = vrot.lane.b32.xlu0 %v806_v5, %s1735_s25 }
 0xdd2   :  { %808 = vrot.lane.b32.xlu1 %v783_v59, %s1736_s26 }
 0xe40   :  { %v815_v6 = vpop.permute.xlu1 %814 }
 0xe41   :  { %817 = vst.msk [vmem:[#allocation3] sm:$0x3] %vm183_vm5, %v815_v6  ;;  %823 = vst.msk [vmem:[#allocation2 + $0x8] sm:$0x3] %vm183_vm5, %v815_v6  ;;  %v820_v7 = vpop.permute.xlu0 %819 }
 0xe42   :  { %822 = vst.msk [vmem:[#allocation3] sm:$0x3] %vm185_vm6, %v820_v7  ;;  %824 = vst.msk [vmem:[#allocation2 + $0x6] sm:$0x3] %vm185_vm6, %v820_v7 }
 0xe44   :  { %v809_v10 = vpop.permute.xlu1 %808 }
 0xe45   :  { %811 = vst.msk [vmem:[#allocation4] sm:$0x3] %vm183_vm5, %v809_v10 }
 0xe46   :  { %812 = vst.msk [vmem:[#allocation4] sm:$0x3] %vm185_vm6, %v794_v61 }
 0xe49   :  { %v825_v11 = vld [vmem:[#allocation3] sm:$0x3] }
 0xe4a   :  { %1416 = vmatmul.mubr.msk.f32.vlgmr.msra.gmra.mrb[4].mxu1 %vm43_vm1, %v825_v11 }
 0xe4b   :  { %1572 = vmatpush1.bf16.msra.mxu1 %v1786_v8  ;;  %1210 = vmatprep.mubr.f32.mxu1 %v1733_v3  ;;  %v902_v3 = vld [vmem:[%s2160_s0 + $0x8] sm:$0x30]  ;;  %v904_v8 = vrot.slane %v901_v12, 2 }
 0xe4c   :  { %1574 = vmatprep.subr.bf16.mxu1 %v1788_v9  ;;  %v908_v9 = vrot.slane %v902_v3, 4 }
 0xe4d   :  { %v826_v29 = vld [vmem:[#allocation4] sm:$0x3] }
 0xe4f   :  { %1576 = vmatpush1.bf16.msra.mxu1 %v1805_v14 }
 0xe50   :  { %1578 = vmatprep.subr.bf16.mxu1 %v1809_v15 }
 0xe53   :  { %1580 = vmatpush1.bf16.msra.mxu1 %v1827_v21 }
 0xe54   :  { %1582 = vmatprep.subr.bf16.mxu1 %v1832_v22 }
 0xe57   :  { %1584 = vmatpush1.bf16.msra.mxu1 %v1843_v25 }
 0xf1d   :  { %v896_v13 = vpop.f32.mrb[4].mxu1 }
 0xf1e   :  { %v906_v14 = vadd.f32 %v904_v8, %v896_v13  ;;  %v898_v16 = vpop.f32.mrb[5].mxu1 }
 0xf1f   :  { %v910_v15 = vadd.f32 %v908_v9, %v898_v16 }
 0xf20   :  { %v1417_v17 = vmul.f32 -1.442695, %v906_v14 }
 0xf21   :  { %v1418_v21 = vmul.f32 -1.442695, %v910_v15 }
 0xf22   :  { %1685 = vpow2.f32 %v1417_v17 }
 0xf23   :  { %1687 = vpow2.f32 %v1418_v21 }
 0xf24   :  { %1689 = vtanh.f32 %v906_v14 }
 0xf25   :  { %1691 = vtanh.f32 %v910_v15 }
 0xf2c   :  { %v1686_v22 = vpop.eup %1685 }
 0xf2d   :  { %v1688_v25 = vpop.eup %1687  ;;  %v915_v18 = vadd.f32 1.0, %v1686_v22 }
 0xf2e   :  { %v923_v19 = vadd.f32 1.0, %v1688_v25  ;;  %v1690_v20 = vpop.eup %1689 }
 0xf2f   :  { %1693 = vrcp.f32 %v915_v18  ;;  %v1692_v23 = vpop.eup %1691 }
 0xf30   :  { %1695 = vrcp.f32 %v923_v19 }
 0xf39   :  { %v1694_v24 = vpop.eup %1693 }
 0xf3a   :  { %v1696_v26 = vpop.eup %1695  ;;  %v918_v27 = vsel %vm1868_vm4, %v1690_v20, %v1694_v24 }
 0xf3b   :  { %933 = vrot.lane.b32.xlu0 %v918_v27, %s1735_s25  ;;  %v926_v28 = vsel %vm1868_vm4, %v1692_v23, %v1696_v26 }
 0xf3c   :  { %944 = vrot.lane.b32.xlu1 %v926_v28, %s1735_s25  ;;  %v942_v37 = vmul.f32 %v926_v28, %v826_v29 }
 0xf3f   :  { %928 = vrot.lane.b32.xlu0 %v826_v29, %s1734_s17 }
 0xfad   :  { %v934_v30 = vpop.permute.xlu0 %933 }
 0xfae   :  { %v936_v31 = vmul.f32 %v934_v30, %v918_v27  ;;  %v945_v32 = vpop.permute.xlu1 %944  ;;  %v1217_v30 = vld [vmem:[%s2160_s0 + $0x10] sm:$0xc0] }
 0xfaf   :  { %v947_v33 = vmul.f32 %v945_v32, %v926_v28  ;;  %v1218_v32 = vld [vmem:[%s2160_s0 + $0x8] sm:$0x3] }
 0xfb0   :  { %938 = vrot.lane.b32.xlu1 %v936_v31, %s1734_s17  ;;  %v1220_v31 = vrot.slane %v1217_v30, 6 }
 0xfb1   :  { %949 = vrot.lane.b32.xlu0 %v947_v33, %s1734_s17  ;;  %v929_v34 = vpop.permute.xlu0 %928 }
 0xfb2   :  { %v931_v35 = vmul.f32 %v929_v34, %v918_v27 }
0x1022   :  { %v939_v36 = vpop.permute.xlu1 %938 }
0x1023   :  { %v941_v38 = vadd.f32 %v939_v36, %v931_v35  ;;  %v950_v39 = vpop.permute.xlu0 %949 }
0x1024   :  { %v952_v40 = vadd.f32 %v950_v39, %v942_v37 }
0x1025   :  { %1697 = vtanh.f32 %v941_v38 }
0x1026   :  { %1699 = vtanh.f32 %v952_v40 }
0x102f   :  { %v1698_v41 = vpop.eup %1697 }
0x1030   :  { %v1700_v43 = vpop.eup %1699  ;;  %955 = vrot.lane.b32.xlu1 %v1698_v41, %s1735_s25 }
0x1031   :  { %961 = vrot.lane.b32.xlu0 %v1700_v43, %s1735_s25 }
0x10a2   :  { %v956_v44 = vpop.permute.xlu1 %955 }
0x10a3   :  { %v958_v45 = vmul.f32 %v956_v44, %v918_v27  ;;  %v962_v46 = vpop.permute.xlu0 %961 }
0x10a4   :  { %v964_v47 = vmul.f32 %v962_v46, %v926_v28 }
0x10a5   :  { %972 = vrot.lane.b32.xlu1 %v958_v45, %s1734_s17 }
0x10a6   :  { %977 = vrot.lane.b32.xlu0 %v964_v47, %s1735_s25 }
0x10a9   :  { %966 = vrot.lane.b32.xlu1 %v941_v38, %s1736_s26 }
0x1117   :  { %v973_v48 = vpop.permute.xlu1 %972 }
0x1118   :  { %975 = vst.msk [vmem:[#allocation3] sm:$0x3] %vm183_vm5, %v973_v48  ;;  %981 = vst.msk [vmem:[#allocation2 + $0xa] sm:$0x3] %vm183_vm5, %v973_v48  ;;  %v978_v49 = vpop.permute.xlu0 %977 }
0x1119   :  { %980 = vst.msk [vmem:[#allocation3] sm:$0x3] %vm185_vm6, %v978_v49  ;;  %982 = vst.msk [vmem:[#allocation2 + $0x4] sm:$0x3] %vm185_vm6, %v978_v49 }
0x111b   :  { %v967_v50 = vpop.permute.xlu1 %966 }
0x111c   :  { %969 = vst.msk [vmem:[#allocation4] sm:$0x3] %vm183_vm5, %v967_v50 }
0x111d   :  { %970 = vst.msk [vmem:[#allocation4] sm:$0x3] %vm185_vm6, %v952_v40 }
0x1120   :  { %v983_v51 = vld [vmem:[#allocation3] sm:$0x3] }
0x1121   :  { %1419 = vmatmul.mubr.msk.f32.vlgmr.msra.gmra.mrb[6].mxu0 %vm43_vm1, %v983_v51 }
0x1124   :  { %v984_v11 = vld [vmem:[#allocation4] sm:$0x3] }
0x11f4   :  { %v1054_v56 = vpop.f32.mrb[6].mxu0 }
0x11f5   :  { %v1064_v4 = vadd.f32 %v1062_v54, %v1054_v56  ;;  %v1056_v57 = vpop.f32.mrb[7].mxu0 }
0x11f6   :  { %v1068_v58 = vadd.f32 %v1066_v55, %v1056_v57 }
0x11f7   :  { %v1420_v59 = vmul.f32 -1.442695, %v1064_v4 }
0x11f8   :  { %v1421_v60 = vmul.f32 -1.442695, %v1068_v58 }
0x11f9   :  { %1701 = vpow2.f32 %v1420_v59 }
0x11fa   :  { %1703 = vpow2.f32 %v1421_v60  ;;  %v1298_v60 = vld [vmem:[%s2161_s2] sm:$0xff] }
0x11fb   :  { %1705 = vtanh.f32 %v1064_v4 }
0x11fc   :  { %1707 = vtanh.f32 %v1068_v58 }
0x1203   :  { %v1702_v61 = vpop.eup %1701 }
0x1204   :  { %v1704_v62 = vpop.eup %1703  ;;  %v1073_v63 = vadd.f32 1.0, %v1702_v61  ;;  %v1299_v61 = vld [vmem:[%s2161_s2 + $0x8] sm:$0xff] }
0x1205   :  { %v1081_v0 = vadd.f32 1.0, %v1704_v62  ;;  %v1706_v1 = vpop.eup %1705  ;;  %v1300_v62 = vld [vmem:[%s2161_s2 + $0x10] sm:$0xff] }
0x1206   :  { %1709 = vrcp.f32 %v1073_v63  ;;  %v1708_v2 = vpop.eup %1707  ;;  %v1585_v63 = vpack.c.bf16 %v1299_v61, %v1298_v60 }
0x1207   :  { %1711 = vrcp.f32 %v1081_v0  ;;  %v1301_v0 = vld [vmem:[%s2161_s2 + $0x18] sm:$0xff] }
0x1208   :  { %1586 = vmatprep.subr.bf16.mxu0 %v1585_v63 }
0x1209   :  { %1588 = vmatpush3.bf16.msra.mxu0 %v1585_v63 }
0x1210   :  { %v1710_v5 = vpop.eup %1709 }
0x1211   :  { %v1712_v6 = vpop.eup %1711  ;;  %v1076_v7 = vsel %vm1868_vm4, %v1706_v1, %v1710_v5  ;;  %v1589_v1 = vpack.c.bf16 %v1301_v0, %v1300_v62 }
0x1212   :  { %1091 = vrot.lane.b32.xlu0 %v1076_v7, %s1735_s25  ;;  %v1084_v10 = vsel %vm1868_vm4, %v1708_v2, %v1712_v6  ;;  %v1302_v6 = vld [vmem:[%s2161_s2 + $0x20] sm:$0xff] }
0x1213   :  { %1102 = vrot.lane.b32.xlu1 %v1084_v10, %s1735_s25  ;;  %v1100_v15 = vmul.f32 %v1084_v10, %v984_v11  ;;  %1590 = vmatprep.subr.bf16.mxu0 %v1589_v1 }
0x1214   :  { %1592 = vmatpush3.bf16.msra.mxu0 %v1589_v1 }
0x1216   :  { %1086 = vrot.lane.b32.xlu0 %v984_v11, %s1734_s17  ;;  %v1304_v11 = vld [vmem:[%s2161_s2 + $0x30] sm:$0xff] }
0x1284   :  { %v1092_v12 = vpop.permute.xlu0 %1091 }
0x1285   :  { %v1094_v3 = vmul.f32 %v1092_v12, %v1076_v7  ;;  %v1103_v8 = vpop.permute.xlu1 %1102  ;;  %v1305_v12 = vld [vmem:[%s2161_s2 + $0x38] sm:$0xff] }
0x1286   :  { %v1105_v9 = vmul.f32 %v1103_v8, %v1084_v10 }
0x1287   :  { %1096 = vrot.lane.b32.xlu1 %v1094_v3, %s1734_s17  ;;  %v1597_v3 = vpack.c.bf16 %v1305_v12, %v1304_v11 }
0x1288   :  { %1107 = vrot.lane.b32.xlu0 %v1105_v9, %s1734_s17  ;;  %v1087_v13 = vpop.permute.xlu0 %1086 }
0x1289   :  { %v1089_v14 = vmul.f32 %v1087_v13, %v1076_v7 }
0x12f9   :  { %v1097_v16 = vpop.permute.xlu1 %1096 }
0x12fa   :  { %v1099_v17 = vadd.f32 %v1097_v16, %v1089_v14  ;;  %v1108_v21 = vpop.permute.xlu0 %1107 }
0x12fb   :  { %v1110_v22 = vadd.f32 %v1108_v21, %v1100_v15 }
0x12fc   :  { %1713 = vtanh.f32 %v1099_v17 }
0x12fd   :  { %1715 = vtanh.f32 %v1110_v22 }
0x1306   :  { %v1714_v25 = vpop.eup %1713 }
0x1307   :  { %v1716_v18 = vpop.eup %1715  ;;  %1113 = vrot.lane.b32.xlu1 %v1714_v25, %s1735_s25  ;;  %v1425_v25 = vld [vmem:[%s2162_s3] ss:$0 sm:$0xff] }
0x1308   :  { %1119 = vrot.lane.b32.xlu0 %v1716_v18, %s1735_s25 }
0x1379   :  { %v1114_v19 = vpop.permute.xlu1 %1113 }
0x137a   :  { %v1116_v20 = vmul.f32 %v1114_v19, %v1076_v7  ;;  %v1120_v23 = vpop.permute.xlu0 %1119  ;;  %v1303_v7 = vld [vmem:[%s2161_s2 + $0x28] sm:$0xff] }
0x137b   :  { %v1122_v24 = vmul.f32 %v1120_v23, %v1084_v10  ;;  %v1593_v10 = vpack.c.bf16 %v1303_v7, %v1302_v6 }
0x137c   :  { %1130 = vrot.lane.b32.xlu1 %v1116_v20, %s1734_s17 }
0x137d   :  { %1135 = vrot.lane.b32.xlu0 %v1122_v24, %s1735_s25  ;;  %1594 = vmatprep.subr.bf16.mxu0 %v1593_v10 }
0x137e   :  { %1596 = vmatpush3.bf16.msra.mxu0 %v1593_v10 }
0x137f   :  { %1598 = vmatprep.subr.bf16.mxu0 %v1597_v3 }
0x1380   :  { %1124 = vrot.lane.b32.xlu1 %v1099_v17, %s1736_s26 }
0x1382   :  { %1600 = vmatpush3.bf16.msra.mxu0 %v1597_v3 }
0x13ee   :  { %v1131_v26 = vpop.permute.xlu1 %1130 }
0x13ef   :  { %1133 = vst.msk [vmem:[#allocation3] sm:$0x3] %vm183_vm5, %v1131_v26  ;;  %1139 = vst.msk [vmem:[#allocation2 + $0xc] sm:$0x3] %vm183_vm5, %v1131_v26  ;;  %v1136_v27 = vpop.permute.xlu0 %1135 }
0x13f0   :  { %1138 = vst.msk [vmem:[#allocation3] sm:$0x3] %vm185_vm6, %v1136_v27  ;;  %1140 = vst.msk [vmem:[#allocation2 + $0x2] sm:$0x3] %vm185_vm6, %v1136_v27 }
0x13f2   :  { %v1125_v28 = vpop.permute.xlu1 %1124 }
0x13f3   :  { %1127 = vst.msk [vmem:[#allocation4] sm:$0x3] %vm183_vm5, %v1125_v28 }
0x13f4   :  { %1128 = vst.msk [vmem:[#allocation4] sm:$0x3] %vm185_vm6, %v1110_v22 }
0x13f7   :  { %v1141_v29 = vld [vmem:[#allocation3] sm:$0x3] }
0x13f8   :  { %1422 = vmatmul.mubr.msk.f32.vlgmr.msra.gmra.mrb[6].mxu1 %vm43_vm1, %v1141_v29 }
0x13fb   :  { %v1142_v50 = vld [vmem:[#allocation4] sm:$0x3] }
0x14cb   :  { %v1212_v33 = vpop.f32.mrb[6].mxu1 }
0x14cc   :  { %v1222_v34 = vadd.f32 %v1220_v31, %v1212_v33  ;;  %v1214_v35 = vpop.f32.mrb[7].mxu1 }
0x14cd   :  { %v1223_v36 = vadd.f32 %v1218_v32, %v1214_v35 }
0x14ce   :  { %v1423_v37 = vmul.f32 -1.442695, %v1222_v34 }
0x14cf   :  { %v1424_v38 = vmul.f32 -1.442695, %v1223_v36 }
0x14d0   :  { %1717 = vpow2.f32 %v1423_v37 }
0x14d1   :  { %1719 = vpow2.f32 %v1424_v38 }
0x14d2   :  { %1721 = vtanh.f32 %v1222_v34 }
0x14d3   :  { %1723 = vtanh.f32 %v1223_v36 }
0x14da   :  { %v1718_v39 = vpop.eup %1717 }
0x14db   :  { %v1720_v40 = vpop.eup %1719  ;;  %v1228_v41 = vadd.f32 1.0, %v1718_v39 }
0x14dc   :  { %v1236_v43 = vadd.f32 1.0, %v1720_v40  ;;  %v1722_v44 = vpop.eup %1721 }
0x14dd   :  { %1725 = vrcp.f32 %v1228_v41  ;;  %v1724_v45 = vpop.eup %1723 }
0x14de   :  { %1727 = vrcp.f32 %v1236_v43 }
0x14e7   :  { %v1726_v46 = vpop.eup %1725 }
0x14e8   :  { %v1728_v47 = vpop.eup %1727  ;;  %v1231_v48 = vsel %vm1868_vm4, %v1722_v44, %v1726_v46 }
0x14e9   :  { %1246 = vrot.lane.b32.xlu1 %v1231_v48, %s1735_s25  ;;  %v1239_v49 = vsel %vm1868_vm4, %v1724_v45, %v1728_v47 }
0x14ea   :  { %1257 = vrot.lane.b32.xlu0 %v1239_v49, %s1735_s25  ;;  %v1255_v57 = vmul.f32 %v1239_v49, %v1142_v50 }
0x14ee   :  { %1241 = vrot.lane.b32.xlu0 %v1142_v50, %s1734_s17 }
0x155b   :  { %v1247_v51 = vpop.permute.xlu1 %1246 }
0x155c   :  { %v1249_v52 = vmul.f32 %v1247_v51, %v1231_v48  ;;  %v1258_v53 = vpop.permute.xlu0 %1257 }
0x155d   :  { %v1260_v54 = vmul.f32 %v1258_v53, %v1239_v49 }
0x155e   :  { %1251 = vrot.lane.b32.xlu0 %v1249_v52, %s1734_s17 }
0x155f   :  { %1262 = vrot.lane.b32.xlu1 %v1260_v54, %s1734_s17 }
0x1560   :  { %v1242_v55 = vpop.permute.xlu0 %1241 }
0x1561   :  { %v1244_v56 = vmul.f32 %v1242_v55, %v1231_v48 }
0x15d0   :  { %v1252_v4 = vpop.permute.xlu0 %1251 }
0x15d1   :  { %v1254_v58 = vadd.f32 %v1252_v4, %v1244_v56  ;;  %v1263_v42 = vpop.permute.xlu1 %1262 }
0x15d2   :  { %v1265_v59 = vadd.f32 %v1263_v42, %v1255_v57 }
0x15d3   :  { %1729 = vtanh.f32 %v1254_v58 }
0x15d4   :  { %1731 = vtanh.f32 %v1265_v59 }
0x15dd   :  { %v1730_v2 = vpop.eup %1729 }
0x15de   :  { %v1732_v5 = vpop.eup %1731  ;;  %1268 = vrot.lane.b32.xlu0 %v1730_v2, %s1735_s25 }
0x15df   :  { %1274 = vrot.lane.b32.xlu1 %v1732_v5, %s1735_s25 }
0x1650   :  { %v1269_v8 = vpop.permute.xlu0 %1268 }
0x1651   :  { %v1271_v9 = vmul.f32 %v1269_v8, %v1231_v48  ;;  %v1275_v13 = vpop.permute.xlu1 %1274 }
0x1652   :  { %v1277_v14 = vmul.f32 %v1275_v13, %v1239_v49 }
0x1653   :  { %1285 = vrot.lane.b32.xlu0 %v1271_v9, %s1734_s17 }
0x1654   :  { %1290 = vrot.lane.b32.xlu1 %v1277_v14, %s1735_s25 }
0x1658   :  { %1279 = vrot.lane.b32.xlu1 %v1254_v58, %s1736_s26 }
0x16c5   :  { %v1286_v16 = vpop.permute.xlu0 %1285 }
0x16c6   :  { %1288 = vst.msk [vmem:[#allocation3] sm:$0x3] %vm183_vm5, %v1286_v16  ;;  %1294 = vst.msk [vmem:[#allocation2 + $0xe] sm:$0x3] %vm183_vm5, %v1286_v16  ;;  %v1291_v15 = vpop.permute.xlu1 %1290 }
0x16c7   :  { %1293 = vst.msk [vmem:[#allocation3] sm:$0x3] %vm185_vm6, %v1291_v15  ;;  %1295 = vst.msk [vmem:[#allocation2] sm:$0x3] %vm185_vm6, %v1291_v15 }
0x16ca   :  { %v1280_v17 = vpop.permute.xlu1 %1279 }
0x16cb   :  { %1282 = vst.msk [vmem:[#allocation4] sm:$0x3] %vm183_vm5, %v1280_v17 }
0x16cc   :  { %1283 = vst.msk [vmem:[#allocation4] sm:$0x3] %vm185_vm6, %v1265_v59 }
0x16cd   :  { %v1297_v22 = vld [vmem:[#allocation2 + $0x8] sm:$0xff] }
0x16ce   :  { %v1296_v21 = vld [vmem:[#allocation2] sm:$0xff] }
0x16cf   :  { %1454 = vmatprep.mubr.msk.f32.mxu0 %vm43_vm1, %v1296_v21 }
0x16d0   :  { %1455 = vmatmul.mubr.msk.f32.vlgmr.msra.gmra.mrb[8].mxu0 %vm43_vm1, %v1297_v22 }
0x17a3   :  { %v1456_v18 = vpop.f32.mrb[8].mxu0 }
0x17a4   :  { %v1391_v19 = vadd.f32 %v1456_v18, %v1425_v25  ;;  %v1385_v20 = vpop.f32.mrb[9].mxu0 }
0x17a5   :  { %v1386_v23 = vadd.f32 %v1425_v25, %v1385_v20 }
0x17a6   :  { %1396 = vst.msk [vmem:[%s2163_s4 + $0x8] sm:$0xff] %vm1394_vm7, %v1391_v19 }
0x17a7   :  { %1395 = vst.msk [vmem:[%s2163_s4] sm:$0xff] %vm1394_vm7, %v1386_v23 }

</bundles_post_ra>
